<compile_context>
chip_gen: v6e
topology: v6e:2x2x1
jax: 0.10.0
libtpu: 0.0.40
codegen_flags: <defaults>
</compile_context>

<pallas_src>
import jax
import jax.numpy as jnp
from jax.experimental import pallas as pl
from jax.experimental.pallas import tpu as pltpu

NUM_CLASSES = (5, 3, 2, 3, 3, 3, 3, 2)   # the 8 classifier heads
FEAT = 512                               # per-backbone feature dim (resnet18)
HIDDEN = 512                             # hidden width of each _make_fc head
C_PAD = 32                               # padded logit width (>= max(NUM_CLASSES))
HEADS_PER_STEP = 4                       # heads fused per grid step -> grid=(2,)


def _heads_kernel(derm_ref, clinic_ref,
                  w1d_ref, w1c_ref, s1d_ref, s1c_ref, b1_ref,
                  w2_ref, s2_ref, b2_ref, out_ref):
    """One grid step == HEADS_PER_STEP fused classifier heads."""
    # Cast the tiny (B, FEAT) activations to bf16 once per step; MXU is
    # natively bf16 and accumulation stays in f32.
    derm = derm_ref[...].astype(jnp.bfloat16)
    clinic = clinic_ref[...].astype(jnp.bfloat16)

    for g in range(HEADS_PER_STEP):          # static unrolled loop (G = 4)
        # int8 -> bf16 dequant on the VPU (idle in this DMA-bound kernel);
        # the per-head scale is applied once to the small f32 accumulator.
        w1d = w1d_ref[g].astype(jnp.float32).astype(jnp.bfloat16)
        w1c = w1c_ref[g].astype(jnp.float32).astype(jnp.bfloat16)
        # Linear(2*FEAT, HIDDEN): torch.cat + matmul rewritten as a split
        # matmul (no per-step (B, 2*FEAT) concat buffer rebuild).
        h = (jnp.dot(derm, w1d, preferred_element_type=jnp.float32) * s1d_ref[g]
             + jnp.dot(clinic, w1c, preferred_element_type=jnp.float32) * s1c_ref[g]
             + b1_ref[g])
        h = jnp.maximum(h, 0.0)              # ReLU  (Dropout is identity in eval)
        h = h.astype(jnp.bfloat16)
        # Linear(HIDDEN, num_classes), padded to C_PAD columns (pad cols are 0).
        w2 = w2_ref[g].astype(jnp.float32).astype(jnp.bfloat16)
        out = jnp.dot(h, w2, preferred_element_type=jnp.float32) * s2_ref[g] + b2_ref[g]
        out_ref[g] = out.astype(out_ref.dtype)


def baseline_mlp2_heads(derm_feats, clinic_feats, params):
    """feats: (B, FEAT) f32 each; int8 weights + f32 per-head scales + f32 biases."""
    B, F = derm_feats.shape
    n_heads = params["w1d"].shape[0]
    G = HEADS_PER_STEP
    assert n_heads % G == 0

    out = pl.pallas_call(
        _heads_kernel,
        out_shape=jax.ShapeDtypeStruct((n_heads, B, C_PAD), jnp.float32),
        grid_spec=pltpu.PrefetchScalarGridSpec(
            num_scalar_prefetch=0,
            grid=(n_heads // G,),
            in_specs=[
                pl.BlockSpec((B, F), lambda s: (0, 0)),                 # derm feats
                pl.BlockSpec((B, F), lambda s: (0, 0)),                 # clinic feats
                pl.BlockSpec((G, F, HIDDEN), lambda s: (s, 0, 0)),      # W1 derm half (int8)
                pl.BlockSpec((G, F, HIDDEN), lambda s: (s, 0, 0)),      # W1 clinic half (int8)
                pl.BlockSpec((G, 1, 1), lambda s: (s, 0, 0)),           # scale W1 derm
                pl.BlockSpec((G, 1, 1), lambda s: (s, 0, 0)),           # scale W1 clinic
                pl.BlockSpec((G, 1, HIDDEN), lambda s: (s, 0, 0)),      # b1
                pl.BlockSpec((G, HIDDEN, C_PAD), lambda s: (s, 0, 0)),  # W2 (int8)
                pl.BlockSpec((G, 1, 1), lambda s: (s, 0, 0)),           # scale W2
                pl.BlockSpec((G, 1, C_PAD), lambda s: (s, 0, 0)),       # b2
            ],
            out_specs=pl.BlockSpec((G, B, C_PAD), lambda s: (s, 0, 0)),
        ),
        compiler_params=pltpu.CompilerParams(
            dimension_semantics=("parallel",)),
    )(derm_feats, clinic_feats,
      params["w1d"], params["w1c"], params["s1d"], params["s1c"], params["b1"],
      params["w2"], params["s2"], params["b2"])

    # Per-head logits sliced to each head's true class count, mirroring
    # `[classify(feats) for classify in self.classifier]`.
    return [out[i, :, :nc] for i, nc in enumerate(NUM_CLASSES)]


def _quantize_per_head(w):
    """(n, K, N) f32 -> (int8 weights, (n,1,1) f32 scale), symmetric per-head."""
    amax = jnp.max(jnp.abs(w), axis=(1, 2), keepdims=True)
    scale = jnp.maximum(amax, 1e-12) / 127.0
    q = jnp.clip(jnp.round(w / scale), -127.0, 127.0).astype(jnp.int8)
    return q, scale.astype(jnp.float32)


def init_params(key):
    """Deterministic init mirroring _init_fc: W ~ N(0, 0.01), b = 0.

    W1 is split into its derm / clinic halves; weights are stored int8 with a
    per-head f32 scale (HBM bandwidth), biases in f32 (added to the f32 acc).
    The f32 master weights are also returned for fidelity checking.
    """
    n = len(NUM_CLASSES)
    k1, k2, k3 = jax.random.split(key, 3)
    w1d_f = jax.random.normal(k1, (n, FEAT, HIDDEN), jnp.float32) * 0.01
    w1c_f = jax.random.normal(k2, (n, FEAT, HIDDEN), jnp.float32) * 0.01
    b1 = jnp.zeros((n, 1, HIDDEN), jnp.float32)
    w2_full = jax.random.normal(k3, (n, HIDDEN, C_PAD), jnp.float32) * 0.01
    # Zero the padded class columns so they contribute nothing.
    col = jnp.arange(C_PAD)[None, None, :]
    ncs = jnp.array(NUM_CLASSES, jnp.int32)[:, None, None]
    w2_f = jnp.where(col < ncs, w2_full, 0.0)
    b2 = jnp.zeros((n, 1, C_PAD), jnp.float32)

    w1d, s1d = _quantize_per_head(w1d_f)
    w1c, s1c = _quantize_per_head(w1c_f)
    w2, s2 = _quantize_per_head(w2_f)

    params = dict(w1d=w1d, w1c=w1c, s1d=s1d, s1c=s1c, b1=b1,
                  w2=w2, s2=s2, b2=b2)
    master = dict(w1d=w1d_f, w1c=w1c_f, b1=b1, w2=w2_f, b2=b2)
    return params, master


def reference_heads_quant(derm_feats, clinic_feats, p):
    """Pure-JAX reference using the SAME int8+scale / bf16 math as the kernel."""
    d = derm_feats.astype(jnp.bfloat16)
    c = clinic_feats.astype(jnp.bfloat16)
    outs = []
    for i, nc in enumerate(NUM_CLASSES):
        w1d = p["w1d"][i].astype(jnp.float32).astype(jnp.bfloat16)
        w1c = p["w1c"][i].astype(jnp.float32).astype(jnp.bfloat16)
        w2 = p["w2"][i].astype(jnp.float32).astype(jnp.bfloat16)
        h = (jnp.dot(d, w1d, preferred_element_type=jnp.float32) * p["s1d"][i, 0, 0]
             + jnp.dot(c, w1c, preferred_element_type=jnp.float32) * p["s1c"][i, 0, 0]
             + p["b1"][i, 0])
        h = jnp.maximum(h, 0.0).astype(jnp.bfloat16)
        o = jnp.dot(h, w2, preferred_element_type=jnp.float32) * p["s2"][i, 0, 0] + p["b2"][i, 0]
        outs.append(o[:, :nc])
    return outs


def reference_heads_f32(derm_feats, clinic_feats, m):
    """Full-precision f32 reference (the original PyTorch classifier math)."""
    outs = []
    for i, nc in enumerate(NUM_CLASSES):
        h = (jnp.dot(derm_feats, m["w1d"][i]) + jnp.dot(clinic_feats, m["w1c"][i])
             + m["b1"][i, 0])
        h = jnp.maximum(h, 0.0)
        o = jnp.dot(h, m["w2"][i]) + m["b2"][i, 0]
        outs.append(o[:, :nc])
    return outs


if __name__ == "__main__":
    B = 2
    key = jax.random.PRNGKey(0)
    k_derm, k_clinic, k_params = jax.random.split(key, 3)

    # Stand-ins for derm_backbone(x[0]) / clinic_backbone(x[1]) pooled features.
    derm_feats = jax.random.normal(k_derm, (B, FEAT), jnp.float32)
    clinic_feats = jax.random.normal(k_clinic, (B, FEAT), jnp.float32)

    params, master = init_params(k_params)

    outs = baseline_mlp2_heads(derm_feats, clinic_feats, params)
    outs = [jax.block_until_ready(o) for o in outs]

    refs_q = reference_heads_quant(derm_feats, clinic_feats, params)
    refs_f32 = reference_heads_f32(derm_feats, clinic_feats, master)
    for o, rq, rf, nc in zip(outs, refs_q, refs_f32, NUM_CLASSES):
        assert o.shape == (B, nc), (o.shape, nc)
        # Tight check vs the bit-matched quantized reference.
        assert jnp.allclose(o, rq, atol=2e-3, rtol=2e-2), "mismatch vs quantized reference"
        # Fidelity check vs the true f32 classifier (int8+bf16 quantization noise).
        assert jnp.allclose(o, rf, atol=2e-2, rtol=2e-1), "mismatch vs f32 reference"

    print("KERNEL_OK")
</pallas_src>

<mosaic_0001>
module attributes {stable_mosaic.version = 11 : i64} {
  func.func @_heads_kernel(%arg0: i32, %arg1: memref<2x512xf32, #tpu.memory_space<vmem>>, %arg2: memref<2x512xf32, #tpu.memory_space<vmem>>, %arg3: memref<4x512x512xi8, #tpu.memory_space<vmem>>, %arg4: memref<4x512x512xi8, #tpu.memory_space<vmem>>, %arg5: memref<4x1x1xf32, #tpu.memory_space<vmem>>, %arg6: memref<4x1x1xf32, #tpu.memory_space<vmem>>, %arg7: memref<4x1x512xf32, #tpu.memory_space<vmem>>, %arg8: memref<4x512x32xi8, #tpu.memory_space<vmem>>, %arg9: memref<4x1x1xf32, #tpu.memory_space<vmem>>, %arg10: memref<4x1x32xf32, #tpu.memory_space<vmem>>, %arg11: memref<4x2x32xf32, #tpu.memory_space<vmem>>) attributes {dimension_semantics = [#tpu.dimension_semantics<parallel>], iteration_bounds = array<i64: 2>, scalar_prefetch = 0 : i64, scratch_operands = 0 : i64, tpu.core_type = #tpu.core_type<tc>, window_params = [{pipeline_mode = #tpu.pipeline_mode<synchronous>, transform_indices = @transform_0, window_bounds = array<i64: 2, 512>}, {pipeline_mode = #tpu.pipeline_mode<synchronous>, transform_indices = @transform_1, window_bounds = array<i64: 2, 512>}, {transform_indices = @transform_2, window_bounds = array<i64: 4, 512, 512>}, {transform_indices = @transform_3, window_bounds = array<i64: 4, 512, 512>}, {transform_indices = @transform_4, window_bounds = array<i64: 4, 1, 1>}, {transform_indices = @transform_5, window_bounds = array<i64: 4, 1, 1>}, {transform_indices = @transform_6, window_bounds = array<i64: 4, 1, 512>}, {transform_indices = @transform_7, window_bounds = array<i64: 4, 512, 32>}, {transform_indices = @transform_8, window_bounds = array<i64: 4, 1, 1>}, {transform_indices = @transform_9, window_bounds = array<i64: 4, 1, 32>}, {transform_indices = @transform_10, window_bounds = array<i64: 4, 2, 32>}]} {
    %c0 = arith.constant 0 : index
    %c0_0 = arith.constant 0 : index
    %0 = vector.load %arg1[%c0, %c0_0] : memref<2x512xf32, #tpu.memory_space<vmem>>, vector<2x512xf32>
    %1 = arith.truncf %0 : vector<2x512xf32> to vector<2x512xbf16>
    %c0_1 = arith.constant 0 : index
    %c0_2 = arith.constant 0 : index
    %2 = vector.load %arg2[%c0_1, %c0_2] : memref<2x512xf32, #tpu.memory_space<vmem>>, vector<2x512xf32>
    %3 = arith.truncf %2 : vector<2x512xf32> to vector<2x512xbf16>
    %c0_3 = arith.constant 0 : index
    %c0_4 = arith.constant 0 : index
    %c0_5 = arith.constant 0 : index
    %4 = vector.load %arg3[%c0_3, %c0_4, %c0_5] : memref<4x512x512xi8, #tpu.memory_space<vmem>>, vector<1x512x512xi8>
    %5 = vector.shape_cast %4 : vector<1x512x512xi8> to vector<512x512xi8>
    %6 = arith.sitofp %5 : vector<512x512xi8> to vector<512x512xf32>
    %7 = arith.truncf %6 : vector<512x512xf32> to vector<512x512xbf16>
    %c0_6 = arith.constant 0 : index
    %c0_7 = arith.constant 0 : index
    %c0_8 = arith.constant 0 : index
    %8 = vector.load %arg4[%c0_6, %c0_7, %c0_8] : memref<4x512x512xi8, #tpu.memory_space<vmem>>, vector<1x512x512xi8>
    %9 = vector.shape_cast %8 : vector<1x512x512xi8> to vector<512x512xi8>
    %10 = arith.sitofp %9 : vector<512x512xi8> to vector<512x512xf32>
    %11 = arith.truncf %10 : vector<512x512xf32> to vector<512x512xbf16>
    %cst = arith.constant dense<0.000000e+00> : vector<2x512xf32>
    %12 = tpu.matmul %1, %7, %cst {dimension_numbers = #tpu.dot_dimension_numbers<[1], [0], [0], [1], [0, 0, 1, 1], [], []>} : vector<2x512xbf16>, vector<512x512xbf16>, vector<2x512xf32> -> vector<2x512xf32>
    %c0_9 = arith.constant 0 : index
    %c0_10 = arith.constant 0 : index
    %c0_11 = arith.constant 0 : index
    %13 = vector.load %arg5[%c0_9, %c0_10, %c0_11] : memref<4x1x1xf32, #tpu.memory_space<vmem>>, vector<1x1x1xf32>
    %14 = vector.shape_cast %13 : vector<1x1x1xf32> to vector<1x1xf32>
    %15 = vector.broadcast %14 : vector<1x1xf32> to vector<2x512xf32>
    %16 = arith.mulf %12, %15 : vector<2x512xf32>
    %cst_12 = arith.constant dense<0.000000e+00> : vector<2x512xf32>
    %17 = tpu.matmul %3, %11, %cst_12 {dimension_numbers = #tpu.dot_dimension_numbers<[1], [0], [0], [1], [0, 0, 1, 1], [], []>} : vector<2x512xbf16>, vector<512x512xbf16>, vector<2x512xf32> -> vector<2x512xf32>
    %c0_13 = arith.constant 0 : index
    %c0_14 = arith.constant 0 : index
    %c0_15 = arith.constant 0 : index
    %18 = vector.load %arg6[%c0_13, %c0_14, %c0_15] : memref<4x1x1xf32, #tpu.memory_space<vmem>>, vector<1x1x1xf32>
    %19 = vector.shape_cast %18 : vector<1x1x1xf32> to vector<1x1xf32>
    %20 = vector.broadcast %19 : vector<1x1xf32> to vector<2x512xf32>
    %21 = arith.mulf %17, %20 : vector<2x512xf32>
    %22 = arith.addf %16, %21 : vector<2x512xf32>
    %c0_16 = arith.constant 0 : index
    %c0_17 = arith.constant 0 : index
    %c0_18 = arith.constant 0 : index
    %23 = vector.load %arg7[%c0_16, %c0_17, %c0_18] : memref<4x1x512xf32, #tpu.memory_space<vmem>>, vector<1x1x512xf32>
    %24 = vector.shape_cast %23 : vector<1x1x512xf32> to vector<1x512xf32>
    %25 = vector.broadcast %24 : vector<1x512xf32> to vector<2x512xf32>
    %26 = arith.addf %22, %25 : vector<2x512xf32>
    %cst_19 = arith.constant 0.000000e+00 : f32
    %27 = vector.broadcast %cst_19 : f32 to vector<2x512xf32>
    %28 = arith.maximumf %26, %27 : vector<2x512xf32>
    %29 = arith.truncf %28 : vector<2x512xf32> to vector<2x512xbf16>
    %c0_20 = arith.constant 0 : index
    %c0_21 = arith.constant 0 : index
    %c0_22 = arith.constant 0 : index
    %30 = vector.load %arg8[%c0_20, %c0_21, %c0_22] : memref<4x512x32xi8, #tpu.memory_space<vmem>>, vector<1x512x32xi8>
    %31 = vector.shape_cast %30 : vector<1x512x32xi8> to vector<512x32xi8>
    %32 = arith.sitofp %31 : vector<512x32xi8> to vector<512x32xf32>
    %33 = arith.truncf %32 : vector<512x32xf32> to vector<512x32xbf16>
    %cst_23 = arith.constant dense<0.000000e+00> : vector<2x32xf32>
    %34 = tpu.matmul %29, %33, %cst_23 {dimension_numbers = #tpu.dot_dimension_numbers<[1], [0], [0], [1], [0, 0, 1, 1], [], []>} : vector<2x512xbf16>, vector<512x32xbf16>, vector<2x32xf32> -> vector<2x32xf32>
    %c0_24 = arith.constant 0 : index
    %c0_25 = arith.constant 0 : index
    %c0_26 = arith.constant 0 : index
    %35 = vector.load %arg9[%c0_24, %c0_25, %c0_26] : memref<4x1x1xf32, #tpu.memory_space<vmem>>, vector<1x1x1xf32>
    %36 = vector.shape_cast %35 : vector<1x1x1xf32> to vector<1x1xf32>
    %37 = vector.broadcast %36 : vector<1x1xf32> to vector<2x32xf32>
    %38 = arith.mulf %34, %37 : vector<2x32xf32>
    %c0_27 = arith.constant 0 : index
    %c0_28 = arith.constant 0 : index
    %c0_29 = arith.constant 0 : index
    %39 = vector.load %arg10[%c0_27, %c0_28, %c0_29] : memref<4x1x32xf32, #tpu.memory_space<vmem>>, vector<1x1x32xf32>
    %40 = vector.shape_cast %39 : vector<1x1x32xf32> to vector<1x32xf32>
    %41 = vector.broadcast %40 : vector<1x32xf32> to vector<2x32xf32>
    %42 = arith.addf %38, %41 : vector<2x32xf32>
    %c0_30 = arith.constant 0 : index
    %c0_31 = arith.constant 0 : index
    %c0_32 = arith.constant 0 : index
    %43 = vector.load %arg11[%c0_30, %c0_31, %c0_32] : memref<4x2x32xf32, #tpu.memory_space<vmem>>, vector<1x2x32xf32>
    %44 = vector.shape_cast %43 : vector<1x2x32xf32> to vector<2x32xf32>
    %45 = vector.shape_cast %42 : vector<2x32xf32> to vector<1x2x32xf32>
    tpu.vector_store %arg11[%c0_30, %c0_31, %c0_32], %45 {strides = array<i32>} : memref<4x2x32xf32, #tpu.memory_space<vmem>>, vector<1x2x32xf32>,
    %c1 = arith.constant 1 : index
    %c0_33 = arith.constant 0 : index
    %c0_34 = arith.constant 0 : index
    %46 = vector.load %arg3[%c1, %c0_33, %c0_34] : memref<4x512x512xi8, #tpu.memory_space<vmem>>, vector<1x512x512xi8>
    %47 = vector.shape_cast %46 : vector<1x512x512xi8> to vector<512x512xi8>
    %48 = arith.sitofp %47 : vector<512x512xi8> to vector<512x512xf32>
    %49 = arith.truncf %48 : vector<512x512xf32> to vector<512x512xbf16>
    %c1_35 = arith.constant 1 : index
    %c0_36 = arith.constant 0 : index
    %c0_37 = arith.constant 0 : index
    %50 = vector.load %arg4[%c1_35, %c0_36, %c0_37] : memref<4x512x512xi8, #tpu.memory_space<vmem>>, vector<1x512x512xi8>
    %51 = vector.shape_cast %50 : vector<1x512x512xi8> to vector<512x512xi8>
    %52 = arith.sitofp %51 : vector<512x512xi8> to vector<512x512xf32>
    %53 = arith.truncf %52 : vector<512x512xf32> to vector<512x512xbf16>
    %cst_38 = arith.constant dense<0.000000e+00> : vector<2x512xf32>
    %54 = tpu.matmul %1, %49, %cst_38 {dimension_numbers = #tpu.dot_dimension_numbers<[1], [0], [0], [1], [0, 0, 1, 1], [], []>} : vector<2x512xbf16>, vector<512x512xbf16>, vector<2x512xf32> -> vector<2x512xf32>
    %c1_39 = arith.constant 1 : index
    %c0_40 = arith.constant 0 : index
    %c0_41 = arith.constant 0 : index
    %55 = vector.load %arg5[%c1_39, %c0_40, %c0_41] : memref<4x1x1xf32, #tpu.memory_space<vmem>>, vector<1x1x1xf32>
    %56 = vector.shape_cast %55 : vector<1x1x1xf32> to vector<1x1xf32>
    %57 = vector.broadcast %56 : vector<1x1xf32> to vector<2x512xf32>
    %58 = arith.mulf %54, %57 : vector<2x512xf32>
    %cst_42 = arith.constant dense<0.000000e+00> : vector<2x512xf32>
    %59 = tpu.matmul %3, %53, %cst_42 {dimension_numbers = #tpu.dot_dimension_numbers<[1], [0], [0], [1], [0, 0, 1, 1], [], []>} : vector<2x512xbf16>, vector<512x512xbf16>, vector<2x512xf32> -> vector<2x512xf32>
    %c1_43 = arith.constant 1 : index
    %c0_44 = arith.constant 0 : index
    %c0_45 = arith.constant 0 : index
    %60 = vector.load %arg6[%c1_43, %c0_44, %c0_45] : memref<4x1x1xf32, #tpu.memory_space<vmem>>, vector<1x1x1xf32>
    %61 = vector.shape_cast %60 : vector<1x1x1xf32> to vector<1x1xf32>
    %62 = vector.broadcast %61 : vector<1x1xf32> to vector<2x512xf32>
    %63 = arith.mulf %59, %62 : vector<2x512xf32>
    %64 = arith.addf %58, %63 : vector<2x512xf32>
    %c1_46 = arith.constant 1 : index
    %c0_47 = arith.constant 0 : index
    %c0_48 = arith.constant 0 : index
    %65 = vector.load %arg7[%c1_46, %c0_47, %c0_48] : memref<4x1x512xf32, #tpu.memory_space<vmem>>, vector<1x1x512xf32>
    %66 = vector.shape_cast %65 : vector<1x1x512xf32> to vector<1x512xf32>
    %67 = vector.broadcast %66 : vector<1x512xf32> to vector<2x512xf32>
    %68 = arith.addf %64, %67 : vector<2x512xf32>
    %cst_49 = arith.constant 0.000000e+00 : f32
    %69 = vector.broadcast %cst_49 : f32 to vector<2x512xf32>
    %70 = arith.maximumf %68, %69 : vector<2x512xf32>
    %71 = arith.truncf %70 : vector<2x512xf32> to vector<2x512xbf16>
    %c1_50 = arith.constant 1 : index
    %c0_51 = arith.constant 0 : index
    %c0_52 = arith.constant 0 : index
    %72 = vector.load %arg8[%c1_50, %c0_51, %c0_52] : memref<4x512x32xi8, #tpu.memory_space<vmem>>, vector<1x512x32xi8>
    %73 = vector.shape_cast %72 : vector<1x512x32xi8> to vector<512x32xi8>
    %74 = arith.sitofp %73 : vector<512x32xi8> to vector<512x32xf32>
    %75 = arith.truncf %74 : vector<512x32xf32> to vector<512x32xbf16>
    %cst_53 = arith.constant dense<0.000000e+00> : vector<2x32xf32>
    %76 = tpu.matmul %71, %75, %cst_53 {dimension_numbers = #tpu.dot_dimension_numbers<[1], [0], [0], [1], [0, 0, 1, 1], [], []>} : vector<2x512xbf16>, vector<512x32xbf16>, vector<2x32xf32> -> vector<2x32xf32>
    %c1_54 = arith.constant 1 : index
    %c0_55 = arith.constant 0 : index
    %c0_56 = arith.constant 0 : index
    %77 = vector.load %arg9[%c1_54, %c0_55, %c0_56] : memref<4x1x1xf32, #tpu.memory_space<vmem>>, vector<1x1x1xf32>
    %78 = vector.shape_cast %77 : vector<1x1x1xf32> to vector<1x1xf32>
    %79 = vector.broadcast %78 : vector<1x1xf32> to vector<2x32xf32>
    %80 = arith.mulf %76, %79 : vector<2x32xf32>
    %c1_57 = arith.constant 1 : index
    %c0_58 = arith.constant 0 : index
    %c0_59 = arith.constant 0 : index
    %81 = vector.load %arg10[%c1_57, %c0_58, %c0_59] : memref<4x1x32xf32, #tpu.memory_space<vmem>>, vector<1x1x32xf32>
    %82 = vector.shape_cast %81 : vector<1x1x32xf32> to vector<1x32xf32>
    %83 = vector.broadcast %82 : vector<1x32xf32> to vector<2x32xf32>
    %84 = arith.addf %80, %83 : vector<2x32xf32>
    %c1_60 = arith.constant 1 : index
    %c0_61 = arith.constant 0 : index
    %c0_62 = arith.constant 0 : index
    %85 = vector.load %arg11[%c1_60, %c0_61, %c0_62] : memref<4x2x32xf32, #tpu.memory_space<vmem>>, vector<1x2x32xf32>
    %86 = vector.shape_cast %85 : vector<1x2x32xf32> to vector<2x32xf32>
    %87 = vector.shape_cast %84 : vector<2x32xf32> to vector<1x2x32xf32>
    tpu.vector_store %arg11[%c1_60, %c0_61, %c0_62], %87 {strides = array<i32>} : memref<4x2x32xf32, #tpu.memory_space<vmem>>, vector<1x2x32xf32>,
    %c2 = arith.constant 2 : index
    %c0_63 = arith.constant 0 : index
    %c0_64 = arith.constant 0 : index
    %88 = vector.load %arg3[%c2, %c0_63, %c0_64] : memref<4x512x512xi8, #tpu.memory_space<vmem>>, vector<1x512x512xi8>
    %89 = vector.shape_cast %88 : vector<1x512x512xi8> to vector<512x512xi8>
    %90 = arith.sitofp %89 : vector<512x512xi8> to vector<512x512xf32>
    %91 = arith.truncf %90 : vector<512x512xf32> to vector<512x512xbf16>
    %c2_65 = arith.constant 2 : index
    %c0_66 = arith.constant 0 : index
    %c0_67 = arith.constant 0 : index
    %92 = vector.load %arg4[%c2_65, %c0_66, %c0_67] : memref<4x512x512xi8, #tpu.memory_space<vmem>>, vector<1x512x512xi8>
    %93 = vector.shape_cast %92 : vector<1x512x512xi8> to vector<512x512xi8>
    %94 = arith.sitofp %93 : vector<512x512xi8> to vector<512x512xf32>
    %95 = arith.truncf %94 : vector<512x512xf32> to vector<512x512xbf16>
    %cst_68 = arith.constant dense<0.000000e+00> : vector<2x512xf32>
    %96 = tpu.matmul %1, %91, %cst_68 {dimension_numbers = #tpu.dot_dimension_numbers<[1], [0], [0], [1], [0, 0, 1, 1], [], []>} : vector<2x512xbf16>, vector<512x512xbf16>, vector<2x512xf32> -> vector<2x512xf32>
    %c2_69 = arith.constant 2 : index
    %c0_70 = arith.constant 0 : index
    %c0_71 = arith.constant 0 : index
    %97 = vector.load %arg5[%c2_69, %c0_70, %c0_71] : memref<4x1x1xf32, #tpu.memory_space<vmem>>, vector<1x1x1xf32>
    %98 = vector.shape_cast %97 : vector<1x1x1xf32> to vector<1x1xf32>
    %99 = vector.broadcast %98 : vector<1x1xf32> to vector<2x512xf32>
    %100 = arith.mulf %96, %99 : vector<2x512xf32>
    %cst_72 = arith.constant dense<0.000000e+00> : vector<2x512xf32>
    %101 = tpu.matmul %3, %95, %cst_72 {dimension_numbers = #tpu.dot_dimension_numbers<[1], [0], [0], [1], [0, 0, 1, 1], [], []>} : vector<2x512xbf16>, vector<512x512xbf16>, vector<2x512xf32> -> vector<2x512xf32>
    %c2_73 = arith.constant 2 : index
    %c0_74 = arith.constant 0 : index
    %c0_75 = arith.constant 0 : index
    %102 = vector.load %arg6[%c2_73, %c0_74, %c0_75] : memref<4x1x1xf32, #tpu.memory_space<vmem>>, vector<1x1x1xf32>
    %103 = vector.shape_cast %102 : vector<1x1x1xf32> to vector<1x1xf32>
    %104 = vector.broadcast %103 : vector<1x1xf32> to vector<2x512xf32>
    %105 = arith.mulf %101, %104 : vector<2x512xf32>
    %106 = arith.addf %100, %105 : vector<2x512xf32>
    %c2_76 = arith.constant 2 : index
    %c0_77 = arith.constant 0 : index
    %c0_78 = arith.constant 0 : index
    %107 = vector.load %arg7[%c2_76, %c0_77, %c0_78] : memref<4x1x512xf32, #tpu.memory_space<vmem>>, vector<1x1x512xf32>
    %108 = vector.shape_cast %107 : vector<1x1x512xf32> to vector<1x512xf32>
    %109 = vector.broadcast %108 : vector<1x512xf32> to vector<2x512xf32>
    %110 = arith.addf %106, %109 : vector<2x512xf32>
    %cst_79 = arith.constant 0.000000e+00 : f32
    %111 = vector.broadcast %cst_79 : f32 to vector<2x512xf32>
    %112 = arith.maximumf %110, %111 : vector<2x512xf32>
    %113 = arith.truncf %112 : vector<2x512xf32> to vector<2x512xbf16>
    %c2_80 = arith.constant 2 : index
    %c0_81 = arith.constant 0 : index
    %c0_82 = arith.constant 0 : index
    %114 = vector.load %arg8[%c2_80, %c0_81, %c0_82] : memref<4x512x32xi8, #tpu.memory_space<vmem>>, vector<1x512x32xi8>
    %115 = vector.shape_cast %114 : vector<1x512x32xi8> to vector<512x32xi8>
    %116 = arith.sitofp %115 : vector<512x32xi8> to vector<512x32xf32>
    %117 = arith.truncf %116 : vector<512x32xf32> to vector<512x32xbf16>
    %cst_83 = arith.constant dense<0.000000e+00> : vector<2x32xf32>
    %118 = tpu.matmul %113, %117, %cst_83 {dimension_numbers = #tpu.dot_dimension_numbers<[1], [0], [0], [1], [0, 0, 1, 1], [], []>} : vector<2x512xbf16>, vector<512x32xbf16>, vector<2x32xf32> -> vector<2x32xf32>
    %c2_84 = arith.constant 2 : index
    %c0_85 = arith.constant 0 : index
    %c0_86 = arith.constant 0 : index
    %119 = vector.load %arg9[%c2_84, %c0_85, %c0_86] : memref<4x1x1xf32, #tpu.memory_space<vmem>>, vector<1x1x1xf32>
    %120 = vector.shape_cast %119 : vector<1x1x1xf32> to vector<1x1xf32>
    %121 = vector.broadcast %120 : vector<1x1xf32> to vector<2x32xf32>
    %122 = arith.mulf %118, %121 : vector<2x32xf32>
    %c2_87 = arith.constant 2 : index
    %c0_88 = arith.constant 0 : index
    %c0_89 = arith.constant 0 : index
    %123 = vector.load %arg10[%c2_87, %c0_88, %c0_89] : memref<4x1x32xf32, #tpu.memory_space<vmem>>, vector<1x1x32xf32>
    %124 = vector.shape_cast %123 : vector<1x1x32xf32> to vector<1x32xf32>
    %125 = vector.broadcast %124 : vector<1x32xf32> to vector<2x32xf32>
    %126 = arith.addf %122, %125 : vector<2x32xf32>
    %c2_90 = arith.constant 2 : index
    %c0_91 = arith.constant 0 : index
    %c0_92 = arith.constant 0 : index
    %127 = vector.load %arg11[%c2_90, %c0_91, %c0_92] : memref<4x2x32xf32, #tpu.memory_space<vmem>>, vector<1x2x32xf32>
    %128 = vector.shape_cast %127 : vector<1x2x32xf32> to vector<2x32xf32>
    %129 = vector.shape_cast %126 : vector<2x32xf32> to vector<1x2x32xf32>
    tpu.vector_store %arg11[%c2_90, %c0_91, %c0_92], %129 {strides = array<i32>} : memref<4x2x32xf32, #tpu.memory_space<vmem>>, vector<1x2x32xf32>,
    %c3 = arith.constant 3 : index
    %c0_93 = arith.constant 0 : index
    %c0_94 = arith.constant 0 : index
    %130 = vector.load %arg3[%c3, %c0_93, %c0_94] : memref<4x512x512xi8, #tpu.memory_space<vmem>>, vector<1x512x512xi8>
    %131 = vector.shape_cast %130 : vector<1x512x512xi8> to vector<512x512xi8>
    %132 = arith.sitofp %131 : vector<512x512xi8> to vector<512x512xf32>
    %133 = arith.truncf %132 : vector<512x512xf32> to vector<512x512xbf16>
    %c3_95 = arith.constant 3 : index
    %c0_96 = arith.constant 0 : index
    %c0_97 = arith.constant 0 : index
    %134 = vector.load %arg4[%c3_95, %c0_96, %c0_97] : memref<4x512x512xi8, #tpu.memory_space<vmem>>, vector<1x512x512xi8>
    %135 = vector.shape_cast %134 : vector<1x512x512xi8> to vector<512x512xi8>
    %136 = arith.sitofp %135 : vector<512x512xi8> to vector<512x512xf32>
    %137 = arith.truncf %136 : vector<512x512xf32> to vector<512x512xbf16>
    %cst_98 = arith.constant dense<0.000000e+00> : vector<2x512xf32>
    %138 = tpu.matmul %1, %133, %cst_98 {dimension_numbers = #tpu.dot_dimension_numbers<[1], [0], [0], [1], [0, 0, 1, 1], [], []>} : vector<2x512xbf16>, vector<512x512xbf16>, vector<2x512xf32> -> vector<2x512xf32>
    %c3_99 = arith.constant 3 : index
    %c0_100 = arith.constant 0 : index
    %c0_101 = arith.constant 0 : index
    %139 = vector.load %arg5[%c3_99, %c0_100, %c0_101] : memref<4x1x1xf32, #tpu.memory_space<vmem>>, vector<1x1x1xf32>
    %140 = vector.shape_cast %139 : vector<1x1x1xf32> to vector<1x1xf32>
    %141 = vector.broadcast %140 : vector<1x1xf32> to vector<2x512xf32>
    %142 = arith.mulf %138, %141 : vector<2x512xf32>
    %cst_102 = arith.constant dense<0.000000e+00> : vector<2x512xf32>
    %143 = tpu.matmul %3, %137, %cst_102 {dimension_numbers = #tpu.dot_dimension_numbers<[1], [0], [0], [1], [0, 0, 1, 1], [], []>} : vector<2x512xbf16>, vector<512x512xbf16>, vector<2x512xf32> -> vector<2x512xf32>
    %c3_103 = arith.constant 3 : index
    %c0_104 = arith.constant 0 : index
    %c0_105 = arith.constant 0 : index
    %144 = vector.load %arg6[%c3_103, %c0_104, %c0_105] : memref<4x1x1xf32, #tpu.memory_space<vmem>>, vector<1x1x1xf32>
    %145 = vector.shape_cast %144 : vector<1x1x1xf32> to vector<1x1xf32>
    %146 = vector.broadcast %145 : vector<1x1xf32> to vector<2x512xf32>
    %147 = arith.mulf %143, %146 : vector<2x512xf32>
    %148 = arith.addf %142, %147 : vector<2x512xf32>
    %c3_106 = arith.constant 3 : index
    %c0_107 = arith.constant 0 : index
    %c0_108 = arith.constant 0 : index
    %149 = vector.load %arg7[%c3_106, %c0_107, %c0_108] : memref<4x1x512xf32, #tpu.memory_space<vmem>>, vector<1x1x512xf32>
    %150 = vector.shape_cast %149 : vector<1x1x512xf32> to vector<1x512xf32>
    %151 = vector.broadcast %150 : vector<1x512xf32> to vector<2x512xf32>
    %152 = arith.addf %148, %151 : vector<2x512xf32>
    %cst_109 = arith.constant 0.000000e+00 : f32
    %153 = vector.broadcast %cst_109 : f32 to vector<2x512xf32>
    %154 = arith.maximumf %152, %153 : vector<2x512xf32>
    %155 = arith.truncf %154 : vector<2x512xf32> to vector<2x512xbf16>
    %c3_110 = arith.constant 3 : index
    %c0_111 = arith.constant 0 : index
    %c0_112 = arith.constant 0 : index
    %156 = vector.load %arg8[%c3_110, %c0_111, %c0_112] : memref<4x512x32xi8, #tpu.memory_space<vmem>>, vector<1x512x32xi8>
    %157 = vector.shape_cast %156 : vector<1x512x32xi8> to vector<512x32xi8>
    %158 = arith.sitofp %157 : vector<512x32xi8> to vector<512x32xf32>
    %159 = arith.truncf %158 : vector<512x32xf32> to vector<512x32xbf16>
    %cst_113 = arith.constant dense<0.000000e+00> : vector<2x32xf32>
    %160 = tpu.matmul %155, %159, %cst_113 {dimension_numbers = #tpu.dot_dimension_numbers<[1], [0], [0], [1], [0, 0, 1, 1], [], []>} : vector<2x512xbf16>, vector<512x32xbf16>, vector<2x32xf32> -> vector<2x32xf32>
    %c3_114 = arith.constant 3 : index
    %c0_115 = arith.constant 0 : index
    %c0_116 = arith.constant 0 : index
    %161 = vector.load %arg9[%c3_114, %c0_115, %c0_116] : memref<4x1x1xf32, #tpu.memory_space<vmem>>, vector<1x1x1xf32>
    %162 = vector.shape_cast %161 : vector<1x1x1xf32> to vector<1x1xf32>
    %163 = vector.broadcast %162 : vector<1x1xf32> to vector<2x32xf32>
    %164 = arith.mulf %160, %163 : vector<2x32xf32>
    %c3_117 = arith.constant 3 : index
    %c0_118 = arith.constant 0 : index
    %c0_119 = arith.constant 0 : index
    %165 = vector.load %arg10[%c3_117, %c0_118, %c0_119] : memref<4x1x32xf32, #tpu.memory_space<vmem>>, vector<1x1x32xf32>
    %166 = vector.shape_cast %165 : vector<1x1x32xf32> to vector<1x32xf32>
    %167 = vector.broadcast %166 : vector<1x32xf32> to vector<2x32xf32>
    %168 = arith.addf %164, %167 : vector<2x32xf32>
    %c3_120 = arith.constant 3 : index
    %c0_121 = arith.constant 0 : index
    %c0_122 = arith.constant 0 : index
    %169 = vector.load %arg11[%c3_120, %c0_121, %c0_122] : memref<4x2x32xf32, #tpu.memory_space<vmem>>, vector<1x2x32xf32>
    %170 = vector.shape_cast %169 : vector<1x2x32xf32> to vector<2x32xf32>
    %171 = vector.shape_cast %168 : vector<2x32xf32> to vector<1x2x32xf32>
    tpu.vector_store %arg11[%c3_120, %c0_121, %c0_122], %171 {strides = array<i32>} : memref<4x2x32xf32, #tpu.memory_space<vmem>>, vector<1x2x32xf32>,
    return
  }
  func.func @transform_0(%arg0: i32) -> (i32, i32) {
    %c0_i32 = arith.constant 0 : i32
    %c0_i32_0 = arith.constant 0 : i32
    %c0_i32_1 = arith.constant 0 : i32
    return %c0_i32, %c0_i32_0 : i32, i32
  }
  func.func @transform_1(%arg0: i32) -> (i32, i32) {
    %c0_i32 = arith.constant 0 : i32
    %c0_i32_0 = arith.constant 0 : i32
    %c0_i32_1 = arith.constant 0 : i32
    return %c0_i32, %c0_i32_0 : i32, i32
  }
  func.func @transform_2(%arg0: i32) -> (i32, i32, i32) {
    %c0_i32 = arith.constant 0 : i32
    %c0_i32_0 = arith.constant 0 : i32
    %c0_i32_1 = arith.constant 0 : i32
    return %arg0, %c0_i32, %c0_i32_0 : i32, i32, i32
  }
  func.func @transform_3(%arg0: i32) -> (i32, i32, i32) {
    %c0_i32 = arith.constant 0 : i32
    %c0_i32_0 = arith.constant 0 : i32
    %c0_i32_1 = arith.constant 0 : i32
    return %arg0, %c0_i32, %c0_i32_0 : i32, i32, i32
  }
  func.func @transform_4(%arg0: i32) -> (i32, i32, i32) {
    %c0_i32 = arith.constant 0 : i32
    %c0_i32_0 = arith.constant 0 : i32
    %c0_i32_1 = arith.constant 0 : i32
    return %arg0, %c0_i32, %c0_i32_0 : i32, i32, i32
  }
  func.func @transform_5(%arg0: i32) -> (i32, i32, i32) {
    %c0_i32 = arith.constant 0 : i32
    %c0_i32_0 = arith.constant 0 : i32
    %c0_i32_1 = arith.constant 0 : i32
    return %arg0, %c0_i32, %c0_i32_0 : i32, i32, i32
  }
  func.func @transform_6(%arg0: i32) -> (i32, i32, i32) {
    %c0_i32 = arith.constant 0 : i32
    %c0_i32_0 = arith.constant 0 : i32
    %c0_i32_1 = arith.constant 0 : i32
    return %arg0, %c0_i32, %c0_i32_0 : i32, i32, i32
  }
  func.func @transform_7(%arg0: i32) -> (i32, i32, i32) {
    %c0_i32 = arith.constant 0 : i32
    %c0_i32_0 = arith.constant 0 : i32
    %c0_i32_1 = arith.constant 0 : i32
    return %arg0, %c0_i32, %c0_i32_0 : i32, i32, i32
  }
  func.func @transform_8(%arg0: i32) -> (i32, i32, i32) {
    %c0_i32 = arith.constant 0 : i32
    %c0_i32_0 = arith.constant 0 : i32
    %c0_i32_1 = arith.constant 0 : i32
    return %arg0, %c0_i32, %c0_i32_0 : i32, i32, i32
  }
  func.func @transform_9(%arg0: i32) -> (i32, i32, i32) {
    %c0_i32 = arith.constant 0 : i32
    %c0_i32_0 = arith.constant 0 : i32
    %c0_i32_1 = arith.constant 0 : i32
    return %arg0, %c0_i32, %c0_i32_0 : i32, i32, i32
  }
  func.func @transform_10(%arg0: i32) -> (i32, i32, i32) {
    %c0_i32 = arith.constant 0 : i32
    %c0_i32_0 = arith.constant 0 : i32
    %c0_i32_1 = arith.constant 0 : i32
    return %arg0, %c0_i32, %c0_i32_0 : i32, i32, i32
  }
}

</mosaic_0001>

<bundles_post_ra>
// kernel: tpu_custom_call.1
= control target key start
LH: loop header
LB: loop body
LE: loop exit
PB: predicated region body
PF: predicated region fallthrough
CT: control target
= control target key end

     0   :  { %s6957_s0 = inlined_call_operand.hbm [shape: f32[2,512], index: 0, kind: input, shape index: {}]   ;;  %s6958_s1 = inlined_call_operand.hbm [shape: f32[2,512], index: 1, kind: input, shape index: {}]   ;;  %s6959_s2 = inlined_call_operand.hbm [shape: s8[8,512,512], index: 2, kind: input, shape index: {}]   ;;  %s6960_s3 = inlined_call_operand.hbm [shape: s8[8,512,512], index: 3, kind: input, shape index: {}]   ;;  %s6961_s4 = inlined_call_operand.vmem [shape: f32[8,1,1], index: 4, kind: input, shape index: {}]   ;;  %s6962_s5 = inlined_call_operand.vmem [shape: f32[8,1,1], index: 5, kind: input, shape index: {}]   ;;  %s6963_s6 = inlined_call_operand.hbm [shape: f32[8,1,512], index: 6, kind: input, shape index: {}]   ;;  %s6964_s7 = inlined_call_operand.vmem [shape: s8[8,512,32], index: 7, kind: input, shape index: {}]   ;;  %s6965_s8 = inlined_call_operand.vmem [shape: f32[8,1,1], index: 8, kind: input, shape index: {}]   ;;  %s6966_s9 = inlined_call_operand.hbm [shape: f32[8,1,32], index: 9, kind: input, shape index: {}]   ;;  %s6967_s10 = inlined_call_operand.hbm [shape: f32[8,2,32], index: 10, kind: output, shape index: {}]  }
   0x1   :  { %6985 = sst [smem:[#allocation22_spill]] %s6957_s0 }
   0x2   :  { %6986 = sst [smem:[#allocation23_spill]] %s6959_s2 }
   0x3   :  { %6987 = sst [smem:[#allocation24_spill]] %s6967_s10 }
   0x4   :  { %15 = vsyncpa [#allocation3], 0 }
   0x5   :  { %16 = vsyncpa [#allocation6], 0 }
   0x6   :  { %17 = vsyncpa [#allocation4], 0 }
   0x7   :  { %19 = vsyncpa [#allocation4 + $0x1], 0  ;;  %s5690_s13 = smov 0   ;;  %s5692_s14 = smov 0  }
   0x8   :  { %s5694_s15 = smov 0   ;;  %s5696_s16 = smov 0  }
   0x9 LB: > { %6988 = sst [smem:[#allocation16_spill]] %s5604_s13  ;;  %s5711_s17 = sadd.s32 4294967295, %s5616_s16   ;;  %s5616_s16 = sphi %s5696_s16, %s7023_s16   ;;  %s5612_s15 = sphi %s5694_s15, %s7025_s15   ;;  %s5608_s14 = sphi %s5692_s14, %s7027_s14   ;;  %s5604_s13 = sphi %s5690_s13, %s7026_s13  }
   0xa   : > { %6989 = sst [smem:[#allocation17_spill]] %s5612_s15  ;;  %s4594_s18 = sadd.s32 4294967294, %s5616_s16  }
   0xb   : > { %s5715_s19 = sadd.s32 1, %s5616_s16   ;;  %s74_s20 = sadd.s32 1, %s5612_s15 }
   0xc   : > { %6990 = sst [smem:[#allocation18_spill]] %s5715_s19  ;;  %s71_s21 = ssub.s32 %s5616_s16, %s5715_s19 }
   0xd   : > { %p81_p0 = scmp.ne.s32.totalorder %s5612_s15, %s5608_s14  ;;  %p72_p1 = scmp.eq.s32.totalorder %s71_s21, 0 }
   0xe   : > { %p82_p2 = scmp.eq.s32.totalorder %s5616_s16, 0  ;;  %p87_p3 = scmp.ne.s32.totalorder %s5608_s14, %s5604_s13 }
   0xf   : > { %p6968_p4 = scmp.eq.s32.totalorder %s5711_s17, 0  ;;  %p293_p7 = scmp.eq.s32.totalorder %s5711_s17, 1 }
  0x10   : > { %s5727_s22 = scalar_select %p72_p1, %s5612_s15, %s74_s20  }
  0x11   : > { %p5729_p5 = por %p82_p2, %p81_p0  ;;  %p5735_p6 = por %p6968_p4, %p87_p3 }
  0x12   : > { %6991 = sst [smem:[#allocation19_spill]] %s5727_s22  ;;  %p299_p8 = scmp.eq.s32.totalorder %s4594_s18, 1 }
  0x13   : > { %s6993_s24 = scalar_select %p5735_p6, 1, 0 }
  0x14   : > { %p4595_p9 = scmp.ge.s32.totalorder %s5616_s16, 1  ;;  %p306_p10 = scmp.lt.s32.totalorder %s5616_s16, 3 }
  0x15   : > { %p5742_p11 = por %p293_p7, %p81_p0  ;;  %p5746_p12 = por %p299_p8, %p87_p3 }
  0x16   : > { %p5750_p13 = pnand %p4595_p9, %p306_p10  ;;  %s5618_s28 = smov [#allocation2]  }
  0x17   : > { %s6994_s25 = scalar_select %p5742_p11, 1, 0 }
  0x18   : > { %s6996_s26 = scalar_select %p5746_p12, 1, 0 }
  0x19   : > { %6995 = sst [smem:[#allocation20_spill]] %s6994_s25  ;;  %p5302_p2 = pneg %p5750_p13 }
  0x1a   : > { %6997 = sst [smem:[#allocation21_spill]] %s6996_s26  ;;  %s319_s29 = sshll.u32 %s5618_s28, 4  ;;  %s320_s29 = int_to_ptr.vmem [resolvable:$true] %s319_s29 }
  0x1b   : > { %s6998_s27 = scalar_select %p5750_p13, 1, 0 }
  0x1c   : > { %p5328_p4 = scmp.lt.s32.totalorder %s5616_s16, 2  ;;  %p6999_p0 = scmp.eq.s32.totalorder %s5711_s17, 0 }
  0x1d   : > { %s341_s11 = sand.u32 1, %s5616_s16   ;;  %s5772_s18 = sand.u32 1, %s5612_s15  }
  0x1e   : > { %p5760_p7 = pnand %p5302_p2, %p6999_p0  ;;  %p5767_p3 = pnand %p5328_p4, %p5729_p5 }
  0x1f   : > { %s5391_s20 = scalar_lea.vmem %s320_s29, 128  ;;  %p5399_p0 = scmp.lt.s32.totalorder %s320_s29, %s320_s29 }
  0x20   : > { %s7000_s30 = scalar_select %p5760_p7, 1, 0 }
  0x21   : > { %p6977_p8 = pneg %p5760_p7  ;;  %p5392_p9 = scmp.ne.s32.totalorder %s320_s29, %s5391_s20 }
  0x22   : > { %p5400_p1 = scmp.lt.s32.totalorder %s5391_s20, %s5391_s20 }
  0x23   : > { %p5394_p10 = pnand %p5392_p9, %p6977_p8 }
  0x24   : > { %p5401_p12 = por %p5400_p1, %p5399_p0 }
  0x25   : > { %p5395_p2 = pneg %p5394_p10 }
  0x27   : > { %p5402_p11 = pnand %p5401_p12, %p5395_p2 }
  0x29   : > { %5405 = shalt.err (!%p5402_p11)
}
  0x2a   : > { %s7002_s0 = sld [smem:[#allocation22_spill]]  ;;  %s6975_s28 = sshll.u32 %s5772_s18, 11 }
  0x2b   : > { %s6976_s22 = sshll.u32 %s5616_s16, 15  ;;  %s7003_s2 = sld [smem:[#allocation23_spill]] }
  0x2c   : > { %s345_s26 = scalar_lea.vmem [#allocation7], %s6975_s28  ;;  %s5797_s23 = scalar_lea.sflag [#allocation3], %s341_s11 }
  0x2d   : > { %s353_s21 = sshll.u32 %s345_s26, 4  ;;  %p5803_p5 = pneg %p5767_p3  ;;  %s5795_s21 = int_to_ptr.vmem [resolvable:$true] %s353_s21 }
  0x30   : > { %5305 = dma.hbm_to_vmem [thread:$0]  (!%p5760_p7), %s7002_s0, 128, %s320_s29, [#allocation3]  }
  0x31   : > { %s5791_s20 = scalar_lea.hbm %s7003_s2, %s6976_s22  ;;  %s5411_s28 = scalar_lea.hbm %s7003_s2, 65536 }
  0x32   : > { %s5406_s13 = scalar_lea.hbm %s5791_s20, 32768  ;;  %p5412_p1 = scmp.lt.s32.totalorder %s5791_s20, %s7003_s2 }
  0x33   : > { %p5407_p4 = scmp.ne.s32.totalorder %s5791_s20, %s5406_s13  ;;  %p5413_p9 = scmp.lt.s32.totalorder %s5411_s28, %s5406_s13 }
  0x35   : > { %p5409_p11 = pnand %p5803_p5, %p5407_p4  ;;  %p5414_p10 = por %p5413_p9, %p5412_p1 }
  0x37   : > { %p5410_p12 = pneg %p5409_p11 }
  0x39   : > { %p5415_p2 = pnand %p5414_p10, %p5410_p12 }
  0x3b   : > { %5418 = shalt.err (!%p5415_p2)
}
  0x3c   : > { %s5419_s11 = scalar_lea.vmem %s5795_s21, 32768  ;;  %s5619_s0 = smov [#allocation7]  }
  0x3d   : > { %p5420_p0 = scmp.ne.s32.totalorder %s5795_s21, %s5419_s11  ;;  %s5424_s15 = sshll.u32 %s5619_s0, 4  ;;  %s5425_s15 = int_to_ptr.vmem [resolvable:$false] %s5424_s15 }
  0x3e   : > { %s5426_s19 = scalar_lea.vmem %s5425_s15, 65536  ;;  %p5427_p8 = scmp.lt.s32.totalorder %s5795_s21, %s5425_s15 }
  0x3f   : > { %p5422_p4 = pnand %p5420_p0, %p5803_p5  ;;  %p5428_p6 = scmp.lt.s32.totalorder %s5426_s19, %s5419_s11 }
  0x41   : > { %p5423_p11 = pneg %p5422_p4  ;;  %p5429_p13 = por %p5428_p6, %p5427_p8 }
  0x43   : > { %p5430_p7 = pnand %p5429_p13, %p5423_p11 }
  0x45   : > { %5433 = shalt.err (!%p5430_p7)
}
  0x46   : > { %s5620_s13 = smov 512   ;;  %s5621_s22 = smov 32  }
  0x47   : > { %5312 = dma.hbm_to_vmem [thread:$0]  (!%p5767_p3), %s5791_s20, 32768, %s5795_s21, %s5797_s23, %s5620_s13, %s5620_s13, %s5621_s22  }
  0x48   : > { %s7005_s0 = sshll.u32 %s5616_s16, 15  ;;  %s7006_s15 = sshll.u32 %s5772_s18, 11 }
  0x49   : > { %s5834_s11 = scalar_lea.hbm %s6960_s3, %s7005_s0  ;;  %s367_s19 = scalar_lea.vmem [#allocation8], %s7006_s15 }
  0x4a   : > { %s375_s2 = sshll.u32 %s367_s19, 4  ;;  %s4607_s10 = sshll.u32 %s5772_s18, 4  ;;  %s5838_s2 = int_to_ptr.vmem [resolvable:$true] %s375_s2 }
  0x4b   : > { %s5434_s25 = scalar_lea.hbm %s5834_s11, 32768  ;;  %s5439_s28 = scalar_lea.hbm %s6960_s3, 65536 }
  0x4c   : > { %p5435_p6 = scmp.ne.s32.totalorder %s5834_s11, %s5434_s25  ;;  %p5440_p8 = scmp.lt.s32.totalorder %s5834_s11, %s6960_s3 }
  0x4d   : > { %p5441_p12 = scmp.lt.s32.totalorder %s5439_s28, %s5434_s25 }
  0x4e   : > { %p5437_p13 = pnand %p5435_p6, %p5803_p5 }
  0x4f   : > { %p5442_p1 = por %p5441_p12, %p5440_p8 }
  0x50   : > { %p5438_p7 = pneg %p5437_p13 }
  0x52   : > { %p5443_p9 = pnand %p5442_p1, %p5438_p7 }
  0x54   : > { %5446 = shalt.err (!%p5443_p9)
}
  0x55   : > { %s5447_s15 = scalar_lea.vmem %s5838_s2, 32768  ;;  %s5622_s19 = smov [#allocation8]  }
  0x56   : > { %p5448_p10 = scmp.ne.s32.totalorder %s5838_s2, %s5447_s15  ;;  %s5452_s20 = sshll.u32 %s5622_s19, 4  ;;  %s5453_s20 = int_to_ptr.vmem [resolvable:$false] %s5452_s20 }
  0x57   : > { %s5454_s21 = scalar_lea.vmem %s5453_s20, 65536  ;;  %p5455_p4 = scmp.lt.s32.totalorder %s5838_s2, %s5453_s20 }
  0x58   : > { %p5450_p2 = pnand %p5448_p10, %p5803_p5  ;;  %p5456_p11 = scmp.lt.s32.totalorder %s5454_s21, %s5447_s15 }
  0x5a   : > { %p5451_p0 = pneg %p5450_p2  ;;  %p5457_p6 = por %p5456_p11, %p5455_p4 }
  0x5c   : > { %p5458_p13 = pnand %p5457_p6, %p5451_p0 }
  0x5e   : > { %5461 = shalt.err (!%p5458_p13)
}
  0x5f   : > { %5315 = dma.hbm_to_vmem [thread:$0]  (!%p5767_p3), %s5834_s11, 32768, %s5838_s2, %s5797_s23, %s5620_s13, %s5620_s13, %s5621_s22  }
  0x60   : > { %s5104_s25 = sshll.u32 %s5616_s16, 8  ;;  %s405_s15 = scalar_lea.vmem [#allocation9], %s4607_s10 }
  0x61   : > { %s5869_s26 = scalar_lea.hbm %s6963_s6, %s5104_s25  ;;  %s413_s19 = sshll.u32 %s405_s15, 4  ;;  %s5873_s19 = int_to_ptr.vmem [resolvable:$true] %s413_s19 }
  0x62   : > { %s5462_s20 = scalar_lea.hbm %s5869_s26, 256  ;;  %s5467_s22 = scalar_lea.hbm %s6963_s6, 512 }
  0x63   : > { %p5463_p7 = scmp.ne.s32.totalorder %s5869_s26, %s5462_s20  ;;  %p5468_p1 = scmp.lt.s32.totalorder %s5869_s26, %s6963_s6 }
  0x64   : > { %p5469_p9 = scmp.lt.s32.totalorder %s5467_s22, %s5462_s20 }
  0x65   : > { %p5465_p8 = pnand %p5463_p7, %p5803_p5 }
  0x66   : > { %p5470_p10 = por %p5469_p9, %p5468_p1 }
  0x67   : > { %p5466_p12 = pneg %p5465_p8 }
  0x69   : > { %p5471_p2 = pnand %p5470_p10, %p5466_p12 }
  0x6b   : > { %5474 = shalt.err (!%p5471_p2)
}
  0x6c   : > { %s5475_s10 = scalar_lea.vmem %s5873_s19, 256  ;;  %s5623_s25 = smov [#allocation9]  }
  0x6d   : > { %p5476_p0 = scmp.ne.s32.totalorder %s5873_s19, %s5475_s10  ;;  %s5480_s28 = sshll.u32 %s5623_s25, 4  ;;  %s5481_s28 = int_to_ptr.vmem [resolvable:$false] %s5480_s28 }
  0x6e   : > { %s5482_s0 = scalar_lea.vmem %s5481_s28, 512  ;;  %p5483_p6 = scmp.lt.s32.totalorder %s5873_s19, %s5481_s28 }
  0x6f   : > { %p5478_p4 = pnand %p5476_p0, %p5803_p5  ;;  %p5484_p13 = scmp.lt.s32.totalorder %s5482_s0, %s5475_s10 }
  0x71   : > { %p5479_p11 = pneg %p5478_p4  ;;  %p5485_p7 = por %p5484_p13, %p5483_p6 }
  0x73   : > { %p5486_p8 = pnand %p5485_p7, %p5479_p11 }
  0x75   : > { %5489 = shalt.err (!%p5486_p8)
}
  0x76   : > { %s5624_s15 = smov 64   ;;  %s5625_s20 = smov 4  }
  0x77   : > { %5318 = dma.hbm_to_vmem [thread:$0]  (!%p5767_p3), %s5869_s26, 256, %s5873_s19, %s5797_s23, %s5624_s15, %s5624_s15, %s5625_s20  }
  0x78   : > { %s5626_s2 = smov [#allocation5]   ;;  %s4611_s22 = sshll.u32 %s5772_s18, 2 }
  0x79   : > { %s330_s13 = sshll.u32 %s5626_s2, 4  ;;  %p7007_p1 = scmp.ne.s32.totalorder %s7000_s30, 0  ;;  %s331_s13 = int_to_ptr.vmem [resolvable:$true] %s330_s13 }
  0x7a   : > { %s5501_s11 = scalar_lea.vmem %s331_s13, 128  ;;  %p5509_p0 = scmp.lt.s32.totalorder %s331_s13, %s331_s13 }
  0x7b   : > { %p5502_p12 = scmp.ne.s32.totalorder %s331_s13, %s5501_s11  ;;  %p7008_p9 = pneg %p7007_p1 }
  0x7c   : > { %p5510_p4 = scmp.lt.s32.totalorder %s5501_s11, %s5501_s11 }
  0x7d   : > { %p5504_p10 = pnand %p5502_p12, %p7008_p9 }
  0x7e   : > { %p5511_p11 = por %p5510_p4, %p5509_p0 }
  0x7f   : > { %p5505_p2 = pneg %p5504_p10 }
  0x81   : > { %p5512_p6 = pnand %p5511_p11, %p5505_p2 }
  0x83   : > { %5515 = shalt.err (!%p5512_p6)
}
  0x84   : > { %5308 = dma.hbm_to_vmem [thread:$0]  (!%p7007_p1), %s6958_s1, 128, %s331_s13, [#allocation6]  }
  0x85   : > { %s5105_s18 = sshll.u32 %s5616_s16, 6  ;;  %s445_s26 = scalar_lea.vmem [#allocation10], %s4611_s22 }
  0x86   : > { %s452_s19 = sshll.u32 %s445_s26, 4  ;;  %s5909_s0 = scalar_lea.hbm %s6966_s9, %s5105_s18  ;;  %s5911_s19 = int_to_ptr.vmem [resolvable:$true] %s452_s19 }
  0x87   : > { %s5516_s30 = scalar_lea.hbm %s5909_s0, 64  ;;  %s5521_s2 = scalar_lea.hbm %s6966_s9, 128 }
  0x88   : > { %p5517_p13 = scmp.ne.s32.totalorder %s5909_s0, %s5516_s30  ;;  %p5522_p12 = scmp.lt.s32.totalorder %s5909_s0, %s6966_s9 }
  0x89   : > { %p5523_p1 = scmp.lt.s32.totalorder %s5521_s2, %s5516_s30 }
  0x8a   : > { %p5519_p7 = pnand %p5517_p13, %p5803_p5 }
  0x8b   : > { %p5524_p9 = por %p5523_p1, %p5522_p12 }
  0x8c   : > { %p5520_p8 = pneg %p5519_p7 }
  0x8e   : > { %p5525_p10 = pnand %p5524_p9, %p5520_p8 }
  0x90   : > { %5528 = shalt.err (!%p5525_p10)
}
  0x91   : > { %s5529_s11 = scalar_lea.vmem %s5911_s19, 64  ;;  %s5627_s21 = smov [#allocation10]  }
  0x92   : > { %p5530_p2 = scmp.ne.s32.totalorder %s5911_s19, %s5529_s11  ;;  %s5534_s10 = sshll.u32 %s5627_s21, 4  ;;  %s5535_s10 = int_to_ptr.vmem [resolvable:$false] %s5534_s10 }
  0x93   : > { %s5536_s18 = scalar_lea.vmem %s5535_s10, 128  ;;  %p5537_p11 = scmp.lt.s32.totalorder %s5911_s19, %s5535_s10 }
  0x94   : > { %p5532_p0 = pnand %p5530_p2, %p5803_p5  ;;  %p5538_p6 = scmp.lt.s32.totalorder %s5536_s18, %s5529_s11 }
  0x96   : > { %p5533_p4 = pneg %p5532_p0  ;;  %p5539_p13 = por %p5538_p6, %p5537_p11 }
  0x98   : > { %p5540_p7 = pnand %p5539_p13, %p5533_p4 }
  0x9a   : > { %5543 = shalt.err (!%p5540_p7)
}
  0x9b   : > { %s5628_s26 = smov 16   ;;  %s5629_s25 = smov 1  }
  0x9c   : > { %5321 = dma.hbm_to_vmem [thread:$0]  (!%p5767_p3), %s5909_s0, 64, %s5911_s19, %s5797_s23, %s5628_s26, %s5628_s26, %s5629_s25  }
  0x9d   : > { %p7009_p5 = scmp.ne.s32.totalorder %s6998_s27, 0 }
  0x9e   : > { %p7010_p8 = scmp.eq.s32.totalorder (!%p7009_p5), %s5711_s17, 0 }
  0x9f   : > { %464 = sbr.rel (%p7009_p5) target bundleno = 2250 (0x8ca), region = 60 }
  0xa4   : > { %5587 = dma.done.wait (%p7010_p8), [#allocation3], 128   ;;  %p7011_p12 = pmov %p7010_p8 }
  0xa5   : > { %p7012_p1 = pmov %p7010_p8 }
  0xa6   : > { %5589 = vsyncadd (%p7011_p12), [#allocation3], 4294967168 }
  0xa7   : > { %5591 = dma.done.wait (%p7012_p1), [#allocation6], 128   ;;  %p7013_p9 = pmov %p7012_p1 }
  0xa8   : > { %s474_s12 = sand.u32 1, %s5711_s17   ;;  %s5946_s23 = sand.u32 1, %s5608_s14  }
  0xa9   : > { %5593 = vsyncadd (%p7013_p9), [#allocation6], 4294967168  ;;  %s4617_s27 = sshll.u32 %s5946_s23, 11  ;;  %s475_s29 = scalar_lea.sflag [#allocation3], %s474_s12 }
  0xaa   : > { %s5951_s19 = scalar_lea.vmem [#allocation7], %s4617_s27  ;;  %p7014_p3 = scmp.ne.s32.totalorder %s6993_s24, 0 }
  0xac   : > { %5595 = dma.done.wait (%p7014_p3), %s475_s29, 65856  }
  0xad   : > { %5597 = vsyncadd (%p7014_p3), %s475_s29, 4294901440  ;;  %v670_v0 = vld [vmem:[%s5951_s19 + $0x68] sm:$0xff]  ;;  %v669_v2 = vld [vmem:[%s5951_s19 + $0x60] sm:$0xff]  ;;  %v5630_v18 = vmov 1983009808   ;;  %v609_v20 = vlaneseq  ;;  %s4622_s24 = sshll.u32 %s5711_s17, 2 }
  0xae   : > { %v702_v1 = vld [vmem:[%s5951_s19 + $0x168] sm:$0xff]  ;;  %v746_v3 = vunpack.c.l.s8.bf16 %v670_v0  ;;  %v750_v4 = vunpack.c.h.s8.bf16 %v670_v0  ;;  %v701_v7 = vld [vmem:[%s5951_s19 + $0x160] sm:$0xff]  ;;  %v749_v8 = vunpack.c.h.s8.bf16 %v669_v2  ;;  %v745_v12 = vunpack.c.l.s8.bf16 %v669_v2  ;;  %v603_v36 = vld [vmem:[#allocation2] sm:$0xff]  ;;  %p5994_p10 = scmp.lt.s32.totalorder %s4622_s24, 7  ;;  %s6072_s20 = scalar_lea.vmem [#allocation8], %s4617_s27 }
  0xaf   : > { %v810_v5 = vunpack.c.l.s8.bf16 %v702_v1  ;;  %v814_v6 = vunpack.c.h.s8.bf16 %v702_v1  ;;  %v813_v9 = vunpack.c.h.s8.bf16 %v701_v7  ;;  %v666_v10 = vld [vmem:[%s5951_s19 + $0x48] sm:$0xff]  ;;  %v809_v13 = vunpack.c.l.s8.bf16 %v701_v7  ;;  %v665_v16 = vld [vmem:[%s5951_s19 + $0x40] sm:$0xff]  ;;  %s4619_s27 = sshll.u32 %s5946_s23, 4  ;;  %s4621_s28 = sshll.u32 %s5946_s23, 3 }
  0xb0   : > { %v698_v11 = vld [vmem:[%s5951_s19 + $0x148] sm:$0xff]  ;;  %1041 = vmatprep.subr.bf16.mxu0 %v750_v4  ;;  %v742_v14 = vunpack.c.h.s8.bf16 %v666_v10  ;;  %v697_v17 = vld [vmem:[%s5951_s19 + $0x140] sm:$0xff]  ;;  %v607_v19 = vunpack.c.l.s4 %v5630_v18  ;;  %v741_v21 = vunpack.c.h.s8.bf16 %v665_v16  ;;  %v738_v23 = vunpack.c.l.s8.bf16 %v666_v10  ;;  %s7029_s24 = smov (!%p5994_p10, %s4622_s24), 7  ;;  %s6230_s29 = scalar_lea.vmem [#allocation9], %s4619_s27 }
  0xb1   : > { %1082 = vmatprep.subr.bf16.mxu1 %v814_v6  ;;  %1042 = vmatpush1.bf16.msra.mxu0 %v749_v8  ;;  %v806_v15 = vunpack.c.h.s8.bf16 %v698_v11  ;;  %v805_v22 = vunpack.c.h.s8.bf16 %v697_v17  ;;  %v802_v24 = vunpack.c.l.s8.bf16 %v698_v11  ;;  %v5965_v26 = vshrl.u32 %v609_v20, 7  ;;  %v662_v27 = vld [vmem:[%s5951_s19 + $0x28] sm:$0xff]  ;;  %v661_v33 = vld [vmem:[%s5951_s19 + $0x20] sm:$0xff]  ;;  %s6011_s15 = scalar_lea.vmem %s6961_s4, %s7029_s24  ;;  %s6104_s22 = scalar_lea.vmem %s6962_s5, %s7029_s24 }
  0xb2   : > { %1083 = vmatpush1.bf16.msra.mxu1 %v813_v9  ;;  %1043 = vmatprep.subr.bf16.mxu0 %v746_v3  ;;  %v608_v25 = vunpack.c.0.s8 %v607_v19  ;;  %v694_v28 = vld [vmem:[%s5951_s19 + $0x128] sm:$0xff]  ;;  %v737_v29 = vunpack.c.l.s8.bf16 %v665_v16  ;;  %v801_v30 = vunpack.c.l.s8.bf16 %v697_v17  ;;  %v734_v31 = vunpack.c.h.s8.bf16 %v662_v27  ;;  %v693_v34 = vld [vmem:[%s5951_s19 + $0x120] sm:$0xff]  ;;  %s6151_s10 = scalar_lea.vmem %s6965_s8, %s7029_s24  ;;  %s5106_s18 = sshll.u32 %s7029_s24, 7 }
  0xb3   : > { %1084 = vmatprep.subr.bf16.mxu1 %v810_v5  ;;  %v798_v32 = vunpack.c.h.s8.bf16 %v694_v28  ;;  %v733_v37 = vunpack.c.h.s8.bf16 %v661_v33  ;;  %v797_v38 = vunpack.c.h.s8.bf16 %v693_v34  ;;  %v730_v39 = vunpack.c.l.s8.bf16 %v662_v27  ;;  %v658_v43 = vld [vmem:[%s5951_s19 + $0x8] sm:$0xff]  ;;  %v657_v51 = vld [vmem:[%s5951_s19] sm:$0xff]  ;;  %s6189_s12 = scalar_lea.vmem %s6964_s7, %s5106_s18  ;;  %s4620_s24 = sshll.u32 %s5946_s23, 2 }
  0xb4   : > { %v5972_v35 = vsub.s32 %v608_v25, %v5965_v26  ;;  %v794_v40 = vunpack.c.l.s8.bf16 %v694_v28  ;;  %v605_v42 = vcombine.high %v603_v36, %v603_v36  ;;  %v690_v44 = vld [vmem:[%s5951_s19 + $0x108] sm:$0xff]  ;;  %v729_v47 = vunpack.c.l.s8.bf16 %v661_v33  ;;  %v689_v52 = vld [vmem:[%s5951_s19 + $0x100] sm:$0xff]  ;;  %s6413_s0 = scalar_lea.vmem [#allocation10], %s4620_s24  ;;  %s6421_s30 = scalar_lea.vmem [#allocation11], %s4621_s28 }
  0xb5   : > { %1044 = vmatpush1.bf16.msra.mxu0 %v745_v12  ;;  %v793_v48 = vunpack.c.l.s8.bf16 %v693_v34  ;;  %v726_v49 = vunpack.c.h.s8.bf16 %v658_v43  ;;  %v790_v50 = vunpack.c.h.s8.bf16 %v690_v44  ;;  %v725_v56 = vunpack.c.h.s8.bf16 %v657_v51  ;;  %v686_v60 = vld [vmem:[%s5951_s19 + $0xe8] sm:$0xff]  ;;  %v685_v2 = vld [vmem:[%s5951_s19 + $0xe0] sm:$0xff]  ;;  %v4628_v12 = vld [vmem:[%s6011_s15] ss:$0 sm:$0xff]  ;;  %s4390_s21 = scalar_lea.sflag [#allocation4], %s5946_s23 }
  0xb6   : > { %1085 = vmatpush1.bf16.msra.mxu1 %v809_v13  ;;  %1045 = vmatprep.subr.bf16.mxu0 %v742_v14  ;;  %v5975_v41 = vrot.slane %v603_v36, %v5972_v35  ;;  %v5982_v46 = vrot.slane %v605_v42, %v5972_v35  ;;  %v789_v57 = vunpack.c.h.s8.bf16 %v689_v52  ;;  %v722_v58 = vunpack.c.l.s8.bf16 %v658_v43  ;;  %v718_v61 = vld [vmem:[%s5951_s19 + $0x1e8] sm:$0xff]  ;;  %v717_v3 = vld [vmem:[%s5951_s19 + $0x1e0] sm:$0xff] }
  0xb7   : > { %1086 = vmatprep.subr.bf16.mxu1 %v806_v15  ;;  %v786_v59 = vunpack.c.l.s8.bf16 %v690_v44  ;;  %v721_v62 = vunpack.c.l.s8.bf16 %v657_v51  ;;  %v785_v63 = vunpack.c.l.s8.bf16 %v689_v52  ;;  %v782_v0 = vunpack.c.h.s8.bf16 %v686_v60  ;;  %v682_v8 = vld [vmem:[%s5951_s19 + $0xc8] sm:$0xff]  ;;  %v681_v15 = vld [vmem:[%s5951_s19 + $0xc0] sm:$0xff]  ;;  %v704_v51 = vld [vmem:[%s5951_s19 + $0x178] sm:$0xff] }
  0xb8   : > { %v620_v45 = vcombine.high %v5975_v41, %v5975_v41  ;;  %v621_v54 = vcombine.high %v5982_v46, %v5982_v46  ;;  %v846_v1 = vunpack.c.h.s8.bf16 %v718_v61  ;;  %v781_v4 = vunpack.c.h.s8.bf16 %v685_v2  ;;  %v714_v9 = vld [vmem:[%s5951_s19 + $0x1c8] sm:$0xff]  ;;  %v713_v16 = vld [vmem:[%s5951_s19 + $0x1c0] sm:$0xff] }
  0xb9   : > { %1046 = vmatpush1.bf16.msra.mxu0 %v741_v21  ;;  %v845_v5 = vunpack.c.h.s8.bf16 %v717_v3  ;;  %v778_v6 = vunpack.c.l.s8.bf16 %v686_v60  ;;  %v842_v7 = vunpack.c.l.s8.bf16 %v718_v61  ;;  %v777_v10 = vunpack.c.l.s8.bf16 %v685_v2  ;;  %v674_v36 = vld [vmem:[%s5951_s19 + $0x88] sm:$0xff]  ;;  %v673_v43 = vld [vmem:[%s5951_s19 + $0x80] sm:$0xff]  ;;  %v668_v2 = vld [vmem:[%s5951_s19 + $0x58] sm:$0xff] }
  0xba   : > { %1087 = vmatpush1.bf16.msra.mxu1 %v805_v22  ;;  %1047 = vmatprep.subr.bf16.mxu0 %v738_v23  ;;  %v5986_v53 = vpack.c.bf16 %v620_v45, %v620_v45  ;;  %v5992_v55 = vpack.c.bf16 %v621_v54, %v621_v54  ;;  %v841_v11 = vunpack.c.l.s8.bf16 %v717_v3  ;;  %v774_v13 = vunpack.c.h.s8.bf16 %v682_v8  ;;  %v678_v22 = vld [vmem:[%s5951_s19 + $0xa8] sm:$0xff]  ;;  %v705_v44 = vld [vmem:[%s5951_s19 + $0x180] sm:$0xff]  ;;  %v700_v3 = vld [vmem:[%s5951_s19 + $0x158] sm:$0xff] }
  0xbb   : > { %1088 = vmatprep.subr.bf16.mxu1 %v802_v24  ;;  %v838_v14 = vunpack.c.h.s8.bf16 %v714_v9  ;;  %v5631_v17 = vmov 0   ;;  %v773_v18 = vunpack.c.h.s8.bf16 %v681_v15  ;;  %v837_v19 = vunpack.c.h.s8.bf16 %v713_v16  ;;  %v710_v23 = vld [vmem:[%s5951_s19 + $0x1a8] sm:$0xff] }
  0xbc   : > { %1073 = vmatprep.mubr.bf16.mxu0 %v5986_v53  ;;  %1114 = vmatprep.mubr.bf16.mxu1 %v5992_v55  ;;  %v770_v20 = vunpack.c.l.s8.bf16 %v682_v8  ;;  %v834_v21 = vunpack.c.l.s8.bf16 %v714_v9  ;;  %v769_v24 = vunpack.c.l.s8.bf16 %v681_v15  ;;  %v833_v25 = vunpack.c.l.s8.bf16 %v713_v16 }
  0xbd   : > { %1048 = vmatpush1.bf16.msra.mxu0 %v737_v29  ;;  %5376 = vset.pattern.permute.xlu0 %v5631_v17  ;;  %v766_v27 = vunpack.c.h.s8.bf16 %v678_v22  ;;  %v830_v28 = vunpack.c.h.s8.bf16 %v710_v23  ;;  %v677_v29 = vld [vmem:[%s5951_s19 + $0xa0] sm:$0xff]  ;;  %v762_v33 = vunpack.c.l.s8.bf16 %v678_v22  ;;  %v826_v34 = vunpack.c.l.s8.bf16 %v710_v23 }
  0xbe   : > { %1089 = vmatpush1.bf16.msra.mxu1 %v801_v30  ;;  %1049 = vmatprep.subr.bf16.mxu0 %v734_v31  ;;  %v709_v30 = vld [vmem:[%s5951_s19 + $0x1a0] sm:$0xff]  ;;  %v765_v31 = vunpack.c.h.s8.bf16 %v677_v29  ;;  %v757_v45 = vunpack.c.h.s8.bf16 %v673_v43  ;;  %v753_v52 = vunpack.c.l.s8.bf16 %v673_v43  ;;  %v817_v54 = vunpack.c.l.s8.bf16 %v705_v44 }
  0xbf   : > { %1090 = vmatprep.subr.bf16.mxu1 %v798_v32  ;;  %5377 = vset.pattern.permute.xlu1 %v5631_v17  ;;  %v829_v32 = vunpack.c.h.s8.bf16 %v709_v30  ;;  %v6032_v60 = vpack.c.bf16 %v5975_v41, %v5975_v41  ;;  %v6036_v61 = vpack.c.bf16 %v5982_v46, %v5982_v46  ;;  %vm1582_vm0 = vcmask 254976  }
  0xc0   : > { %1212 = vperm.xlu0 %5376, %v4628_v12   ;;  %v664_v12 = vld [vmem:[%s5951_s19 + $0x38] sm:$0xff] }
  0xc1   : > { %1050 = vmatpush1.bf16.msra.mxu0 %v733_v37  ;;  %v706_v37 = vld [vmem:[%s5951_s19 + $0x188] sm:$0xff]  ;;  %v736_v16 = vunpack.c.h.s8.bf16 %v664_v12  ;;  %v732_v22 = vunpack.c.l.s8.bf16 %v664_v12 }
  0xc2   : > { %1091 = vmatpush1.bf16.msra.mxu1 %v797_v38  ;;  %1051 = vmatprep.subr.bf16.mxu0 %v730_v39  ;;  %v761_v38 = vunpack.c.l.s8.bf16 %v677_v29  ;;  %v825_v39 = vunpack.c.l.s8.bf16 %v709_v30  ;;  %v822_v42 = vunpack.c.h.s8.bf16 %v706_v37 }
  0xc3   : > { %1092 = vmatprep.subr.bf16.mxu1 %v794_v40  ;;  %v758_v40 = vunpack.c.h.s8.bf16 %v674_v36 }
  0xc5   : > { %1052 = vmatpush1.bf16.msra.mxu0 %v729_v47  ;;  %v821_v47 = vunpack.c.h.s8.bf16 %v705_v44 }
  0xc6   : > { %1093 = vmatpush1.bf16.msra.mxu1 %v793_v48  ;;  %1053 = vmatprep.subr.bf16.mxu0 %v726_v49  ;;  %v754_v48 = vunpack.c.l.s8.bf16 %v674_v36  ;;  %v818_v49 = vunpack.c.l.s8.bf16 %v706_v37 }
  0xc7   : > { %1094 = vmatprep.subr.bf16.mxu1 %v790_v50  ;;  %v672_v50 = vld [vmem:[%s5951_s19 + $0x78] sm:$0xff] }
  0xc9   : > { %1054 = vmatpush1.bf16.msra.mxu0 %v725_v56  ;;  %v752_v56 = vunpack.c.h.s8.bf16 %v672_v50 }
  0xca   : > { %1095 = vmatpush1.bf16.msra.mxu1 %v789_v57  ;;  %1055 = vmatprep.subr.bf16.mxu0 %v722_v58  ;;  %v816_v57 = vunpack.c.h.s8.bf16 %v704_v51  ;;  %v671_v58 = vld [vmem:[%s5951_s19 + $0x70] sm:$0xff] }
  0xcb   : > { %1096 = vmatprep.subr.bf16.mxu1 %v786_v59  ;;  %v703_v59 = vld [vmem:[%s5951_s19 + $0x170] sm:$0xff]  ;;  %v747_v41 = vunpack.c.l.s8.bf16 %v671_v58 }
  0xcc   : > { %v811_v46 = vunpack.c.l.s8.bf16 %v703_v59 }
  0xcd   : > { %1056 = vmatpush1.bf16.msra.mxu0 %v721_v62  ;;  %v751_v62 = vunpack.c.h.s8.bf16 %v671_v58 }
  0xce   : > { %1097 = vmatpush1.bf16.msra.mxu1 %v785_v63  ;;  %1057 = vmatprep.subr.bf16.mxu0 %v782_v0  ;;  %v815_v63 = vunpack.c.h.s8.bf16 %v703_v59  ;;  %v748_v0 = vunpack.c.l.s8.bf16 %v672_v50 }
  0xcf   : > { %1098 = vmatprep.subr.bf16.mxu1 %v846_v1  ;;  %v812_v1 = vunpack.c.l.s8.bf16 %v704_v51 }
  0xd1   : > { %1058 = vmatpush2.bf16.msra.mxu0 %v781_v4  ;;  %v744_v4 = vunpack.c.h.s8.bf16 %v668_v2 }
  0xd2   : > { %1099 = vmatpush2.bf16.msra.mxu1 %v845_v5  ;;  %1059 = vmatprep.subr.bf16.mxu0 %v778_v6  ;;  %v808_v5 = vunpack.c.h.s8.bf16 %v700_v3  ;;  %v667_v6 = vld [vmem:[%s5951_s19 + $0x50] sm:$0xff] }
  0xd3   : > { %1100 = vmatprep.subr.bf16.mxu1 %v842_v7  ;;  %v699_v7 = vld [vmem:[%s5951_s19 + $0x150] sm:$0xff]  ;;  %v743_v8 = vunpack.c.h.s8.bf16 %v667_v6 }
  0xd4   : > { %v807_v9 = vunpack.c.h.s8.bf16 %v699_v7  ;;  %v803_v15 = vunpack.c.l.s8.bf16 %v699_v7 }
  0xd5   : > { %1060 = vmatpush2.bf16.msra.mxu0 %v777_v10  ;;  %v740_v10 = vunpack.c.l.s8.bf16 %v668_v2 }
  0xd6   : > { %1101 = vmatpush2.bf16.msra.mxu1 %v841_v11  ;;  %1061 = vmatprep.subr.bf16.mxu0 %v774_v13  ;;  %v804_v11 = vunpack.c.l.s8.bf16 %v700_v3  ;;  %v696_v13 = vld [vmem:[%s5951_s19 + $0x138] sm:$0xff] }
  0xd7   : > { %1102 = vmatprep.subr.bf16.mxu1 %v838_v14  ;;  %v739_v14 = vunpack.c.l.s8.bf16 %v667_v6  ;;  %v800_v17 = vunpack.c.h.s8.bf16 %v696_v13  ;;  %v796_v23 = vunpack.c.l.s8.bf16 %v696_v13 }
  0xd9   : > { %1062 = vmatpush2.bf16.msra.mxu0 %v773_v18  ;;  %v663_v18 = vld [vmem:[%s5951_s19 + $0x30] sm:$0xff] }
  0xda   : > { %1103 = vmatpush2.bf16.msra.mxu1 %v837_v19  ;;  %1063 = vmatprep.subr.bf16.mxu0 %v770_v20  ;;  %v695_v19 = vld [vmem:[%s5951_s19 + $0x130] sm:$0xff]  ;;  %v735_v20 = vunpack.c.h.s8.bf16 %v663_v18 }
  0xdb   : > { %1104 = vmatprep.subr.bf16.mxu1 %v834_v21  ;;  %v799_v21 = vunpack.c.h.s8.bf16 %v695_v19 }
  0xdd   : > { %1064 = vmatpush2.bf16.msra.mxu0 %v769_v24  ;;  %v660_v24 = vld [vmem:[%s5951_s19 + $0x18] sm:$0xff] }
  0xde   : > { %1105 = vmatpush2.bf16.msra.mxu1 %v833_v25  ;;  %1065 = vmatprep.subr.bf16.mxu0 %v766_v27  ;;  %v692_v25 = vld [vmem:[%s5951_s19 + $0x118] sm:$0xff]  ;;  %v731_v27 = vunpack.c.l.s8.bf16 %v663_v18  ;;  %v728_v29 = vunpack.c.h.s8.bf16 %v660_v24  ;;  %v724_v36 = vunpack.c.l.s8.bf16 %v660_v24 }
  0xdf   : > { %1106 = vmatprep.subr.bf16.mxu1 %v830_v28  ;;  %v795_v28 = vunpack.c.l.s8.bf16 %v695_v19  ;;  %v792_v30 = vunpack.c.h.s8.bf16 %v692_v25  ;;  %v788_v37 = vunpack.c.l.s8.bf16 %v692_v25 }
  0xe1   : > { %1066 = vmatpush2.bf16.msra.mxu0 %v765_v31  ;;  %v659_v31 = vld [vmem:[%s5951_s19 + $0x10] sm:$0xff] }
  0xe2   : > { %1107 = vmatpush2.bf16.msra.mxu1 %v829_v32  ;;  %1067 = vmatprep.subr.bf16.mxu0 %v762_v33  ;;  %v691_v32 = vld [vmem:[%s5951_s19 + $0x110] sm:$0xff]  ;;  %v727_v33 = vunpack.c.h.s8.bf16 %v659_v31 }
  0xe3   : > { %1108 = vmatprep.subr.bf16.mxu1 %v826_v34  ;;  %v791_v34 = vunpack.c.h.s8.bf16 %v691_v32 }
  0xe5   : > { %1068 = vmatpush2.bf16.msra.mxu0 %v761_v38  ;;  %v688_v38 = vld [vmem:[%s5951_s19 + $0xf8] sm:$0xff] }
  0xe6   : > { %1109 = vmatpush2.bf16.msra.mxu1 %v825_v39  ;;  %1069 = vmatprep.subr.bf16.mxu0 %v758_v40  ;;  %v720_v39 = vld [vmem:[%s5951_s19 + $0x1f8] sm:$0xff]  ;;  %v723_v40 = vunpack.c.l.s8.bf16 %v659_v31  ;;  %v784_v43 = vunpack.c.h.s8.bf16 %v688_v38  ;;  %v780_v50 = vunpack.c.l.s8.bf16 %v688_v38  ;;  %v861_v38 = vld [vmem:[%s6072_s20 + $0x60] sm:$0xff] }
  0xe7   : > { %1110 = vmatprep.subr.bf16.mxu1 %v822_v42  ;;  %v787_v42 = vunpack.c.l.s8.bf16 %v691_v32  ;;  %v848_v44 = vunpack.c.h.s8.bf16 %v720_v39  ;;  %v844_v51 = vunpack.c.l.s8.bf16 %v720_v39  ;;  %v893_v39 = vld [vmem:[%s6072_s20 + $0x160] sm:$0xff] }
  0xe9   : > { %1070 = vmatpush2.bf16.msra.mxu0 %v757_v45  ;;  %v687_v45 = vld [vmem:[%s5951_s19 + $0xf0] sm:$0xff] }
  0xea   : > { %1111 = vmatpush2.bf16.msra.mxu1 %v821_v47  ;;  %1071 = vmatprep.subr.bf16.mxu0 %v754_v48  ;;  %v719_v47 = vld [vmem:[%s5951_s19 + $0x1f0] sm:$0xff]  ;;  %v783_v48 = vunpack.c.h.s8.bf16 %v687_v45 }
  0xeb   : > { %1112 = vmatprep.subr.bf16.mxu1 %v818_v49  ;;  %v847_v49 = vunpack.c.h.s8.bf16 %v719_v47 }
  0xed   : > { %1072 = vmatpush2.bf16.msra.mxu0 %v753_v52  ;;  %v684_v52 = vld [vmem:[%s5951_s19 + $0xd8] sm:$0xff] }
  0xee   : > { %1113 = vmatpush2.bf16.msra.mxu1 %v817_v54  ;;  %1123 = vmatprep.subr.bf16.mxu0 %v752_v56  ;;  %v716_v54 = vld [vmem:[%s5951_s19 + $0x1d8] sm:$0xff]  ;;  %v779_v56 = vunpack.c.l.s8.bf16 %v687_v45  ;;  %v776_v58 = vunpack.c.h.s8.bf16 %v684_v52  ;;  %v772_v2 = vunpack.c.l.s8.bf16 %v684_v52  ;;  %v1001_v52 = vunpack.c.l.s8.bf16 %v893_v39 }
  0xef   : > { %1164 = vmatprep.subr.bf16.mxu1 %v816_v57  ;;  %v843_v57 = vunpack.c.l.s8.bf16 %v719_v47  ;;  %v840_v59 = vunpack.c.h.s8.bf16 %v716_v54  ;;  %v836_v3 = vunpack.c.l.s8.bf16 %v716_v54  ;;  %v858_v47 = vld [vmem:[%s6072_s20 + $0x48] sm:$0xff] }
  0xf0   : > { %1074 = vmatmul.mubr.bf16.vlgmr.msra.gmra.mxu0 %v6032_v60  ;;  %v934_v54 = vunpack.c.h.s8.bf16 %v858_v47 }
  0xf1   : > { %1115 = vmatmul.mubr.bf16.vlgmr.msra.gmra.mxu1 %v6036_v61  ;;  %1124 = vmatpush1.bf16.msra.mxu0 %v751_v62  ;;  %v683_v62 = vld [vmem:[%s5951_s19 + $0xd0] sm:$0xff] }
  0xf2   : > { %1165 = vmatpush1.bf16.msra.mxu1 %v815_v63  ;;  %1125 = vmatprep.subr.bf16.mxu0 %v748_v0  ;;  %v715_v63 = vld [vmem:[%s5951_s19 + $0x1d0] sm:$0xff]  ;;  %v775_v0 = vunpack.c.h.s8.bf16 %v683_v62 }
  0xf3   : > { %1166 = vmatprep.subr.bf16.mxu1 %v812_v1  ;;  %1155 = vmatprep.mubr.bf16.mxu0 %v5986_v53  ;;  %v839_v1 = vunpack.c.h.s8.bf16 %v715_v63 }
  0xf4   : > { %1196 = vmatprep.mubr.bf16.mxu1 %v5992_v55 }
  0xf5   : > { %1126 = vmatpush1.bf16.msra.mxu0 %v747_v41  ;;  %v680_v41 = vld [vmem:[%s5951_s19 + $0xb8] sm:$0xff] }
  0xf6   : > { %1167 = vmatpush1.bf16.msra.mxu1 %v811_v46  ;;  %1127 = vmatprep.subr.bf16.mxu0 %v744_v4  ;;  %v712_v46 = vld [vmem:[%s5951_s19 + $0x1b8] sm:$0xff]  ;;  %v771_v4 = vunpack.c.l.s8.bf16 %v683_v62  ;;  %v768_v6 = vunpack.c.h.s8.bf16 %v680_v41  ;;  %v764_v12 = vunpack.c.l.s8.bf16 %v680_v41  ;;  %v4915_v41 = vld [vmem:[%s6011_s15 + $0x2] ss:$0 sm:$0xff] }
  0xf7   : > { %1168 = vmatprep.subr.bf16.mxu1 %v808_v5  ;;  %v835_v5 = vunpack.c.l.s8.bf16 %v715_v63  ;;  %v832_v7 = vunpack.c.h.s8.bf16 %v712_v46  ;;  %v828_v13 = vunpack.c.l.s8.bf16 %v712_v46  ;;  %v930_v63 = vunpack.c.l.s8.bf16 %v858_v47 }
  0xf9   : > { %1128 = vmatpush1.bf16.msra.mxu0 %v743_v8  ;;  %v679_v8 = vld [vmem:[%s5951_s19 + $0xb0] sm:$0xff] }
  0xfa   : > { %1169 = vmatpush1.bf16.msra.mxu1 %v807_v9  ;;  %1129 = vmatprep.subr.bf16.mxu0 %v740_v10  ;;  %v711_v9 = vld [vmem:[%s5951_s19 + $0x1b0] sm:$0xff]  ;;  %v767_v10 = vunpack.c.h.s8.bf16 %v679_v8 }
  0xfb   : > { %1170 = vmatprep.subr.bf16.mxu1 %v804_v11  ;;  %v831_v11 = vunpack.c.h.s8.bf16 %v711_v9  ;;  %v827_v18 = vunpack.c.l.s8.bf16 %v711_v9  ;;  %v5069_v9 = vld [vmem:[%s6011_s15 + $0x3] ss:$0 sm:$0xff] }
  0xfd   : > { %1130 = vmatpush1.bf16.msra.mxu0 %v739_v14  ;;  %v676_v14 = vld [vmem:[%s5951_s19 + $0x98] sm:$0xff] }
  0xfe   : > { %1171 = vmatpush1.bf16.msra.mxu1 %v803_v15  ;;  %1131 = vmatprep.subr.bf16.mxu0 %v736_v16  ;;  %v708_v15 = vld [vmem:[%s5951_s19 + $0x198] sm:$0xff]  ;;  %v760_v19 = vunpack.c.h.s8.bf16 %v676_v14 }
  0xff   : > { %1172 = vmatprep.subr.bf16.mxu1 %v800_v17  ;;  %v630_v16 = vld [vmem:[#allocation5] sm:$0xff]  ;;  %v763_v17 = vunpack.c.l.s8.bf16 %v679_v8  ;;  %v885_v8 = vld [vmem:[%s6072_s20 + $0x120] sm:$0xff] }
 0x100   : > { %v6077_v31 = vrot.slane %v630_v16, %v5972_v35 }
 0x101   : > { %1132 = vmatpush1.bf16.msra.mxu0 %v735_v20  ;;  %v824_v20 = vunpack.c.h.s8.bf16 %v708_v15 }
 0x102   : > { %1173 = vmatpush1.bf16.msra.mxu1 %v799_v21  ;;  %1133 = vmatprep.subr.bf16.mxu0 %v732_v22  ;;  %v675_v21 = vld [vmem:[%s5951_s19 + $0x90] sm:$0xff] }
 0x103   : > { %1174 = vmatprep.subr.bf16.mxu1 %v796_v23  ;;  %v707_v22 = vld [vmem:[%s5951_s19 + $0x190] sm:$0xff]  ;;  %v632_v23 = vcombine.high %v630_v16, %v630_v16  ;;  %v759_v24 = vunpack.c.h.s8.bf16 %v675_v21 }
 0x104   : > { %v823_v25 = vunpack.c.h.s8.bf16 %v707_v22 }
 0x105   : > { %1134 = vmatpush1.bf16.msra.mxu0 %v731_v27  ;;  %v756_v27 = vunpack.c.l.s8.bf16 %v676_v14  ;;  %v6080_v32 = vrot.slane %v632_v23, %v5972_v35  ;;  %v941_v35 = vunpack.c.h.s8.bf16 %v861_v38  ;;  %v850_v14 = vld [vmem:[%s6072_s20 + $0x8] sm:$0xff] }
 0x106   : > { %1175 = vmatpush1.bf16.msra.mxu1 %v795_v28  ;;  %1135 = vmatprep.subr.bf16.mxu0 %v728_v29  ;;  %v820_v28 = vunpack.c.l.s8.bf16 %v708_v15  ;;  %v862_v29 = vld [vmem:[%s6072_s20 + $0x68] sm:$0xff] }
 0x107   : > { %1176 = vmatprep.subr.bf16.mxu1 %v792_v30  ;;  %v894_v30 = vld [vmem:[%s6072_s20 + $0x168] sm:$0xff] }
 0x108   : > { %v1002_v45 = vunpack.c.l.s8.bf16 %v894_v30  ;;  %v882_v15 = vld [vmem:[%s6072_s20 + $0x108] sm:$0xff] }
 0x109   : > { %1136 = vmatpush1.bf16.msra.mxu0 %v727_v33  ;;  %v755_v33 = vunpack.c.l.s8.bf16 %v675_v21  ;;  %v881_v21 = vld [vmem:[%s6072_s20 + $0x100] sm:$0xff] }
 0x10a   : > { %1177 = vmatpush1.bf16.msra.mxu1 %v791_v34  ;;  %1137 = vmatprep.subr.bf16.mxu0 %v724_v36  ;;  %v819_v34 = vunpack.c.l.s8.bf16 %v707_v22  ;;  %v942_v36 = vunpack.c.h.s8.bf16 %v862_v29  ;;  %v981_v23 = vunpack.c.h.s8.bf16 %v881_v21 }
 0x10b   : > { %1178 = vmatprep.subr.bf16.mxu1 %v788_v37  ;;  %v1006_v37 = vunpack.c.h.s8.bf16 %v894_v30  ;;  %v977_v30 = vunpack.c.l.s8.bf16 %v881_v21 }
 0x10d   : > { %1138 = vmatpush1.bf16.msra.mxu0 %v723_v40  ;;  %v647_v40 = vcombine.high %v6077_v31, %v6077_v31 }
 0x10e   : > { %1179 = vmatpush1.bf16.msra.mxu1 %v787_v42  ;;  %1139 = vmatprep.subr.bf16.mxu0 %v784_v43  ;;  %v648_v42 = vcombine.high %v6080_v32, %v6080_v32  ;;  %v1005_v43 = vunpack.c.h.s8.bf16 %v893_v39 }
 0x10f   : > { %1180 = vmatprep.subr.bf16.mxu1 %v848_v44  ;;  %v938_v44 = vunpack.c.l.s8.bf16 %v862_v29 }
 0x111   : > { %1140 = vmatpush2.bf16.msra.mxu0 %v783_v48  ;;  %v890_v48 = vld [vmem:[%s6072_s20 + $0x148] sm:$0xff] }
 0x112   : > { %1181 = vmatpush2.bf16.msra.mxu1 %v847_v49  ;;  %1141 = vmatprep.subr.bf16.mxu0 %v780_v50  ;;  %v6090_v49 = vpack.c.bf16 %v647_v40, %v647_v40  ;;  %v6092_v50 = vpack.c.bf16 %v648_v42, %v648_v42 }
 0x113   : > { %1182 = vmatprep.subr.bf16.mxu1 %v844_v51  ;;  %v937_v51 = vunpack.c.l.s8.bf16 %v861_v38 }
 0x115   : > { %1142 = vmatpush2.bf16.msra.mxu0 %v779_v56  ;;  %v998_v56 = vunpack.c.h.s8.bf16 %v890_v48 }
 0x116   : > { %1183 = vmatpush2.bf16.msra.mxu1 %v843_v57  ;;  %1143 = vmatprep.subr.bf16.mxu0 %v776_v58  ;;  %v857_v57 = vld [vmem:[%s6072_s20 + $0x40] sm:$0xff] }
 0x117   : > { %1184 = vmatprep.subr.bf16.mxu1 %v840_v59  ;;  %v889_v58 = vld [vmem:[%s6072_s20 + $0x140] sm:$0xff]  ;;  %v933_v59 = vunpack.c.h.s8.bf16 %v857_v57  ;;  %v929_v46 = vunpack.c.l.s8.bf16 %v857_v57 }
 0x118   : > { %v997_v62 = vunpack.c.h.s8.bf16 %v889_v58 }
 0x119   : > { %1144 = vmatpush2.bf16.msra.mxu0 %v775_v0  ;;  %v994_v0 = vunpack.c.l.s8.bf16 %v890_v48 }
 0x11a   : > { %1185 = vmatpush2.bf16.msra.mxu1 %v839_v1  ;;  %1145 = vmatprep.subr.bf16.mxu0 %v772_v2  ;;  %v4629_v1 = vld [vmem:[%s6104_s22] ss:$0 sm:$0xff]  ;;  %v854_v2 = vld [vmem:[%s6072_s20 + $0x28] sm:$0xff] }
 0x11b   : > { %1186 = vmatprep.subr.bf16.mxu1 %v836_v3  ;;  %v886_v3 = vld [vmem:[%s6072_s20 + $0x128] sm:$0xff]  ;;  %1390 = vperm.xlu0 %5376, %v4629_v1  }
 0x11d   : > { %1146 = vmatpush2.bf16.msra.mxu0 %v771_v4  ;;  %v993_v4 = vunpack.c.l.s8.bf16 %v889_v58 }
 0x11e   : > { %1187 = vmatpush2.bf16.msra.mxu1 %v835_v5  ;;  %1147 = vmatprep.subr.bf16.mxu0 %v768_v6  ;;  %v926_v5 = vunpack.c.h.s8.bf16 %v854_v2  ;;  %v990_v6 = vunpack.c.h.s8.bf16 %v886_v3 }
 0x11f   : > { %1188 = vmatprep.subr.bf16.mxu1 %v832_v7  ;;  %v853_v7 = vld [vmem:[%s6072_s20 + $0x20] sm:$0xff]  ;;  %3077 = vperm.xlu0 %5376, %v4915_v41  }
 0x120   : > { %v921_v16 = vunpack.c.l.s8.bf16 %v853_v7  ;;  %v901_v41 = vld [vmem:[%s6072_s20 + $0x1a0] sm:$0xff] }
 0x121   : > { %1148 = vmatpush2.bf16.msra.mxu0 %v767_v10  ;;  %v925_v10 = vunpack.c.h.s8.bf16 %v853_v7  ;;  %v866_v7 = vld [vmem:[%s6072_s20 + $0x88] sm:$0xff] }
 0x122   : > { %1189 = vmatpush2.bf16.msra.mxu1 %v831_v11  ;;  %1149 = vmatprep.subr.bf16.mxu0 %v764_v12  ;;  %v989_v11 = vunpack.c.h.s8.bf16 %v885_v8  ;;  %v922_v12 = vunpack.c.l.s8.bf16 %v854_v2 }
 0x123   : > { %1190 = vmatprep.subr.bf16.mxu1 %v828_v13  ;;  %v986_v13 = vunpack.c.l.s8.bf16 %v886_v3  ;;  %4012 = vperm.xlu0 %5376, %v5069_v9   ;;  %v869_v3 = vld [vmem:[%s6072_s20 + $0xa0] sm:$0xff] }
 0x124   : > { %v953_v9 = vunpack.c.l.s8.bf16 %v869_v3 }
 0x125   : > { %1150 = vmatpush2.bf16.msra.mxu0 %v763_v17  ;;  %v985_v17 = vunpack.c.l.s8.bf16 %v885_v8  ;;  %v898_v8 = vld [vmem:[%s6072_s20 + $0x188] sm:$0xff] }
 0x126   : > { %1191 = vmatpush2.bf16.msra.mxu1 %v827_v18  ;;  %1151 = vmatprep.subr.bf16.mxu0 %v760_v19  ;;  %v918_v18 = vunpack.c.h.s8.bf16 %v850_v14  ;;  %v982_v19 = vunpack.c.h.s8.bf16 %v882_v15 }
 0x127   : > { %1192 = vmatprep.subr.bf16.mxu1 %v824_v20  ;;  %v849_v20 = vld [vmem:[%s6072_s20] sm:$0xff] }
 0x128   : > { %v917_v22 = vunpack.c.h.s8.bf16 %v849_v20  ;;  %v913_v29 = vunpack.c.l.s8.bf16 %v849_v20  ;;  %v896_v20 = vld [vmem:[%s6072_s20 + $0x178] sm:$0xff] }
 0x129   : > { %1152 = vmatpush2.bf16.msra.mxu0 %v759_v24  ;;  %v914_v24 = vunpack.c.l.s8.bf16 %v850_v14  ;;  %v897_v14 = vld [vmem:[%s6072_s20 + $0x180] sm:$0xff] }
 0x12a   : > { %1193 = vmatpush2.bf16.msra.mxu1 %v823_v25  ;;  %1153 = vmatprep.subr.bf16.mxu0 %v756_v27  ;;  %v978_v25 = vunpack.c.l.s8.bf16 %v882_v15  ;;  %v878_v27 = vld [vmem:[%s6072_s20 + $0xe8] sm:$0xff] }
 0x12b   : > { %1194 = vmatprep.subr.bf16.mxu1 %v820_v28  ;;  %v910_v28 = vld [vmem:[%s6072_s20 + $0x1e8] sm:$0xff]  ;;  %v970_v40 = vunpack.c.l.s8.bf16 %v878_v27 }
 0x12c   : > { %v1034_v42 = vunpack.c.l.s8.bf16 %v910_v28 }
 0x12d   : > { %1154 = vmatpush2.bf16.msra.mxu0 %v755_v33  ;;  %v974_v33 = vunpack.c.h.s8.bf16 %v878_v27  ;;  %v895_v27 = vld [vmem:[%s6072_s20 + $0x170] sm:$0xff] }
 0x12e   : > { %1195 = vmatpush2.bf16.msra.mxu1 %v819_v34  ;;  %1219 = vmatprep.subr.bf16.mxu0 %v942_v36  ;;  %v1038_v34 = vunpack.c.h.s8.bf16 %v910_v28  ;;  %v877_v36 = vld [vmem:[%s6072_s20 + $0xe0] sm:$0xff]  ;;  %v6139_v28 = vpack.c.bf16 %v6077_v31, %v6077_v31 }
 0x12f   : > { %1260 = vmatprep.subr.bf16.mxu1 %v1006_v37  ;;  %v909_v37 = vld [vmem:[%s6072_s20 + $0x1e0] sm:$0xff]  ;;  %v973_v38 = vunpack.c.h.s8.bf16 %v877_v36 }
 0x130   : > { %1156 = vmatmul.mubr.bf16.vlgmr.msra.gmra.mxu0 %v6032_v60  ;;  %v1037_v39 = vunpack.c.h.s8.bf16 %v909_v37 }
 0x131   : > { %1197 = vmatmul.mubr.bf16.vlgmr.msra.gmra.mxu1 %v6036_v61  ;;  %1220 = vmatpush1.bf16.msra.mxu0 %v941_v35  ;;  %v874_v35 = vld [vmem:[%s6072_s20 + $0xc8] sm:$0xff] }
 0x132   : > { %1261 = vmatpush1.bf16.msra.mxu1 %v1005_v43  ;;  %1221 = vmatprep.subr.bf16.mxu0 %v938_v44  ;;  %v906_v43 = vld [vmem:[%s6072_s20 + $0x1c8] sm:$0xff]  ;;  %v969_v44 = vunpack.c.l.s8.bf16 %v877_v36  ;;  %v966_v47 = vunpack.c.h.s8.bf16 %v874_v35  ;;  %v962_v57 = vunpack.c.l.s8.bf16 %v874_v35  ;;  %v1004_v36 = vunpack.c.l.s8.bf16 %v896_v20  ;;  %v859_v35 = vld [vmem:[%s6072_s20 + $0x50] sm:$0xff] }
 0x133   : > { %1262 = vmatprep.subr.bf16.mxu1 %v1002_v45  ;;  %1251 = vmatprep.mubr.bf16.mxu0 %v6090_v49  ;;  %v1033_v45 = vunpack.c.l.s8.bf16 %v909_v37  ;;  %v1030_v48 = vunpack.c.h.s8.bf16 %v906_v43  ;;  %v1026_v58 = vunpack.c.l.s8.bf16 %v906_v43  ;;  %v860_v37 = vld [vmem:[%s6072_s20 + $0x58] sm:$0xff]  ;;  %v891_v43 = vld [vmem:[%s6072_s20 + $0x150] sm:$0xff] }
 0x134   : > { %1292 = vmatprep.mubr.bf16.mxu1 %v6092_v50 }
 0x135   : > { %1222 = vmatpush1.bf16.msra.mxu0 %v937_v51  ;;  %v873_v51 = vld [vmem:[%s6072_s20 + $0xc0] sm:$0xff] }
 0x136   : > { %1263 = vmatpush1.bf16.msra.mxu1 %v1001_v52  ;;  %1223 = vmatprep.subr.bf16.mxu0 %v934_v54  ;;  %v905_v52 = vld [vmem:[%s6072_s20 + $0x1c0] sm:$0xff]  ;;  %v965_v54 = vunpack.c.h.s8.bf16 %v873_v51 }
 0x137   : > { %1264 = vmatprep.subr.bf16.mxu1 %v998_v56  ;;  %v1029_v56 = vunpack.c.h.s8.bf16 %v905_v52 }
 0x139   : > { %1224 = vmatpush1.bf16.msra.mxu0 %v933_v59  ;;  %v870_v59 = vld [vmem:[%s6072_s20 + $0xa8] sm:$0xff] }
 0x13a   : > { %1265 = vmatpush1.bf16.msra.mxu1 %v997_v62  ;;  %1225 = vmatprep.subr.bf16.mxu0 %v930_v63  ;;  %v902_v62 = vld [vmem:[%s6072_s20 + $0x1a8] sm:$0xff]  ;;  %v961_v63 = vunpack.c.l.s8.bf16 %v873_v51  ;;  %v958_v1 = vunpack.c.h.s8.bf16 %v870_v59 }
 0x13b   : > { %1266 = vmatprep.subr.bf16.mxu1 %v994_v0  ;;  %v1025_v0 = vunpack.c.l.s8.bf16 %v905_v52  ;;  %v1022_v2 = vunpack.c.h.s8.bf16 %v902_v62  ;;  %v856_v52 = vld [vmem:[%s6072_s20 + $0x38] sm:$0xff] }
 0x13d   : > { %1226 = vmatpush1.bf16.msra.mxu0 %v929_v46  ;;  %v957_v46 = vunpack.c.h.s8.bf16 %v869_v3 }
 0x13e   : > { %1267 = vmatpush1.bf16.msra.mxu1 %v993_v4  ;;  %1227 = vmatprep.subr.bf16.mxu0 %v926_v5  ;;  %v1021_v4 = vunpack.c.h.s8.bf16 %v901_v41  ;;  %v954_v5 = vunpack.c.l.s8.bf16 %v870_v59 }
 0x13f   : > { %1268 = vmatprep.subr.bf16.mxu1 %v990_v6  ;;  %v1018_v6 = vunpack.c.l.s8.bf16 %v902_v62  ;;  %v855_v62 = vld [vmem:[%s6072_s20 + $0x30] sm:$0xff] }
 0x141   : > { %1228 = vmatpush1.bf16.msra.mxu0 %v925_v10  ;;  %v1017_v10 = vunpack.c.l.s8.bf16 %v901_v41  ;;  %v852_v41 = vld [vmem:[%s6072_s20 + $0x18] sm:$0xff] }
 0x142   : > { %1269 = vmatpush1.bf16.msra.mxu1 %v989_v11  ;;  %1229 = vmatprep.subr.bf16.mxu0 %v922_v12  ;;  %v950_v11 = vunpack.c.h.s8.bf16 %v866_v7  ;;  %v1014_v12 = vunpack.c.h.s8.bf16 %v898_v8 }
 0x143   : > { %1270 = vmatprep.subr.bf16.mxu1 %v986_v13  ;;  %v865_v13 = vld [vmem:[%s6072_s20 + $0x80] sm:$0xff] }
 0x144   : > { %v949_v15 = vunpack.c.h.s8.bf16 %v865_v13  ;;  %v945_v21 = vunpack.c.l.s8.bf16 %v865_v13 }
 0x145   : > { %1230 = vmatpush1.bf16.msra.mxu0 %v921_v16  ;;  %v1013_v16 = vunpack.c.h.s8.bf16 %v897_v14 }
 0x146   : > { %1271 = vmatpush1.bf16.msra.mxu1 %v985_v17  ;;  %1231 = vmatprep.subr.bf16.mxu0 %v918_v18  ;;  %v946_v17 = vunpack.c.l.s8.bf16 %v866_v7  ;;  %v1010_v18 = vunpack.c.l.s8.bf16 %v898_v8  ;;  %v851_v8 = vld [vmem:[%s6072_s20 + $0x10] sm:$0xff] }
 0x147   : > { %1272 = vmatprep.subr.bf16.mxu1 %v982_v19  ;;  %v864_v19 = vld [vmem:[%s6072_s20 + $0x78] sm:$0xff] }
 0x149   : > { %1232 = vmatpush1.bf16.msra.mxu0 %v917_v22  ;;  %v1009_v22 = vunpack.c.l.s8.bf16 %v897_v14  ;;  %v880_v14 = vld [vmem:[%s6072_s20 + $0xf8] sm:$0xff] }
 0x14a   : > { %1273 = vmatpush1.bf16.msra.mxu1 %v981_v23  ;;  %1233 = vmatprep.subr.bf16.mxu0 %v914_v24  ;;  %v944_v23 = vunpack.c.h.s8.bf16 %v864_v19  ;;  %v1008_v24 = vunpack.c.h.s8.bf16 %v896_v20  ;;  %v879_v20 = vld [vmem:[%s6072_s20 + $0xf0] sm:$0xff] }
 0x14b   : > { %1274 = vmatprep.subr.bf16.mxu1 %v978_v25  ;;  %v863_v25 = vld [vmem:[%s6072_s20 + $0x70] sm:$0xff] }
 0x14c   : > { %v939_v31 = vunpack.c.l.s8.bf16 %v863_v25 }
 0x14d   : > { %1234 = vmatpush1.bf16.msra.mxu0 %v913_v29  ;;  %v6143_v29 = vpack.c.bf16 %v6080_v32, %v6080_v32  ;;  %v1003_v32 = vunpack.c.l.s8.bf16 %v895_v27 }
 0x14e   : > { %1275 = vmatpush1.bf16.msra.mxu1 %v977_v30  ;;  %1235 = vmatprep.subr.bf16.mxu0 %v974_v33  ;;  %v943_v30 = vunpack.c.h.s8.bf16 %v863_v25  ;;  %v1007_v33 = vunpack.c.h.s8.bf16 %v895_v27  ;;  %v876_v27 = vld [vmem:[%s6072_s20 + $0xd8] sm:$0xff] }
 0x14f   : > { %1276 = vmatprep.subr.bf16.mxu1 %v1038_v34  ;;  %v940_v34 = vunpack.c.l.s8.bf16 %v864_v19 }
 0x151   : > { %1236 = vmatpush2.bf16.msra.mxu0 %v973_v38  ;;  %v892_v38 = vld [vmem:[%s6072_s20 + $0x158] sm:$0xff] }
 0x152   : > { %1277 = vmatpush2.bf16.msra.mxu1 %v1037_v39  ;;  %1237 = vmatprep.subr.bf16.mxu0 %v970_v40  ;;  %v4630_v39 = vld [vmem:[%s6151_s10] ss:$0 sm:$0xff]  ;;  %v936_v40 = vunpack.c.h.s8.bf16 %v860_v37  ;;  %v996_v51 = vunpack.c.l.s8.bf16 %v892_v38 }
 0x153   : > { %1278 = vmatprep.subr.bf16.mxu1 %v1034_v42  ;;  %v1000_v42 = vunpack.c.h.s8.bf16 %v892_v38  ;;  %1570 = vperm.xlu0 %5376, %v4630_v39   ;;  %v875_v38 = vld [vmem:[%s6072_s20 + $0xd0] sm:$0xff] }
 0x155   : > { %1238 = vmatpush2.bf16.msra.mxu0 %v969_v44  ;;  %v935_v44 = vunpack.c.h.s8.bf16 %v859_v35 }
 0x156   : > { %1279 = vmatpush2.bf16.msra.mxu1 %v1033_v45  ;;  %1239 = vmatprep.subr.bf16.mxu0 %v966_v47  ;;  %v999_v45 = vunpack.c.h.s8.bf16 %v891_v43  ;;  %v4936_v47 = vld [vmem:[%s6151_s10 + $0x2] ss:$0 sm:$0xff] }
 0x157   : > { %1280 = vmatprep.subr.bf16.mxu1 %v1030_v48  ;;  %v932_v48 = vunpack.c.l.s8.bf16 %v860_v37  ;;  %3439 = vperm.xlu0 %5376, %v4936_v47  }
 0x159   : > { %1240 = vmatpush2.bf16.msra.mxu0 %v965_v54  ;;  %v888_v54 = vld [vmem:[%s6072_s20 + $0x138] sm:$0xff] }
 0x15a   : > { %1281 = vmatpush2.bf16.msra.mxu1 %v1029_v56  ;;  %1241 = vmatprep.subr.bf16.mxu0 %v962_v57  ;;  %v931_v56 = vunpack.c.l.s8.bf16 %v859_v35  ;;  %v995_v57 = vunpack.c.l.s8.bf16 %v891_v43  ;;  %v992_v59 = vunpack.c.h.s8.bf16 %v888_v54  ;;  %v988_v3 = vunpack.c.l.s8.bf16 %v888_v54  ;;  %v872_v35 = vld [vmem:[%s6072_s20 + $0xb8] sm:$0xff] }
 0x15b   : > { %1282 = vmatprep.subr.bf16.mxu1 %v1026_v58  ;;  %v928_v58 = vunpack.c.h.s8.bf16 %v856_v52  ;;  %v904_v43 = vld [vmem:[%s6072_s20 + $0x1b8] sm:$0xff]  ;;  %v960_v47 = vunpack.c.h.s8.bf16 %v872_v35 }
 0x15d   : > { %1242 = vmatpush2.bf16.msra.mxu0 %v961_v63  ;;  %v887_v63 = vld [vmem:[%s6072_s20 + $0x130] sm:$0xff] }
 0x15e   : > { %1283 = vmatpush2.bf16.msra.mxu1 %v1025_v0  ;;  %1243 = vmatprep.subr.bf16.mxu0 %v958_v1  ;;  %v927_v0 = vunpack.c.h.s8.bf16 %v855_v62  ;;  %v991_v1 = vunpack.c.h.s8.bf16 %v887_v63 }
 0x15f   : > { %1284 = vmatprep.subr.bf16.mxu1 %v1022_v2  ;;  %v924_v2 = vunpack.c.l.s8.bf16 %v856_v52  ;;  %v903_v52 = vld [vmem:[%s6072_s20 + $0x1b0] sm:$0xff] }
 0x161   : > { %1244 = vmatpush2.bf16.msra.mxu0 %v957_v46  ;;  %v884_v46 = vld [vmem:[%s6072_s20 + $0x118] sm:$0xff] }
 0x162   : > { %1285 = vmatpush2.bf16.msra.mxu1 %v1021_v4  ;;  %1245 = vmatprep.subr.bf16.mxu0 %v954_v5  ;;  %v923_v4 = vunpack.c.l.s8.bf16 %v855_v62  ;;  %v987_v5 = vunpack.c.l.s8.bf16 %v887_v63  ;;  %v984_v7 = vunpack.c.h.s8.bf16 %v884_v46  ;;  %v980_v13 = vunpack.c.l.s8.bf16 %v884_v46  ;;  %v900_v62 = vld [vmem:[%s6072_s20 + $0x198] sm:$0xff] }
 0x163   : > { %1286 = vmatprep.subr.bf16.mxu1 %v1018_v6  ;;  %v920_v6 = vunpack.c.h.s8.bf16 %v852_v41 }
 0x165   : > { %1246 = vmatpush2.bf16.msra.mxu0 %v953_v9  ;;  %v883_v9 = vld [vmem:[%s6072_s20 + $0x110] sm:$0xff] }
 0x166   : > { %1287 = vmatpush2.bf16.msra.mxu1 %v1017_v10  ;;  %1247 = vmatprep.subr.bf16.mxu0 %v950_v11  ;;  %v919_v10 = vunpack.c.h.s8.bf16 %v851_v8  ;;  %v983_v11 = vunpack.c.h.s8.bf16 %v883_v9 }
 0x167   : > { %1288 = vmatprep.subr.bf16.mxu1 %v1014_v12  ;;  %v916_v12 = vunpack.c.l.s8.bf16 %v852_v41  ;;  %v899_v41 = vld [vmem:[%s6072_s20 + $0x190] sm:$0xff] }
 0x169   : > { %1248 = vmatpush2.bf16.msra.mxu0 %v949_v15  ;;  %v912_v15 = vld [vmem:[%s6072_s20 + $0x1f8] sm:$0xff] }
 0x16a   : > { %1289 = vmatpush2.bf16.msra.mxu1 %v1013_v16  ;;  %1249 = vmatprep.subr.bf16.mxu0 %v946_v17  ;;  %v915_v16 = vunpack.c.l.s8.bf16 %v851_v8  ;;  %v979_v17 = vunpack.c.l.s8.bf16 %v883_v9  ;;  %v1040_v19 = vunpack.c.h.s8.bf16 %v912_v15  ;;  %v1036_v25 = vunpack.c.l.s8.bf16 %v912_v15 }
 0x16b   : > { %1290 = vmatprep.subr.bf16.mxu1 %v1010_v18  ;;  %v976_v18 = vunpack.c.h.s8.bf16 %v880_v14  ;;  %v1011_v9 = vunpack.c.l.s8.bf16 %v899_v41 }
 0x16d   : > { %1250 = vmatpush2.bf16.msra.mxu0 %v945_v21  ;;  %v911_v21 = vld [vmem:[%s6072_s20 + $0x1f0] sm:$0xff] }
 0x16e   : > { %1291 = vmatpush2.bf16.msra.mxu1 %v1009_v22  ;;  %1301 = vmatprep.subr.bf16.mxu0 %v944_v23  ;;  %v975_v22 = vunpack.c.h.s8.bf16 %v879_v20  ;;  %v1039_v23 = vunpack.c.h.s8.bf16 %v911_v21 }
 0x16f   : > { %1342 = vmatprep.subr.bf16.mxu1 %v1008_v24  ;;  %v972_v24 = vunpack.c.l.s8.bf16 %v880_v14  ;;  %v1441_v14 = vld [vmem:[%s6189_s12 + $0x30] sm:$0xff] }
 0x170   : > { %1252 = vmatmul.mubr.bf16.vlgmr.msra.gmra.mxu0 %v6139_v28 }
 0x171   : > { %1293 = vmatmul.mubr.bf16.vlgmr.msra.gmra.mxu1 %v6143_v29  ;;  %1302 = vmatpush1.bf16.msra.mxu0 %v943_v30  ;;  %v908_v30 = vld [vmem:[%s6072_s20 + $0x1d8] sm:$0xff] }
 0x172   : > { %1343 = vmatpush1.bf16.msra.mxu1 %v1007_v33  ;;  %1303 = vmatprep.subr.bf16.mxu0 %v940_v34  ;;  %v971_v33 = vunpack.c.l.s8.bf16 %v879_v20  ;;  %v1035_v34 = vunpack.c.l.s8.bf16 %v911_v21  ;;  %v1032_v37 = vunpack.c.h.s8.bf16 %v908_v30  ;;  %v1464_v21 = vunpack.c.h.s8.bf16 %v1441_v14 }
 0x173   : > { %1344 = vmatprep.subr.bf16.mxu1 %v1004_v36  ;;  %1333 = vmatprep.mubr.bf16.mxu0 %v6090_v49  ;;  %v968_v36 = vunpack.c.h.s8.bf16 %v876_v27 }
 0x174   : > { %1374 = vmatprep.mubr.bf16.mxu1 %v6092_v50 }
 0x175   : > { %1304 = vmatpush1.bf16.msra.mxu0 %v939_v31  ;;  %v907_v31 = vld [vmem:[%s6072_s20 + $0x1d0] sm:$0xff] }
 0x176   : > { %1345 = vmatpush1.bf16.msra.mxu1 %v1003_v32  ;;  %1305 = vmatprep.subr.bf16.mxu0 %v936_v40  ;;  %v967_v32 = vunpack.c.h.s8.bf16 %v875_v38  ;;  %v1031_v39 = vunpack.c.h.s8.bf16 %v907_v31  ;;  %v964_v40 = vunpack.c.l.s8.bf16 %v876_v27 }
 0x177   : > { %1346 = vmatprep.subr.bf16.mxu1 %v1000_v42  ;;  %v1028_v42 = vunpack.c.l.s8.bf16 %v908_v30 }
 0x179   : > { %1306 = vmatpush1.bf16.msra.mxu0 %v935_v44  ;;  %v963_v44 = vunpack.c.l.s8.bf16 %v875_v38 }
 0x17a   : > { %1347 = vmatpush1.bf16.msra.mxu1 %v999_v45  ;;  %1307 = vmatprep.subr.bf16.mxu0 %v932_v48  ;;  %v1027_v45 = vunpack.c.l.s8.bf16 %v907_v31  ;;  %v1024_v48 = vunpack.c.h.s8.bf16 %v904_v43  ;;  %v1436_v31 = vld [vmem:[%s6189_s12 + $0x8] sm:$0xff] }
 0x17b   : > { %1348 = vmatprep.subr.bf16.mxu1 %v996_v51  ;;  %v871_v51 = vld [vmem:[%s6072_s20 + $0xb0] sm:$0xff] }
 0x17c   : > { %v959_v54 = vunpack.c.h.s8.bf16 %v871_v51  ;;  %v955_v63 = vunpack.c.l.s8.bf16 %v871_v51  ;;  %v1435_v51 = vld [vmem:[%s6189_s12] sm:$0xff] }
 0x17d   : > { %1308 = vmatpush1.bf16.msra.mxu0 %v931_v56  ;;  %v1023_v56 = vunpack.c.h.s8.bf16 %v903_v52 }
 0x17e   : > { %1349 = vmatpush1.bf16.msra.mxu1 %v995_v57  ;;  %1309 = vmatprep.subr.bf16.mxu0 %v928_v58  ;;  %v956_v57 = vunpack.c.l.s8.bf16 %v872_v35  ;;  %v1020_v58 = vunpack.c.l.s8.bf16 %v904_v43  ;;  %v1446_v35 = vld [vmem:[%s6189_s12 + $0x58] sm:$0xff]  ;;  %v1453_v43 = vunpack.c.l.s8.bf16 %v1436_v31 }
 0x17f   : > { %1350 = vmatprep.subr.bf16.mxu1 %v992_v59  ;;  %v868_v59 = vld [vmem:[%s6072_s20 + $0x98] sm:$0xff] }
 0x181   : > { %1310 = vmatpush1.bf16.msra.mxu0 %v927_v0  ;;  %v1019_v0 = vunpack.c.l.s8.bf16 %v903_v52  ;;  %v1449_v52 = vld [vmem:[%s6189_s12 + $0x70] sm:$0xff] }
 0x182   : > { %1351 = vmatpush1.bf16.msra.mxu1 %v991_v1  ;;  %1311 = vmatprep.subr.bf16.mxu0 %v924_v2  ;;  %v952_v1 = vunpack.c.h.s8.bf16 %v868_v59  ;;  %v1016_v2 = vunpack.c.h.s8.bf16 %v900_v62 }
 0x183   : > { %1352 = vmatprep.subr.bf16.mxu1 %v988_v3  ;;  %v867_v3 = vld [vmem:[%s6072_s20 + $0x90] sm:$0xff] }
 0x184   : > { %v951_v46 = vunpack.c.h.s8.bf16 %v867_v3  ;;  %v947_v8 = vunpack.c.l.s8.bf16 %v867_v3 }
 0x185   : > { %1312 = vmatpush1.bf16.msra.mxu0 %v923_v4  ;;  %v1015_v4 = vunpack.c.h.s8.bf16 %v899_v41  ;;  %v1444_v41 = vld [vmem:[%s6189_s12 + $0x48] sm:$0xff] }
 0x186   : > { %1353 = vmatpush1.bf16.msra.mxu1 %v987_v5  ;;  %1313 = vmatprep.subr.bf16.mxu0 %v920_v6  ;;  %v948_v5 = vunpack.c.l.s8.bf16 %v868_v59  ;;  %v1012_v6 = vunpack.c.l.s8.bf16 %v900_v62 }
 0x187   : > { %1354 = vmatprep.subr.bf16.mxu1 %v984_v7  ;;  %v1442_v7 = vld [vmem:[%s6189_s12 + $0x38] sm:$0xff] }
 0x189   : > { %1314 = vmatpush1.bf16.msra.mxu0 %v919_v10  ;;  %v1466_v10 = vunpack.c.h.s8.bf16 %v1442_v7 }
 0x18a   : > { %1355 = vmatpush1.bf16.msra.mxu1 %v983_v11  ;;  %1315 = vmatprep.subr.bf16.mxu0 %v916_v12  ;;  %v1438_v11 = vld [vmem:[%s6189_s12 + $0x18] sm:$0xff] }
 0x18b   : > { %1356 = vmatprep.subr.bf16.mxu1 %v980_v13  ;;  %v1458_v12 = vunpack.c.h.s8.bf16 %v1438_v11  ;;  %v1465_v13 = vunpack.c.l.s8.bf16 %v1442_v7 }
 0x18d   : > { %1316 = vmatpush1.bf16.msra.mxu0 %v915_v16 }
 0x18e   : > { %1357 = vmatpush1.bf16.msra.mxu1 %v979_v17  ;;  %1317 = vmatprep.subr.bf16.mxu0 %v976_v18  ;;  %v1457_v18 = vunpack.c.l.s8.bf16 %v1438_v11 }
 0x18f   : > { %1358 = vmatprep.subr.bf16.mxu1 %v1040_v19 }
 0x191   : > { %1318 = vmatpush2.bf16.msra.mxu0 %v975_v22  ;;  %v1437_v22 = vld [vmem:[%s6189_s12 + $0x10] sm:$0xff] }
 0x192   : > { %1359 = vmatpush2.bf16.msra.mxu1 %v1039_v23  ;;  %1319 = vmatprep.subr.bf16.mxu0 %v972_v24  ;;  %v1456_v27 = vunpack.c.h.s8.bf16 %v1437_v22 }
 0x193   : > { %1360 = vmatprep.subr.bf16.mxu1 %v1036_v25 }
 0x195   : > { %1320 = vmatpush2.bf16.msra.mxu0 %v971_v33 }
 0x196   : > { %1361 = vmatpush2.bf16.msra.mxu1 %v1035_v34  ;;  %1321 = vmatprep.subr.bf16.mxu0 %v968_v36  ;;  %v1463_v34 = vunpack.c.l.s8.bf16 %v1441_v14  ;;  %v1440_v36 = vld [vmem:[%s6189_s12 + $0x28] sm:$0xff]  ;;  %v1447_v14 = vld [vmem:[%s6189_s12 + $0x60] sm:$0xff] }
 0x197   : > { %1362 = vmatprep.subr.bf16.mxu1 %v1032_v37  ;;  %v1455_v37 = vunpack.c.l.s8.bf16 %v1437_v22  ;;  %v1462_v38 = vunpack.c.h.s8.bf16 %v1440_v36 }
 0x199   : > { %1322 = vmatpush2.bf16.msra.mxu0 %v967_v32  ;;  %v1454_v32 = vunpack.c.h.s8.bf16 %v1436_v31  ;;  %v6233_v31 = vld [vmem:[%s6230_s29] sm:$0xf] }
 0x19a   : > { %1363 = vmatpush2.bf16.msra.mxu1 %v1031_v39  ;;  %1323 = vmatprep.subr.bf16.mxu0 %v964_v40  ;;  %v1461_v39 = vunpack.c.l.s8.bf16 %v1440_v36  ;;  %v1439_v40 = vld [vmem:[%s6189_s12 + $0x20] sm:$0xff]  ;;  %v6228_v36 = vsub.s32 0, %v5965_v26 }
 0x19b   : > { %1364 = vmatprep.subr.bf16.mxu1 %v1028_v42  ;;  %v1450_v42 = vld [vmem:[%s6189_s12 + $0x78] sm:$0xff]  ;;  %v1459_v59 = vunpack.c.l.s8.bf16 %v1439_v40 }
 0x19d   : > { %1324 = vmatpush2.bf16.msra.mxu0 %v963_v44  ;;  %v1482_v44 = vunpack.c.h.s8.bf16 %v1450_v42 }
 0x19e   : > { %1365 = vmatpush2.bf16.msra.mxu1 %v1027_v45  ;;  %1325 = vmatprep.subr.bf16.mxu0 %v960_v47  ;;  %v1474_v45 = vunpack.c.h.s8.bf16 %v1446_v35  ;;  %v1481_v47 = vunpack.c.l.s8.bf16 %v1450_v42 }
 0x19f   : > { %1366 = vmatprep.subr.bf16.mxu1 %v1024_v48  ;;  %v1460_v48 = vunpack.c.h.s8.bf16 %v1439_v40 }
 0x1a1   : > { %1326 = vmatpush2.bf16.msra.mxu0 %v959_v54  ;;  %v1473_v54 = vunpack.c.l.s8.bf16 %v1446_v35 }
 0x1a2   : > { %1367 = vmatpush2.bf16.msra.mxu1 %v1023_v56  ;;  %1327 = vmatprep.subr.bf16.mxu0 %v956_v57  ;;  %v1452_v56 = vunpack.c.h.s8.bf16 %v1435_v51  ;;  %v1480_v57 = vunpack.c.h.s8.bf16 %v1449_v52 }
 0x1a3   : > { %1368 = vmatprep.subr.bf16.mxu1 %v1020_v58  ;;  %v1445_v58 = vld [vmem:[%s6189_s12 + $0x50] sm:$0xff] }
 0x1a4   : > { %v1472_v62 = vunpack.c.h.s8.bf16 %v1445_v58 }
 0x1a5   : > { %1328 = vmatpush2.bf16.msra.mxu0 %v955_v63  ;;  %v1451_v63 = vunpack.c.l.s8.bf16 %v1435_v51 }
 0x1a6   : > { %1369 = vmatpush2.bf16.msra.mxu1 %v1019_v0  ;;  %1329 = vmatprep.subr.bf16.mxu0 %v952_v1  ;;  %v1479_v0 = vunpack.c.l.s8.bf16 %v1449_v52  ;;  %v1448_v1 = vld [vmem:[%s6189_s12 + $0x68] sm:$0xff] }
 0x1a7   : > { %1370 = vmatprep.subr.bf16.mxu1 %v1016_v2  ;;  %v1471_v2 = vunpack.c.l.s8.bf16 %v1445_v58  ;;  %v1478_v3 = vunpack.c.h.s8.bf16 %v1448_v1  ;;  %v1477_v7 = vunpack.c.l.s8.bf16 %v1448_v1 }
 0x1a9   : > { %1330 = vmatpush2.bf16.msra.mxu0 %v951_v46  ;;  %v1470_v46 = vunpack.c.h.s8.bf16 %v1444_v41 }
 0x1aa   : > { %1371 = vmatpush2.bf16.msra.mxu1 %v1015_v4  ;;  %1331 = vmatprep.subr.bf16.mxu0 %v948_v5 }
 0x1ab   : > { %1372 = vmatprep.subr.bf16.mxu1 %v1012_v6 }
 0x1ad   : > { %1332 = vmatpush2.bf16.msra.mxu0 %v947_v8 }
 0x1ae   : > { %1373 = vmatpush2.bf16.msra.mxu1 %v1011_v9  ;;  %5108 = vmatprep.subr.bf16.mxu0 %v1466_v10  ;;  %v1469_v10 = vunpack.c.l.s8.bf16 %v1444_v41 }
 0x1af   : > { %5130 = vmatprep.subr.bf16.mxu1 %v1482_v44 }
 0x1b0   : > { %v1075_v15 = vpop.f32.mrf.mxu0  ;;  %1334 = vmatmul.mubr.bf16.vlgmr.msra.gmra.mxu0 %v6139_v28 }
 0x1b1   : > { %v1116_v16 = vpop.f32.mrf.mxu1  ;;  %1375 = vmatmul.mubr.bf16.vlgmr.msra.gmra.mxu1 %v6143_v29  ;;  %5109 = vmatpush3.bf16.msra.mxu0 %v1458_v12 }
 0x1b2   : > { %v6196_v17 = vadd.f32 %v1116_v16, %v1075_v15  ;;  %v1077_v19 = vpop.f32.mrf.mxu0  ;;  %5110 = vmatprep.subr.bf16.mxu0 %v1465_v13  ;;  %5131 = vmatpush3.bf16.msra.mxu1 %v1474_v45  ;;  %v1476_v15 = vunpack.c.h.s8.bf16 %v1447_v14  ;;  %v1443_v16 = vld [vmem:[%s6189_s12 + $0x40] sm:$0xff]  ;;  %v1406_v45 = vrot.slane %v6233_v31, %v6228_v36 }
 0x1b3   : > { %v1118_v20 = vpop.f32.mrf.mxu1  ;;  %5132 = vmatprep.subr.bf16.mxu1 %v1481_v47 }
 0x1b4   : > { %v6199_v23 = vadd.f32 %v1118_v20, %v1077_v19  ;;  %v1079_v24 = vpop.f32.mrf.mxu0  ;;  %v1468_v20 = vunpack.c.h.s8.bf16 %v1443_v16 }
 0x1b5   : > { %v1120_v25 = vpop.f32.mrf.mxu1  ;;  %5111 = vmatpush3.bf16.msra.mxu0 %v1457_v18  ;;  %v1475_v24 = vunpack.c.l.s8.bf16 %v1447_v14  ;;  %v4636_v14 = vld [vmem:[%s5951_s19 + $0x220] sm:$0xff] }
 0x1b6   : > { %v1080_v30 = vpop.f32.mrf.mxu0  ;;  %5112 = vmatprep.subr.bf16.mxu0 %v1464_v21  ;;  %5133 = vmatpush3.bf16.msra.mxu1 %v1473_v54  ;;  %v4645_v21 = vld [vmem:[%s5951_s19 + $0x268] sm:$0xff]  ;;  %v1467_v25 = vunpack.c.l.s8.bf16 %v1443_v16 }
 0x1b7   : > { %v1121_v33 = vpop.f32.mrf.mxu1  ;;  %5134 = vmatprep.subr.bf16.mxu1 %v1480_v57  ;;  %v1678_v22 = vunpack.c.h.s8.bf16 %v4645_v21  ;;  %v1674_v41 = vunpack.c.l.s8.bf16 %v4645_v21  ;;  %v4632_v21 = vld [vmem:[%s5951_s19 + $0x200] sm:$0xff] }
 0x1b8   : > { %v6223_v33 = vpop.permute.xlu0 %1212 }
 0x1b9   : > { %5113 = vmatpush3.bf16.msra.mxu0 %v1456_v27  ;;  %v6219_v27 = vld [vmem:[%s5951_s19 + $0x368] sm:$0xff]  ;;  %v1215_v35 = vmul.f32 %v6223_v33, %v6196_v17  ;;  %v1216_v51 = vmul.f32 %v6223_v33, %v6199_v23 }
 0x1ba   : > { %5114 = vmatprep.subr.bf16.mxu0 %v1463_v34  ;;  %5135 = vmatpush3.bf16.msra.mxu1 %v1472_v62  ;;  %v1742_v30 = vunpack.c.h.s8.bf16 %v6219_v27 }
 0x1bb   : > { %5136 = vmatprep.subr.bf16.mxu1 %v1479_v0  ;;  %v4644_v0 = vld [vmem:[%s5951_s19 + $0x260] sm:$0xff] }
 0x1bc   : > { %v6225_v34 = vpop.permute.xlu0 %1390 }
 0x1bd   : > { %5115 = vmatpush3.bf16.msra.mxu0 %v1455_v37 }
 0x1be   : > { %5116 = vmatprep.subr.bf16.mxu0 %v1462_v38  ;;  %5137 = vmatpush3.bf16.msra.mxu1 %v1471_v2 }
 0x1bf   : > { %5138 = vmatprep.subr.bf16.mxu1 %v1478_v3  ;;  %v1677_v3 = vunpack.c.h.s8.bf16 %v4644_v0 }
 0x1c1   : > { %5117 = vmatpush3.bf16.msra.mxu0 %v1454_v32 }
 0x1c2   : > { %5118 = vmatprep.subr.bf16.mxu0 %v1461_v39  ;;  %5139 = vmatpush3.bf16.msra.mxu1 %v1470_v46  ;;  %v6236_v39 = vsub.s32 1, %v5965_v26  ;;  %v4641_v46 = vld [vmem:[%s5951_s19 + $0x248] sm:$0xff] }
 0x1c3   : > { %5140 = vmatprep.subr.bf16.mxu1 %v1477_v7  ;;  %v4640_v7 = vld [vmem:[%s5951_s19 + $0x240] sm:$0xff] }
 0x1c5   : > { %5119 = vmatpush3.bf16.msra.mxu0 %v1453_v43 }
 0x1c6   : > { %5120 = vmatprep.subr.bf16.mxu0 %v1460_v48  ;;  %5141 = vmatpush3.bf16.msra.mxu1 %v1469_v10  ;;  %v4637_v10 = vld [vmem:[%s5951_s19 + $0x228] sm:$0xff] }
 0x1c7   : > { %5142 = vmatprep.subr.bf16.mxu1 %v1476_v15  ;;  %v1661_v15 = vunpack.c.h.s8.bf16 %v4636_v14  ;;  %v1658_v16 = vunpack.c.l.s8.bf16 %v4637_v10 }
 0x1c9   : > { %5121 = vmatpush3.bf16.msra.mxu0 %v1452_v56  ;;  %v1410_v56 = vrot.slane %v6233_v31, %v6236_v39 }
 0x1ca   : > { %5122 = vmatprep.subr.bf16.mxu0 %v1459_v59  ;;  %5143 = vmatpush3.bf16.msra.mxu1 %v1468_v20 }
 0x1cb   : > { %5144 = vmatprep.subr.bf16.mxu1 %v1475_v24 }
 0x1cd   : > { %5123 = vmatpush3.bf16.msra.mxu0 %v1451_v63 }
 0x1ce   : > { %1970 = vmatprep.subr.bf16.mxu0 %v1678_v22  ;;  %5145 = vmatpush3.bf16.msra.mxu1 %v1467_v25  ;;  %v1653_v22 = vunpack.c.h.s8.bf16 %v4632_v21  ;;  %v4661_v25 = vld [vmem:[%s5951_s19 + $0x2e8] sm:$0xff] }
 0x1cf   : > { %2011 = vmatprep.subr.bf16.mxu1 %v1742_v30  ;;  %v1649_v30 = vunpack.c.l.s8.bf16 %v4632_v21 }
 0x1f0   : > { %v1157_v4 = vpop.f32.mrf.mxu0 }
 0x1f1   : > { %v1198_v5 = vpop.f32.mrf.mxu1 }
 0x1f2   : > { %v6211_v6 = vadd.f32 %v1198_v5, %v1157_v4  ;;  %v1159_v8 = vpop.f32.mrf.mxu0  ;;  %v1673_v4 = vunpack.c.l.s8.bf16 %v4644_v0  ;;  %v1670_v5 = vunpack.c.h.s8.bf16 %v4641_v46  ;;  %v6267_v0 = vsub.s32 3, %v5965_v26 }
 0x1f3   : > { %v1200_v9 = vpop.f32.mrf.mxu1 }
 0x1f4   : > { %v6213_v11 = vadd.f32 %v1200_v9, %v1159_v8  ;;  %v1161_v12 = vpop.f32.mrf.mxu0  ;;  %v1669_v8 = vunpack.c.h.s8.bf16 %v4640_v7  ;;  %v1666_v9 = vunpack.c.l.s8.bf16 %v4641_v46  ;;  %v1217_v46 = vmul.f32 %v6223_v33, %v6211_v6 }
 0x1f5   : > { %v1202_v13 = vpop.f32.mrf.mxu1  ;;  %v1665_v12 = vunpack.c.l.s8.bf16 %v4640_v7 }
 0x1f6   : > { %v1162_v18 = vpop.f32.mrf.mxu0  ;;  %v1662_v13 = vunpack.c.h.s8.bf16 %v4637_v10 }
 0x1f7   : > { %v1203_v19 = vpop.f32.mrf.mxu1  ;;  %v4633_v18 = vld [vmem:[%s5951_s19 + $0x208] sm:$0xff] }
 0x1f8   : > { %v1657_v19 = vunpack.c.l.s8.bf16 %v4636_v14  ;;  %v1654_v20 = vunpack.c.h.s8.bf16 %v4633_v18  ;;  %v1650_v24 = vunpack.c.l.s8.bf16 %v4633_v18 }
 0x230   : > { %v1253_v37 = vpop.f32.mrf.mxu0 }
 0x231   : > { %v1294_v38 = vpop.f32.mrf.mxu1 }
 0x232   : > { %v1295_v32 = vadd.f32 %v1294_v38, %v1253_v37  ;;  %v1255_v40 = vpop.f32.mrf.mxu0  ;;  %v1710_v37 = vunpack.c.h.s8.bf16 %v4661_v25  ;;  %v4660_v38 = vld [vmem:[%s5951_s19 + $0x2e0] sm:$0xff] }
 0x233   : > { %v1296_v42 = vpop.f32.mrf.mxu1 }
 0x234   : > { %v1393_v43 = vmul.f32 %v6225_v34, %v1295_v32  ;;  %v1297_v44 = vadd.f32 %v1296_v42, %v1255_v40  ;;  %v1257_v47 = vpop.f32.mrf.mxu0  ;;  %v1709_v32 = vunpack.c.h.s8.bf16 %v4660_v38  ;;  %v1706_v40 = vunpack.c.l.s8.bf16 %v4661_v25  ;;  %v4657_v42 = vld [vmem:[%s5951_s19 + $0x2c8] sm:$0xff] }
 0x235   : > { %v1298_v48 = vpop.f32.mrf.mxu1  ;;  %v1698_v47 = vunpack.c.l.s8.bf16 %v4657_v42 }
 0x236   : > { %v1397_v52 = vadd.f32 %v1393_v43, %v1215_v35  ;;  %v1394_v54 = vmul.f32 %v6225_v34, %v1297_v44  ;;  %v1258_v17 = vpop.f32.mrf.mxu0  ;;  %v1705_v35 = vunpack.c.l.s8.bf16 %v4660_v38  ;;  %v1702_v43 = vunpack.c.h.s8.bf16 %v4657_v42  ;;  %v4656_v44 = vld [vmem:[%s5951_s19 + $0x2c0] sm:$0xff]  ;;  %v4653_v48 = vld [vmem:[%s5951_s19 + $0x2a8] sm:$0xff] }
 0x237   : > { %v1299_v57 = vpop.f32.mrf.mxu1  ;;  %v1690_v17 = vunpack.c.l.s8.bf16 %v4653_v48  ;;  %v4673_v42 = vld [vmem:[%s5951_s19 + $0x348] sm:$0xff] }
 0x238   : > { %v1398_v58 = vadd.f32 %v1394_v54, %v1216_v51  ;;  %v1423_v59 = vadd.f32 %v1406_v45, %v1397_v52  ;;  %v1701_v45 = vunpack.c.h.s8.bf16 %v4656_v44  ;;  %v1697_v51 = vunpack.c.l.s8.bf16 %v4656_v44  ;;  %v4652_v54 = vld [vmem:[%s5951_s19 + $0x2a0] sm:$0xff] }
 0x239   : > { %v1694_v52 = vunpack.c.h.s8.bf16 %v4653_v48  ;;  %v6263_v57 = vsub.s32 2, %v5965_v26  ;;  %v1218_v26 = vmul.f32 %v6223_v33, %v6213_v11  ;;  %v4642_v48 = vld [vmem:[%s5951_s19 + $0x250] sm:$0xff] }
 0x23a   : > { %v1424_v62 = vadd.f32 %v1410_v56, %v1398_v58  ;;  %v1427_v63 = vmax.f32 %v1423_v59, 0.0  ;;  %v1693_v56 = vunpack.c.h.s8.bf16 %v4652_v54  ;;  %v4649_v58 = vld [vmem:[%s5951_s19 + $0x288] sm:$0xff] }
 0x23c   : > { %v1428_v1 = vmax.f32 %v1424_v62, 0.0  ;;  %v1431_v23 = vpack.c.bf16 %v1427_v63, %v1427_v63 }
 0x23e   : > { %v1432_v2 = vpack.c.bf16 %v1428_v1, %v1428_v1  ;;  %v1689_v1 = vunpack.c.l.s8.bf16 %v4652_v54  ;;  %v1730_v54 = vunpack.c.l.s8.bf16 %v4673_v42 }
 0x240   : > { %1515 = vmatprep.mubr.bf16.mxu0 %v1432_v2 }
 0x241   : > { %1516 = vmatmul.mubr.bf16.vlgmr.msra.gmra.mxu0 %v1431_v23  ;;  %v1686_v23 = vunpack.c.h.s8.bf16 %v4649_v58 }
 0x242   : > { %1971 = vmatpush1.bf16.msra.mxu0 %v1677_v3  ;;  %2002 = vmatprep.mubr.bf16.mxu0 %v5986_v53 }
 0x243   : > { %1972 = vmatprep.subr.bf16.mxu0 %v1674_v41  ;;  %v4648_v41 = vld [vmem:[%s5951_s19 + $0x280] sm:$0xff] }
 0x244   : > { %v1685_v6 = vunpack.c.h.s8.bf16 %v4648_v41  ;;  %v1681_v33 = vunpack.c.l.s8.bf16 %v4648_v41 }
 0x246   : > { %1973 = vmatpush1.bf16.msra.mxu0 %v1673_v4 }
 0x247   : > { %1974 = vmatprep.subr.bf16.mxu0 %v1670_v5  ;;  %v1414_v5 = vrot.slane %v6233_v31, %v6263_v57 }
 0x24a   : > { %1975 = vmatpush1.bf16.msra.mxu0 %v1669_v8 }
 0x24b   : > { %1976 = vmatprep.subr.bf16.mxu0 %v1666_v9 }
 0x24e   : > { %1977 = vmatpush1.bf16.msra.mxu0 %v1665_v12 }
 0x24f   : > { %1978 = vmatprep.subr.bf16.mxu0 %v1662_v13  ;;  %v1418_v13 = vrot.slane %v6233_v31, %v6267_v0  ;;  %v4646_v31 = vld [vmem:[%s5951_s19 + $0x270] sm:$0xff] }
 0x250   : > { %v1675_v44 = vunpack.c.l.s8.bf16 %v4646_v31 }
 0x252   : > { %1979 = vmatpush1.bf16.msra.mxu0 %v1661_v15 }
 0x253   : > { %1980 = vmatprep.subr.bf16.mxu0 %v1658_v16  ;;  %v1682_v16 = vunpack.c.l.s8.bf16 %v4649_v58  ;;  %v4669_v58 = vld [vmem:[%s5951_s19 + $0x328] sm:$0xff] }
 0x256   : > { %1981 = vmatpush1.bf16.msra.mxu0 %v1657_v19 }
 0x257   : > { %1982 = vmatprep.subr.bf16.mxu0 %v1654_v20  ;;  %v4647_v20 = vld [vmem:[%s5951_s19 + $0x278] sm:$0xff] }
 0x25a   : > { %1983 = vmatpush1.bf16.msra.mxu0 %v1653_v22  ;;  %v1680_v22 = vunpack.c.h.s8.bf16 %v4647_v20 }
 0x25b   : > { %1984 = vmatprep.subr.bf16.mxu0 %v1650_v24 }
 0x25e   : > { %1985 = vmatpush1.bf16.msra.mxu0 %v1649_v30 }
 0x25f   : > { %1986 = vmatprep.subr.bf16.mxu0 %v1710_v37  ;;  %v1679_v37 = vunpack.c.h.s8.bf16 %v4646_v31  ;;  %v4662_v31 = vld [vmem:[%s5951_s19 + $0x2f0] sm:$0xff] }
 0x262   : > { %1987 = vmatpush2.bf16.msra.mxu0 %v1709_v32  ;;  %v1738_v32 = vunpack.c.l.s8.bf16 %v6219_v27 }
 0x263   : > { %1988 = vmatprep.subr.bf16.mxu0 %v1706_v40  ;;  %v1676_v40 = vunpack.c.l.s8.bf16 %v4647_v20  ;;  %v4663_v20 = vld [vmem:[%s5951_s19 + $0x2f8] sm:$0xff] }
 0x266   : > { %1989 = vmatpush2.bf16.msra.mxu0 %v1705_v35  ;;  %v4643_v35 = vld [vmem:[%s5951_s19 + $0x258] sm:$0xff] }
 0x267   : > { %1990 = vmatprep.subr.bf16.mxu0 %v1702_v43  ;;  %v1672_v27 = vunpack.c.h.s8.bf16 %v4643_v35 }
 0x26a   : > { %1991 = vmatpush2.bf16.msra.mxu0 %v1701_v45  ;;  %v1734_v45 = vunpack.c.h.s8.bf16 %v4673_v42  ;;  %v1707_v42 = vunpack.c.l.s8.bf16 %v4662_v31 }
 0x26b   : > { %1992 = vmatprep.subr.bf16.mxu0 %v1698_v47  ;;  %v4672_v47 = vld [vmem:[%s5951_s19 + $0x340] sm:$0xff] }
 0x26e   : > { %1993 = vmatpush2.bf16.msra.mxu0 %v1697_v51  ;;  %v1733_v51 = vunpack.c.h.s8.bf16 %v4672_v47 }
 0x26f   : > { %1994 = vmatprep.subr.bf16.mxu0 %v1694_v52  ;;  %v1671_v52 = vunpack.c.h.s8.bf16 %v4642_v48 }
 0x270   : > { %v1335_v59 = vpop.f32.mrf.mxu0 }
 0x271   : > { %v1376_v62 = vpop.f32.mrf.mxu1 }
 0x272   : > { %v1377_v63 = vadd.f32 %v1376_v62, %v1335_v59  ;;  %1995 = vmatpush2.bf16.msra.mxu0 %v1693_v56  ;;  %v1337_v2 = vpop.f32.mrf.mxu0  ;;  %v1668_v56 = vunpack.c.l.s8.bf16 %v4643_v35  ;;  %v4639_v59 = vld [vmem:[%s5951_s19 + $0x238] sm:$0xff]  ;;  %v1729_v62 = vunpack.c.l.s8.bf16 %v4672_v47 }
 0x273   : > { %v1378_v3 = vpop.f32.mrf.mxu1  ;;  %1996 = vmatprep.subr.bf16.mxu0 %v1690_v17  ;;  %v4761_v17 = vld [vmem:[%s6011_s15 + $0x1] ss:$0 sm:$0xff]  ;;  %s5107_s15 = sshll.u32 %s5711_s17, 7 }
 0x274   : > { %v1395_v4 = vmul.f32 %v6225_v34, %v1377_v63  ;;  %v1379_v7 = vadd.f32 %v1378_v3, %v1337_v2  ;;  %v1339_v8 = vpop.f32.mrf.mxu0  ;;  %2142 = vperm.xlu1 %5377, %v4761_v17   ;;  %v1667_v63 = vunpack.c.l.s8.bf16 %v4642_v48  ;;  %v4668_v2 = vld [vmem:[%s5951_s19 + $0x320] sm:$0xff]  ;;  %v1664_v3 = vunpack.c.h.s8.bf16 %v4639_v59 }
 0x275   : > { %v1380_v9 = vpop.f32.mrf.mxu1  ;;  %v1725_v41 = vunpack.c.h.s8.bf16 %v4668_v2  ;;  %v1721_v8 = vunpack.c.l.s8.bf16 %v4668_v2 }
 0x276   : > { %v1399_v10 = vadd.f32 %v1395_v4, %v1217_v46  ;;  %v1396_v12 = vmul.f32 %v6225_v34, %v1379_v7  ;;  %1997 = vmatpush2.bf16.msra.mxu0 %v1689_v1  ;;  %v1340_v14 = vpop.f32.mrf.mxu0  ;;  %v4676_v34 = vld [vmem:[%s5951_s19 + $0x360] sm:$0xff]  ;;  %v1726_v1 = vunpack.c.h.s8.bf16 %v4669_v58  ;;  %v1722_v4 = vunpack.c.l.s8.bf16 %v4669_v58  ;;  %v4665_v7 = vld [vmem:[%s5951_s19 + $0x308] sm:$0xff] }
 0x277   : > { %v1381_v15 = vpop.f32.mrf.mxu1  ;;  %1998 = vmatprep.subr.bf16.mxu0 %v1686_v23  ;;  %v1741_v30 = vunpack.c.h.s8.bf16 %v4676_v34  ;;  %v1737_v43 = vunpack.c.l.s8.bf16 %v4676_v34  ;;  %v4638_v23 = vld [vmem:[%s5951_s19 + $0x230] sm:$0xff]  ;;  %v4692_v34 = vld [vmem:[%s5951_s19 + $0x3e0] sm:$0xff] }
 0x278   : > { %v1425_v18 = vadd.f32 %v1414_v5, %v1399_v10  ;;  %v1400_v19 = vadd.f32 %v1396_v12, %v1218_v26  ;;  %v1663_v46 = vunpack.c.h.s8.bf16 %v4638_v23  ;;  %v1660_v5 = vunpack.c.l.s8.bf16 %v4639_v59  ;;  %v4635_v26 = vld [vmem:[%s5951_s19 + $0x218] sm:$0xff]  ;;  %v4664_v12 = vld [vmem:[%s5951_s19 + $0x300] sm:$0xff] }
 0x279   : > { %v1659_v9 = vunpack.c.l.s8.bf16 %v4638_v23  ;;  %v1718_v10 = vunpack.c.h.s8.bf16 %v4665_v7  ;;  %v1717_v14 = vunpack.c.h.s8.bf16 %v4664_v12  ;;  %v4684_v59 = vld [vmem:[%s5951_s19 + $0x3a0] sm:$0xff] }
 0x27a   : > { %v1426_v11 = vadd.f32 %v1418_v13, %v1400_v19  ;;  %1999 = vmatpush2.bf16.msra.mxu0 %v1685_v6  ;;  %v1429_v21 = vmax.f32 %v1425_v18, 0.0  ;;  %v1656_v13 = vunpack.c.h.s8.bf16 %v4635_v26  ;;  %v4634_v6 = vld [vmem:[%s5951_s19 + $0x210] sm:$0xff]  ;;  %v1652_v18 = vunpack.c.l.s8.bf16 %v4635_v26  ;;  %v4693_v19 = vld [vmem:[%s5951_s19 + $0x3e8] sm:$0xff]  ;;  %v4680_v26 = vld [vmem:[%s5951_s19 + $0x380] sm:$0xff] }
 0x27b   : > { %2000 = vmatprep.subr.bf16.mxu0 %v1682_v16  ;;  %v1655_v15 = vunpack.c.h.s8.bf16 %v4634_v6  ;;  %v1714_v16 = vunpack.c.l.s8.bf16 %v4665_v7 }
 0x27c   : > { %v1430_v24 = vmax.f32 %v1426_v11, 0.0  ;;  %v1433_v38 = vpack.c.bf16 %v1429_v21, %v1429_v21  ;;  %v1713_v11 = vunpack.c.l.s8.bf16 %v4664_v12  ;;  %v1774_v21 = vunpack.c.h.s8.bf16 %v4693_v19 }
 0x27e   : > { %v1434_v25 = vpack.c.bf16 %v1430_v24, %v1430_v24  ;;  %2001 = vmatpush2.bf16.msra.mxu0 %v1681_v33  ;;  %v1651_v33 = vunpack.c.l.s8.bf16 %v4634_v6  ;;  %v1773_v24 = vunpack.c.h.s8.bf16 %v4692_v34 }
 0x27f   : > { %2052 = vmatprep.subr.bf16.mxu0 %v1680_v22  ;;  %v1712_v22 = vunpack.c.h.s8.bf16 %v4663_v20 }
 0x280   : > { %1555 = vmatprep.mubr.bf16.mxu1 %v1434_v25  ;;  %v1711_v25 = vunpack.c.h.s8.bf16 %v4662_v31 }
 0x281   : > { %1556 = vmatmul.mubr.bf16.vlgmr.msra.gmra.mxu1 %v1433_v38  ;;  %2003 = vmatmul.mubr.bf16.vlgmr.msra.gmra.mxu0 %v6032_v60  ;;  %v4689_v38 = vld [vmem:[%s5951_s19 + $0x3c8] sm:$0xff] }
 0x282   : > { %2012 = vmatpush1.bf16.msra.mxu1 %v1741_v30  ;;  %2053 = vmatpush1.bf16.msra.mxu0 %v1679_v37  ;;  %v1770_v30 = vunpack.c.l.s8.bf16 %v4693_v19  ;;  %v1708_v37 = vunpack.c.l.s8.bf16 %v4663_v20  ;;  %v1766_v35 = vunpack.c.h.s8.bf16 %v4689_v38  ;;  %v1762_v48 = vunpack.c.l.s8.bf16 %v4689_v38  ;;  %v4678_v20 = vld [vmem:[%s5951_s19 + $0x370] sm:$0xff] }
 0x283   : > { %2013 = vmatprep.subr.bf16.mxu1 %v1738_v32  ;;  %2054 = vmatprep.subr.bf16.mxu0 %v1676_v40  ;;  %v4659_v32 = vld [vmem:[%s5951_s19 + $0x2d8] sm:$0xff]  ;;  %v1769_v40 = vunpack.c.l.s8.bf16 %v4692_v34 }
 0x284   : > { %2043 = vmatprep.mubr.bf16.mxu1 %v5992_v55  ;;  %2084 = vmatprep.mubr.bf16.mxu0 %v5986_v53 }
 0x286   : > { %2014 = vmatpush1.bf16.msra.mxu1 %v1737_v43  ;;  %2055 = vmatpush1.bf16.msra.mxu0 %v1675_v44  ;;  %v4688_v43 = vld [vmem:[%s5951_s19 + $0x3c0] sm:$0xff]  ;;  %v1704_v44 = vunpack.c.h.s8.bf16 %v4659_v32 }
 0x287   : > { %2015 = vmatprep.subr.bf16.mxu1 %v1734_v45  ;;  %2056 = vmatprep.subr.bf16.mxu0 %v1672_v27  ;;  %v4658_v45 = vld [vmem:[%s5951_s19 + $0x2d0] sm:$0xff]  ;;  %v1765_v47 = vunpack.c.h.s8.bf16 %v4688_v43 }
 0x288   : > { %v1703_v27 = vunpack.c.h.s8.bf16 %v4658_v45  ;;  %v1699_v17 = vunpack.c.l.s8.bf16 %v4658_v45 }
 0x28a   : > { %2016 = vmatpush1.bf16.msra.mxu1 %v1733_v51  ;;  %2057 = vmatpush1.bf16.msra.mxu0 %v1671_v52  ;;  %v1700_v51 = vunpack.c.l.s8.bf16 %v4659_v32  ;;  %v4685_v52 = vld [vmem:[%s5951_s19 + $0x3a8] sm:$0xff]  ;;  %v4674_v32 = vld [vmem:[%s5951_s19 + $0x350] sm:$0xff] }
 0x28b   : > { %2017 = vmatprep.subr.bf16.mxu1 %v1730_v54  ;;  %2058 = vmatprep.subr.bf16.mxu0 %v1668_v56  ;;  %v4655_v54 = vld [vmem:[%s5951_s19 + $0x2b8] sm:$0xff]  ;;  %v1761_v56 = vunpack.c.l.s8.bf16 %v4688_v43  ;;  %v1758_v58 = vunpack.c.h.s8.bf16 %v4685_v52 }
 0x28c   : > { %v1692_v23 = vunpack.c.l.s8.bf16 %v4655_v54 }
 0x28e   : > { %2018 = vmatpush1.bf16.msra.mxu1 %v1729_v62  ;;  %2059 = vmatpush1.bf16.msra.mxu0 %v1667_v63  ;;  %v1696_v62 = vunpack.c.h.s8.bf16 %v4655_v54  ;;  %v4654_v63 = vld [vmem:[%s5951_s19 + $0x2b0] sm:$0xff] }
 0x28f   : > { %2019 = vmatprep.subr.bf16.mxu1 %v1726_v1  ;;  %2060 = vmatprep.subr.bf16.mxu0 %v1664_v3  ;;  %v1757_v1 = vunpack.c.h.s8.bf16 %v4684_v59  ;;  %v1695_v2 = vunpack.c.h.s8.bf16 %v4654_v63  ;;  %v1754_v3 = vunpack.c.l.s8.bf16 %v4685_v52  ;;  %v4670_v54 = vld [vmem:[%s5951_s19 + $0x330] sm:$0xff] }
 0x292   : > { %2020 = vmatpush1.bf16.msra.mxu1 %v1725_v41  ;;  %2061 = vmatpush1.bf16.msra.mxu0 %v1663_v46  ;;  %v4681_v41 = vld [vmem:[%s5951_s19 + $0x388] sm:$0xff]  ;;  %v4651_v46 = vld [vmem:[%s5951_s19 + $0x298] sm:$0xff] }
 0x293   : > { %2021 = vmatprep.subr.bf16.mxu1 %v1722_v4  ;;  %2062 = vmatprep.subr.bf16.mxu0 %v1660_v5  ;;  %v1753_v4 = vunpack.c.l.s8.bf16 %v4684_v59  ;;  %v1691_v5 = vunpack.c.l.s8.bf16 %v4654_v63  ;;  %v1750_v7 = vunpack.c.h.s8.bf16 %v4681_v41  ;;  %v1684_v6 = vunpack.c.l.s8.bf16 %v4651_v46 }
 0x296   : > { %2022 = vmatpush1.bf16.msra.mxu1 %v1721_v8  ;;  %2063 = vmatpush1.bf16.msra.mxu0 %v1659_v9  ;;  %v1688_v8 = vunpack.c.h.s8.bf16 %v4651_v46  ;;  %v4650_v9 = vld [vmem:[%s5951_s19 + $0x290] sm:$0xff] }
 0x297   : > { %2023 = vmatprep.subr.bf16.mxu1 %v1718_v10  ;;  %2064 = vmatprep.subr.bf16.mxu0 %v1656_v13  ;;  %v1749_v10 = vunpack.c.h.s8.bf16 %v4680_v26  ;;  %v1687_v12 = vunpack.c.h.s8.bf16 %v4650_v9  ;;  %v1746_v13 = vunpack.c.l.s8.bf16 %v4681_v41  ;;  %v4666_v46 = vld [vmem:[%s5951_s19 + $0x310] sm:$0xff] }
 0x29a   : > { %2024 = vmatpush1.bf16.msra.mxu1 %v1717_v14  ;;  %2065 = vmatpush1.bf16.msra.mxu0 %v1655_v15  ;;  %v4679_v14 = vld [vmem:[%s5951_s19 + $0x378] sm:$0xff]  ;;  %v4709_v15 = vld [vmem:[%s6072_s20 + $0x268] sm:$0xff] }
 0x29b   : > { %2025 = vmatprep.subr.bf16.mxu1 %v1714_v16  ;;  %2066 = vmatprep.subr.bf16.mxu0 %v1652_v18  ;;  %v1745_v16 = vunpack.c.l.s8.bf16 %v4680_v26  ;;  %v1683_v18 = vunpack.c.l.s8.bf16 %v4650_v9  ;;  %v1744_v19 = vunpack.c.h.s8.bf16 %v4679_v14  ;;  %v1867_v31 = vunpack.c.l.s8.bf16 %v4709_v15 }
 0x29e   : > { %2026 = vmatpush1.bf16.msra.mxu1 %v1713_v11  ;;  %2067 = vmatpush1.bf16.msra.mxu0 %v1651_v33  ;;  %v1871_v11 = vunpack.c.h.s8.bf16 %v4709_v15  ;;  %v4708_v33 = vld [vmem:[%s6072_s20 + $0x260] sm:$0xff]  ;;  %v4694_v15 = vld [vmem:[%s5951_s19 + $0x3f0] sm:$0xff] }
 0x29f   : > { %2027 = vmatprep.subr.bf16.mxu1 %v1774_v21  ;;  %2068 = vmatprep.subr.bf16.mxu0 %v1712_v22  ;;  %v1743_v21 = vunpack.c.h.s8.bf16 %v4678_v20  ;;  %v1870_v34 = vunpack.c.h.s8.bf16 %v4708_v33  ;;  %v1740_v22 = vunpack.c.l.s8.bf16 %v4679_v14 }
 0x2a2   : > { %2028 = vmatpush2.bf16.msra.mxu1 %v1773_v24  ;;  %2069 = vmatpush2.bf16.msra.mxu0 %v1711_v25  ;;  %v4675_v24 = vld [vmem:[%s5951_s19 + $0x358] sm:$0xff]  ;;  %v4705_v25 = vld [vmem:[%s6072_s20 + $0x248] sm:$0xff] }
 0x2a3   : > { %2029 = vmatprep.subr.bf16.mxu1 %v1770_v30  ;;  %2070 = vmatprep.subr.bf16.mxu0 %v1708_v37  ;;  %v1739_v30 = vunpack.c.l.s8.bf16 %v4678_v20  ;;  %v1866_v37 = vunpack.c.l.s8.bf16 %v4708_v33  ;;  %v1736_v38 = vunpack.c.h.s8.bf16 %v4675_v24  ;;  %v1859_v45 = vunpack.c.l.s8.bf16 %v4705_v25 }
 0x2a6   : > { %2030 = vmatpush2.bf16.msra.mxu1 %v1769_v40  ;;  %2071 = vmatpush2.bf16.msra.mxu0 %v1707_v42  ;;  %v1863_v40 = vunpack.c.h.s8.bf16 %v4705_v25  ;;  %v4704_v42 = vld [vmem:[%s6072_s20 + $0x240] sm:$0xff]  ;;  %v4690_v25 = vld [vmem:[%s5951_s19 + $0x3d0] sm:$0xff] }
 0x2a7   : > { %2031 = vmatprep.subr.bf16.mxu1 %v1766_v35  ;;  %2072 = vmatprep.subr.bf16.mxu0 %v1704_v44  ;;  %v1735_v35 = vunpack.c.h.s8.bf16 %v4674_v32  ;;  %v1862_v43 = vunpack.c.h.s8.bf16 %v4704_v42  ;;  %v1732_v44 = vunpack.c.l.s8.bf16 %v4675_v24 }
 0x2aa   : > { %2032 = vmatpush2.bf16.msra.mxu1 %v1765_v47  ;;  %2073 = vmatpush2.bf16.msra.mxu0 %v1703_v27  ;;  %v4671_v47 = vld [vmem:[%s5951_s19 + $0x338] sm:$0xff]  ;;  %v4701_v27 = vld [vmem:[%s6072_s20 + $0x228] sm:$0xff] }
 0x2ab   : > { %2033 = vmatprep.subr.bf16.mxu1 %v1762_v48  ;;  %2074 = vmatprep.subr.bf16.mxu0 %v1700_v51  ;;  %v1731_v48 = vunpack.c.l.s8.bf16 %v4674_v32  ;;  %v1858_v51 = vunpack.c.l.s8.bf16 %v4704_v42  ;;  %v1728_v52 = vunpack.c.h.s8.bf16 %v4671_v47  ;;  %v1851_v63 = vunpack.c.l.s8.bf16 %v4701_v27 }
 0x2ae   : > { %2034 = vmatpush2.bf16.msra.mxu1 %v1761_v56  ;;  %2075 = vmatpush2.bf16.msra.mxu0 %v1699_v17  ;;  %v1855_v56 = vunpack.c.h.s8.bf16 %v4701_v27  ;;  %v4700_v17 = vld [vmem:[%s6072_s20 + $0x220] sm:$0xff]  ;;  %v4686_v27 = vld [vmem:[%s5951_s19 + $0x3b0] sm:$0xff] }
 0x2af   : > { %2035 = vmatprep.subr.bf16.mxu1 %v1758_v58  ;;  %2076 = vmatprep.subr.bf16.mxu0 %v1696_v62  ;;  %v1727_v58 = vunpack.c.h.s8.bf16 %v4670_v54  ;;  %v1854_v59 = vunpack.c.h.s8.bf16 %v4700_v17  ;;  %v1724_v62 = vunpack.c.l.s8.bf16 %v4671_v47 }
 0x2b2   : > { %2036 = vmatpush2.bf16.msra.mxu1 %v1757_v1  ;;  %2077 = vmatpush2.bf16.msra.mxu0 %v1695_v2  ;;  %v4667_v1 = vld [vmem:[%s5951_s19 + $0x318] sm:$0xff]  ;;  %v4697_v2 = vld [vmem:[%s6072_s20 + $0x208] sm:$0xff] }
 0x2b3   : > { %2037 = vmatprep.subr.bf16.mxu1 %v1754_v3  ;;  %2078 = vmatprep.subr.bf16.mxu0 %v1692_v23  ;;  %v1723_v3 = vunpack.c.l.s8.bf16 %v4670_v54  ;;  %v1850_v23 = vunpack.c.l.s8.bf16 %v4700_v17  ;;  %v1720_v41 = vunpack.c.h.s8.bf16 %v4667_v1  ;;  %v1843_v9 = vunpack.c.l.s8.bf16 %v4697_v2 }
 0x2b6   : > { %2038 = vmatpush2.bf16.msra.mxu1 %v1753_v4  ;;  %2079 = vmatpush2.bf16.msra.mxu0 %v1691_v5  ;;  %v1847_v4 = vunpack.c.h.s8.bf16 %v4697_v2  ;;  %v4696_v5 = vld [vmem:[%s6072_s20 + $0x200] sm:$0xff]  ;;  %v4682_v2 = vld [vmem:[%s5951_s19 + $0x390] sm:$0xff] }
 0x2b7   : > { %2039 = vmatprep.subr.bf16.mxu1 %v1750_v7  ;;  %2080 = vmatprep.subr.bf16.mxu0 %v1688_v8  ;;  %v1719_v7 = vunpack.c.h.s8.bf16 %v4666_v46  ;;  %v1846_v26 = vunpack.c.h.s8.bf16 %v4696_v5  ;;  %v1716_v8 = vunpack.c.l.s8.bf16 %v4667_v1 }
 0x2ba   : > { %2040 = vmatpush2.bf16.msra.mxu1 %v1749_v10  ;;  %2081 = vmatpush2.bf16.msra.mxu0 %v1687_v12  ;;  %v4695_v10 = vld [vmem:[%s5951_s19 + $0x3f8] sm:$0xff]  ;;  %v4725_v12 = vld [vmem:[%s6072_s20 + $0x2e8] sm:$0xff] }
 0x2bb   : > { %2041 = vmatprep.subr.bf16.mxu1 %v1746_v13  ;;  %2082 = vmatprep.subr.bf16.mxu0 %v1684_v6  ;;  %v1715_v13 = vunpack.c.l.s8.bf16 %v4666_v46  ;;  %v1842_v6 = vunpack.c.l.s8.bf16 %v4696_v5  ;;  %v1776_v14 = vunpack.c.h.s8.bf16 %v4695_v10  ;;  %v1899_v33 = vunpack.c.l.s8.bf16 %v4725_v12 }
 0x2be   : > { %2042 = vmatpush2.bf16.msra.mxu1 %v1745_v16  ;;  %2083 = vmatpush2.bf16.msra.mxu0 %v1683_v18  ;;  %v1903_v16 = vunpack.c.h.s8.bf16 %v4725_v12  ;;  %v4724_v18 = vld [vmem:[%s6072_s20 + $0x2e0] sm:$0xff] }
 0x2bf   : > { %2093 = vmatprep.subr.bf16.mxu1 %v1744_v19  ;;  %2149 = vmatprep.subr.bf16.mxu0 %v1871_v11  ;;  %v1775_v19 = vunpack.c.h.s8.bf16 %v4694_v15  ;;  %v1902_v20 = vunpack.c.h.s8.bf16 %v4724_v18  ;;  %v1772_v11 = vunpack.c.l.s8.bf16 %v4695_v10  ;;  %v4740_v12 = vld [vmem:[%s6072_s20 + $0x360] sm:$0xff] }
 0x2c1   : > { %2044 = vmatmul.mubr.bf16.vlgmr.msra.gmra.mxu1 %v6036_v61  ;;  %2085 = vmatmul.mubr.bf16.vlgmr.msra.gmra.mxu0 %v6032_v60 }
 0x2c2   : > { %2094 = vmatpush1.bf16.msra.mxu1 %v1743_v21  ;;  %2150 = vmatpush1.bf16.msra.mxu0 %v1870_v34  ;;  %v4691_v21 = vld [vmem:[%s5951_s19 + $0x3d8] sm:$0xff]  ;;  %v4721_v34 = vld [vmem:[%s6072_s20 + $0x2c8] sm:$0xff] }
 0x2c3   : > { %2095 = vmatprep.subr.bf16.mxu1 %v1740_v22  ;;  %2151 = vmatprep.subr.bf16.mxu0 %v1867_v31  ;;  %v1771_v22 = vunpack.c.l.s8.bf16 %v4694_v15  ;;  %v1898_v31 = vunpack.c.l.s8.bf16 %v4724_v18  ;;  %v1768_v24 = vunpack.c.h.s8.bf16 %v4691_v21  ;;  %v1891_v42 = vunpack.c.l.s8.bf16 %v4721_v34 }
 0x2c4   : > { %2125 = vmatprep.mubr.bf16.mxu1 %v5992_v55  ;;  %2181 = vmatprep.mubr.bf16.mxu0 %v6090_v49 }
 0x2c6   : > { %2096 = vmatpush1.bf16.msra.mxu1 %v1739_v30  ;;  %2152 = vmatpush1.bf16.msra.mxu0 %v1866_v37  ;;  %v1895_v30 = vunpack.c.h.s8.bf16 %v4721_v34  ;;  %v4720_v37 = vld [vmem:[%s6072_s20 + $0x2c0] sm:$0xff] }
 0x2c7   : > { %2097 = vmatprep.subr.bf16.mxu1 %v1736_v38  ;;  %2153 = vmatprep.subr.bf16.mxu0 %v1863_v40  ;;  %v1767_v38 = vunpack.c.h.s8.bf16 %v4690_v25  ;;  %v1894_v32 = vunpack.c.h.s8.bf16 %v4720_v37  ;;  %v1764_v40 = vunpack.c.l.s8.bf16 %v4691_v21 }
 0x2ca   : > { %2098 = vmatpush1.bf16.msra.mxu1 %v1735_v35  ;;  %2154 = vmatpush1.bf16.msra.mxu0 %v1862_v43  ;;  %v4687_v35 = vld [vmem:[%s5951_s19 + $0x3b8] sm:$0xff]  ;;  %v4717_v43 = vld [vmem:[%s6072_s20 + $0x2a8] sm:$0xff] }
 0x2cb   : > { %2099 = vmatprep.subr.bf16.mxu1 %v1732_v44  ;;  %2155 = vmatprep.subr.bf16.mxu0 %v1859_v45  ;;  %v1763_v44 = vunpack.c.l.s8.bf16 %v4690_v25  ;;  %v1890_v45 = vunpack.c.l.s8.bf16 %v4720_v37  ;;  %v1760_v47 = vunpack.c.h.s8.bf16 %v4687_v35  ;;  %v1883_v17 = vunpack.c.l.s8.bf16 %v4717_v43  ;;  %v4706_v25 = vld [vmem:[%s6072_s20 + $0x250] sm:$0xff] }
 0x2ce   : > { %2100 = vmatpush1.bf16.msra.mxu1 %v1731_v48  ;;  %2156 = vmatpush1.bf16.msra.mxu0 %v1858_v51  ;;  %v1887_v48 = vunpack.c.h.s8.bf16 %v4717_v43  ;;  %v4716_v51 = vld [vmem:[%s6072_s20 + $0x2a0] sm:$0xff]  ;;  %v4763_v43 = vld [vmem:[%s6104_s22 + $0x1] ss:$0 sm:$0xff] }
 0x2cf   : > { %2101 = vmatprep.subr.bf16.mxu1 %v1728_v52  ;;  %2157 = vmatprep.subr.bf16.mxu0 %v1855_v56  ;;  %v1759_v52 = vunpack.c.h.s8.bf16 %v4686_v27  ;;  %v1886_v54 = vunpack.c.h.s8.bf16 %v4716_v51  ;;  %v1756_v56 = vunpack.c.l.s8.bf16 %v4687_v35 }
 0x2d0   : > { %2321 = vperm.xlu1 %5377, %v4763_v43   ;;  %v4749_v43 = vld [vmem:[%s6072_s20 + $0x3a8] sm:$0xff] }
 0x2d2   : > { %2102 = vmatpush1.bf16.msra.mxu1 %v1727_v58  ;;  %2158 = vmatpush1.bf16.msra.mxu0 %v1854_v59  ;;  %v4683_v58 = vld [vmem:[%s5951_s19 + $0x398] sm:$0xff]  ;;  %v4713_v59 = vld [vmem:[%s6072_s20 + $0x288] sm:$0xff] }
 0x2d3   : > { %2103 = vmatprep.subr.bf16.mxu1 %v1724_v62  ;;  %2159 = vmatprep.subr.bf16.mxu0 %v1851_v63  ;;  %v1755_v62 = vunpack.c.l.s8.bf16 %v4686_v27  ;;  %v1882_v63 = vunpack.c.l.s8.bf16 %v4716_v51  ;;  %v1752_v1 = vunpack.c.h.s8.bf16 %v4683_v58  ;;  %v1875_v5 = vunpack.c.l.s8.bf16 %v4713_v59 }
 0x2d6   : > { %2104 = vmatpush1.bf16.msra.mxu1 %v1723_v3  ;;  %2160 = vmatpush1.bf16.msra.mxu0 %v1850_v23  ;;  %v1879_v3 = vunpack.c.h.s8.bf16 %v4713_v59  ;;  %v4712_v23 = vld [vmem:[%s6072_s20 + $0x280] sm:$0xff] }
 0x2d7   : > { %2105 = vmatprep.subr.bf16.mxu1 %v1720_v41  ;;  %2161 = vmatprep.subr.bf16.mxu0 %v1847_v4  ;;  %v1751_v41 = vunpack.c.h.s8.bf16 %v4682_v2  ;;  %v1878_v46 = vunpack.c.h.s8.bf16 %v4712_v23  ;;  %v1748_v4 = vunpack.c.l.s8.bf16 %v4683_v58 }
 0x2da   : > { %2106 = vmatpush1.bf16.msra.mxu1 %v1719_v7  ;;  %2162 = vmatpush1.bf16.msra.mxu0 %v1846_v26  ;;  %v4741_v7 = vld [vmem:[%s6072_s20 + $0x368] sm:$0xff]  ;;  %v4711_v26 = vld [vmem:[%s6072_s20 + $0x278] sm:$0xff] }
 0x2db   : > { %2107 = vmatprep.subr.bf16.mxu1 %v1716_v8  ;;  %2163 = vmatprep.subr.bf16.mxu0 %v1843_v9  ;;  %v1747_v8 = vunpack.c.l.s8.bf16 %v4682_v2  ;;  %v1874_v9 = vunpack.c.l.s8.bf16 %v4712_v23  ;;  %v1935_v10 = vunpack.c.h.s8.bf16 %v4741_v7  ;;  %v1869_v18 = vunpack.c.l.s8.bf16 %v4711_v26  ;;  %v4699_v2 = vld [vmem:[%s6072_s20 + $0x218] sm:$0xff] }
 0x2de   : > { %2108 = vmatpush1.bf16.msra.mxu1 %v1715_v13  ;;  %2164 = vmatpush1.bf16.msra.mxu0 %v1842_v6  ;;  %v1873_v13 = vunpack.c.h.s8.bf16 %v4711_v26  ;;  %v4710_v6 = vld [vmem:[%s6072_s20 + $0x270] sm:$0xff] }
 0x2df   : > { %2109 = vmatprep.subr.bf16.mxu1 %v1776_v14  ;;  %2165 = vmatprep.subr.bf16.mxu0 %v1903_v16  ;;  %v1934_v14 = vunpack.c.h.s8.bf16 %v4740_v12  ;;  %v1872_v15 = vunpack.c.h.s8.bf16 %v4710_v6  ;;  %v1931_v16 = vunpack.c.l.s8.bf16 %v4741_v7  ;;  %v1868_v21 = vunpack.c.l.s8.bf16 %v4710_v6 }
 0x2e2   : > { %2110 = vmatpush2.bf16.msra.mxu1 %v1775_v19  ;;  %2166 = vmatpush2.bf16.msra.mxu0 %v1902_v20  ;;  %v4737_v19 = vld [vmem:[%s6072_s20 + $0x348] sm:$0xff]  ;;  %v4707_v20 = vld [vmem:[%s6072_s20 + $0x258] sm:$0xff] }
 0x2e3   : > { %2111 = vmatprep.subr.bf16.mxu1 %v1772_v11  ;;  %2167 = vmatprep.subr.bf16.mxu0 %v1899_v33  ;;  %v1930_v33 = vunpack.c.l.s8.bf16 %v4740_v12  ;;  %v1861_v35 = vunpack.c.l.s8.bf16 %v4707_v20  ;;  %v4727_v12 = vld [vmem:[%s6072_s20 + $0x2f8] sm:$0xff] }
 0x2e6   : > { %2112 = vmatpush2.bf16.msra.mxu1 %v1771_v22  ;;  %2168 = vmatpush2.bf16.msra.mxu0 %v1898_v31  ;;  %v1927_v22 = vunpack.c.h.s8.bf16 %v4737_v19  ;;  %v4736_v31 = vld [vmem:[%s6072_s20 + $0x340] sm:$0xff] }
 0x2e7   : > { %2113 = vmatprep.subr.bf16.mxu1 %v1768_v24  ;;  %2169 = vmatprep.subr.bf16.mxu0 %v1895_v30  ;;  %v1865_v24 = vunpack.c.h.s8.bf16 %v4707_v20  ;;  %v1922_v27 = vunpack.c.l.s8.bf16 %v4736_v31 }
 0x2ea   : > { %2114 = vmatpush2.bf16.msra.mxu1 %v1767_v38  ;;  %2170 = vmatpush2.bf16.msra.mxu0 %v1894_v32  ;;  %v1926_v38 = vunpack.c.h.s8.bf16 %v4736_v31  ;;  %v1864_v32 = vunpack.c.h.s8.bf16 %v4706_v25 }
 0x2eb   : > { %2115 = vmatprep.subr.bf16.mxu1 %v1764_v40  ;;  %2171 = vmatprep.subr.bf16.mxu0 %v1891_v42  ;;  %v1923_v42 = vunpack.c.l.s8.bf16 %v4737_v19 }
 0x2ee   : > { %2116 = vmatpush2.bf16.msra.mxu1 %v1763_v44  ;;  %2172 = vmatpush2.bf16.msra.mxu0 %v1890_v45  ;;  %v4733_v44 = vld [vmem:[%s6072_s20 + $0x328] sm:$0xff]  ;;  %v4703_v45 = vld [vmem:[%s6072_s20 + $0x238] sm:$0xff] }
 0x2ef   : > { %2117 = vmatprep.subr.bf16.mxu1 %v1760_v47  ;;  %2173 = vmatprep.subr.bf16.mxu0 %v1887_v48  ;;  %v4917_v47 = vld [vmem:[%s6104_s22 + $0x2] ss:$0 sm:$0xff]  ;;  %v1860_v48 = vunpack.c.l.s8.bf16 %v4706_v25  ;;  %v1919_v51 = vunpack.c.h.s8.bf16 %v4733_v44  ;;  %v4752_v25 = vld [vmem:[%s6072_s20 + $0x3c0] sm:$0xff] }
 0x2f0   : > { %3256 = vperm.xlu1 %5377, %v4917_v47  }
 0x2f2   : > { %2118 = vmatpush2.bf16.msra.mxu1 %v1759_v52  ;;  %2174 = vmatpush2.bf16.msra.mxu0 %v1886_v54  ;;  %v4732_v52 = vld [vmem:[%s6072_s20 + $0x320] sm:$0xff]  ;;  %v1857_v54 = vunpack.c.h.s8.bf16 %v4703_v45 }
 0x2f3   : > { %2119 = vmatprep.subr.bf16.mxu1 %v1756_v56  ;;  %2175 = vmatprep.subr.bf16.mxu0 %v1883_v17  ;;  %v4702_v56 = vld [vmem:[%s6072_s20 + $0x230] sm:$0xff]  ;;  %v1918_v58 = vunpack.c.h.s8.bf16 %v4732_v52 }
 0x2f4   : > { %v5071_v17 = vld [vmem:[%s6104_s22 + $0x3] ss:$0 sm:$0xff]  ;;  %v1856_v59 = vunpack.c.h.s8.bf16 %v4702_v56  ;;  %v1852_v23 = vunpack.c.l.s8.bf16 %v4702_v56  ;;  %s7017_s22 = sld [smem:[#allocation24_spill]] }
 0x2f5   : > { %4191 = vperm.xlu1 %5377, %v5071_v17   ;;  %v1947_v17 = vunpack.c.l.s8.bf16 %v4749_v43 }
 0x2f6   : > { %2120 = vmatpush2.bf16.msra.mxu1 %v1755_v62  ;;  %2176 = vmatpush2.bf16.msra.mxu0 %v1882_v63  ;;  %v1915_v62 = vunpack.c.l.s8.bf16 %v4733_v44  ;;  %v1853_v63 = vunpack.c.l.s8.bf16 %v4703_v45  ;;  %v4719_v44 = vld [vmem:[%s6072_s20 + $0x2b8] sm:$0xff]  ;;  %v1954_v45 = vunpack.c.l.s8.bf16 %v4752_v25 }
 0x2f7   : > { %2121 = vmatprep.subr.bf16.mxu1 %v1752_v1  ;;  %2177 = vmatprep.subr.bf16.mxu0 %v1879_v3  ;;  %v4729_v1 = vld [vmem:[%s6072_s20 + $0x308] sm:$0xff]  ;;  %v1914_v3 = vunpack.c.l.s8.bf16 %v4732_v52  ;;  %v4718_v52 = vld [vmem:[%s6072_s20 + $0x2b0] sm:$0xff] }
 0x2f8   : > { %v1888_v56 = vunpack.c.h.s8.bf16 %v4718_v52 }
 0x2fa   : > { %2122 = vmatpush2.bf16.msra.mxu1 %v1751_v41  ;;  %2178 = vmatpush2.bf16.msra.mxu0 %v1878_v46  ;;  %v1911_v41 = vunpack.c.h.s8.bf16 %v4729_v1  ;;  %v4728_v46 = vld [vmem:[%s6072_s20 + $0x300] sm:$0xff]  ;;  %s6910_s11 = scalar_lea.hbm %s7017_s22, %s5107_s15 }
 0x2fb   : > { %2123 = vmatprep.subr.bf16.mxu1 %v1748_v4  ;;  %2179 = vmatprep.subr.bf16.mxu0 %v1875_v5  ;;  %v1849_v4 = vunpack.c.h.s8.bf16 %v4699_v2  ;;  %v4698_v5 = vld [vmem:[%s6072_s20 + $0x210] sm:$0xff]  ;;  %v1910_v7 = vunpack.c.h.s8.bf16 %v4728_v46 }
 0x2fc   : > { %v1848_v26 = vunpack.c.h.s8.bf16 %v4698_v5  ;;  %v1844_v6 = vunpack.c.l.s8.bf16 %v4698_v5 }
 0x2fe   : > { %2124 = vmatpush2.bf16.msra.mxu1 %v1747_v8  ;;  %2180 = vmatpush2.bf16.msra.mxu0 %v1874_v9  ;;  %v1907_v8 = vunpack.c.l.s8.bf16 %v4729_v1  ;;  %v1845_v9 = vunpack.c.l.s8.bf16 %v4699_v2  ;;  %v1884_v1 = vunpack.c.l.s8.bf16 %v4718_v52 }
 0x2ff   : > { %2190 = vmatprep.subr.bf16.mxu1 %v1935_v10  ;;  %2231 = vmatprep.subr.bf16.mxu0 %v1873_v13  ;;  %v4757_v10 = vld [vmem:[%s6072_s20 + $0x3e8] sm:$0xff]  ;;  %v1906_v13 = vunpack.c.l.s8.bf16 %v4728_v46 }
 0x301   : > { %2126 = vmatmul.mubr.bf16.vlgmr.msra.gmra.mxu1 %v6036_v61  ;;  %v5124_v11 = vpop.f32.mrf.mxu0  ;;  %2182 = vmatmul.mubr.bf16.vlgmr.msra.gmra.mxu0 %v6139_v28 }
 0x302   : > { %2191 = vmatpush1.bf16.msra.mxu1 %v1934_v14  ;;  %2232 = vmatpush1.bf16.msra.mxu0 %v1872_v15  ;;  %v1967_v14 = vunpack.c.h.s8.bf16 %v4757_v10  ;;  %v4756_v15 = vld [vmem:[%s6072_s20 + $0x3e0] sm:$0xff] }
 0x303   : > { %v5125_v34 = vpop.f32.mrf.mxu0  ;;  %2192 = vmatprep.subr.bf16.mxu1 %v1931_v16  ;;  %2233 = vmatprep.subr.bf16.mxu0 %v1869_v18  ;;  %v1905_v16 = vunpack.c.h.s8.bf16 %v4727_v12  ;;  %v4726_v18 = vld [vmem:[%s6072_s20 + $0x2f0] sm:$0xff]  ;;  %v1966_v19 = vunpack.c.h.s8.bf16 %v4756_v15 }
 0x304   : > { %v6362_v30 = vadd.f32 %v5125_v34, %v5124_v11  ;;  %2222 = vmatprep.mubr.bf16.mxu1 %v6092_v50  ;;  %2263 = vmatprep.mubr.bf16.mxu0 %v6090_v49  ;;  %v1904_v20 = vunpack.c.h.s8.bf16 %v4726_v18  ;;  %v1963_v11 = vunpack.c.l.s8.bf16 %v4757_v10  ;;  %v4723_v34 = vld [vmem:[%s6072_s20 + $0x2d8] sm:$0xff]  ;;  %v1900_v31 = vunpack.c.l.s8.bf16 %v4726_v18 }
 0x305   : > { %v5127_v37 = vpop.f32.mrf.mxu0 }
 0x306   : > { %2193 = vmatpush1.bf16.msra.mxu1 %v1930_v33  ;;  %2234 = vmatpush1.bf16.msra.mxu0 %v1868_v21  ;;  %v1901_v33 = vunpack.c.l.s8.bf16 %v4727_v12  ;;  %v4753_v21 = vld [vmem:[%s6072_s20 + $0x3c8] sm:$0xff]  ;;  %v1897_v37 = vunpack.c.h.s8.bf16 %v4723_v34 }
 0x307   : > { %v5128_v40 = vpop.f32.mrf.mxu0  ;;  %2194 = vmatprep.subr.bf16.mxu1 %v1927_v22  ;;  %2235 = vmatprep.subr.bf16.mxu0 %v1865_v24  ;;  %v1962_v22 = vunpack.c.l.s8.bf16 %v4756_v15  ;;  %v1959_v24 = vunpack.c.h.s8.bf16 %v4753_v21 }
 0x30a   : > { %2195 = vmatpush1.bf16.msra.mxu1 %v1926_v38  ;;  %2236 = vmatpush1.bf16.msra.mxu0 %v1864_v32  ;;  %v4722_v38 = vld [vmem:[%s6072_s20 + $0x2d0] sm:$0xff]  ;;  %v1958_v32 = vunpack.c.h.s8.bf16 %v4752_v25 }
 0x30b   : > { %2196 = vmatprep.subr.bf16.mxu1 %v1923_v42  ;;  %2237 = vmatprep.subr.bf16.mxu0 %v1861_v35  ;;  %v1896_v40 = vunpack.c.h.s8.bf16 %v4722_v38  ;;  %v1955_v42 = vunpack.c.l.s8.bf16 %v4753_v21  ;;  %v1893_v35 = vunpack.c.l.s8.bf16 %v4723_v34  ;;  %v1892_v47 = vunpack.c.l.s8.bf16 %v4722_v38  ;;  %v4738_v34 = vld [vmem:[%s6072_s20 + $0x350] sm:$0xff] }
 0x30e   : > { %2197 = vmatpush1.bf16.msra.mxu1 %v1922_v27  ;;  %2238 = vmatpush1.bf16.msra.mxu0 %v1860_v48  ;;  %v1951_v27 = vunpack.c.h.s8.bf16 %v4749_v43  ;;  %v4748_v48 = vld [vmem:[%s6072_s20 + $0x3a0] sm:$0xff] }
 0x30f   : > { %2198 = vmatprep.subr.bf16.mxu1 %v1919_v51  ;;  %2239 = vmatprep.subr.bf16.mxu0 %v1857_v54  ;;  %v1889_v51 = vunpack.c.h.s8.bf16 %v4719_v44  ;;  %v1950_v54 = vunpack.c.h.s8.bf16 %v4748_v48 }
 0x312   : > { %2199 = vmatpush1.bf16.msra.mxu1 %v1918_v58  ;;  %2240 = vmatpush1.bf16.msra.mxu0 %v1856_v59  ;;  %v1885_v58 = vunpack.c.l.s8.bf16 %v4719_v44  ;;  %v4745_v59 = vld [vmem:[%s6072_s20 + $0x388] sm:$0xff] }
 0x313   : > { %2200 = vmatprep.subr.bf16.mxu1 %v1915_v62  ;;  %2241 = vmatprep.subr.bf16.mxu0 %v1853_v63  ;;  %v4715_v62 = vld [vmem:[%s6072_s20 + $0x298] sm:$0xff]  ;;  %v1946_v63 = vunpack.c.l.s8.bf16 %v4748_v48  ;;  %v1943_v2 = vunpack.c.h.s8.bf16 %v4745_v59  ;;  %v1939_v5 = vunpack.c.l.s8.bf16 %v4745_v59  ;;  %v4734_v59 = vld [vmem:[%s6072_s20 + $0x330] sm:$0xff] }
 0x314   : > { %v4735_v48 = vld [vmem:[%s6072_s20 + $0x338] sm:$0xff] }
 0x316   : > { %2201 = vmatpush1.bf16.msra.mxu1 %v1914_v3  ;;  %2242 = vmatpush1.bf16.msra.mxu0 %v1852_v23  ;;  %v4744_v3 = vld [vmem:[%s6072_s20 + $0x380] sm:$0xff]  ;;  %v1881_v23 = vunpack.c.h.s8.bf16 %v4715_v62 }
 0x317   : > { %2202 = vmatprep.subr.bf16.mxu1 %v1911_v41  ;;  %2243 = vmatprep.subr.bf16.mxu0 %v1849_v4  ;;  %v4714_v41 = vld [vmem:[%s6072_s20 + $0x290] sm:$0xff]  ;;  %v1942_v46 = vunpack.c.h.s8.bf16 %v4744_v3 }
 0x318   : > { %v1880_v4 = vunpack.c.h.s8.bf16 %v4714_v41  ;;  %v1876_v10 = vunpack.c.l.s8.bf16 %v4714_v41  ;;  %v4731_v41 = vld [vmem:[%s6072_s20 + $0x318] sm:$0xff] }
 0x31a   : > { %2203 = vmatpush1.bf16.msra.mxu1 %v1910_v7  ;;  %2244 = vmatpush1.bf16.msra.mxu0 %v1848_v26  ;;  %v1877_v7 = vunpack.c.l.s8.bf16 %v4715_v62  ;;  %v4743_v26 = vld [vmem:[%s6072_s20 + $0x378] sm:$0xff] }
 0x31b   : > { %2204 = vmatprep.subr.bf16.mxu1 %v1907_v8  ;;  %2245 = vmatprep.subr.bf16.mxu0 %v1845_v9  ;;  %v6394_v8 = vpop.permute.xlu0 %3077  ;;  %v1938_v9 = vunpack.c.l.s8.bf16 %v4744_v3  ;;  %v1937_v12 = vunpack.c.h.s8.bf16 %v4743_v26  ;;  %v1917_v3 = vunpack.c.l.s8.bf16 %v4735_v48 }
 0x31e   : > { %2205 = vmatpush1.bf16.msra.mxu1 %v1906_v13  ;;  %2246 = vmatpush1.bf16.msra.mxu0 %v1844_v6  ;;  %v4742_v13 = vld [vmem:[%s6072_s20 + $0x370] sm:$0xff] }
 0x31f   : > { %2206 = vmatprep.subr.bf16.mxu1 %v1967_v14  ;;  %2247 = vmatprep.subr.bf16.mxu0 %v1905_v16  ;;  %v1936_v6 = vunpack.c.h.s8.bf16 %v4742_v13  ;;  %v1933_v14 = vunpack.c.l.s8.bf16 %v4743_v26  ;;  %v6397_v15 = vpop.permute.xlu0 %4012  ;;  %v4739_v16 = vld [vmem:[%s6072_s20 + $0x358] sm:$0xff] }
 0x320   : > { %v1929_v21 = vunpack.c.h.s8.bf16 %v4739_v16  ;;  %v1925_v43 = vunpack.c.l.s8.bf16 %v4739_v16 }
 0x322   : > { %2207 = vmatpush2.bf16.msra.mxu1 %v1966_v19  ;;  %2248 = vmatpush2.bf16.msra.mxu0 %v1904_v20  ;;  %v4782_v20 = vld [vmem:[%s6151_s10 + $0x1] ss:$0 sm:$0xff] }
 0x323   : > { %2208 = vmatprep.subr.bf16.mxu1 %v1963_v11  ;;  %2249 = vmatprep.subr.bf16.mxu0 %v1901_v33  ;;  %v1932_v11 = vunpack.c.l.s8.bf16 %v4742_v13  ;;  %v1571_v38 = vpop.permute.xlu0 %1570 }
 0x324   : > { %2504 = vperm.xlu1 %5377, %v4782_v20   ;;  %v4755_v20 = vld [vmem:[%s6072_s20 + $0x3d8] sm:$0xff] }
 0x326   : > { %2209 = vmatpush2.bf16.msra.mxu1 %v1962_v22  ;;  %2250 = vmatpush2.bf16.msra.mxu0 %v1900_v31 }
 0x327   : > { %2210 = vmatprep.subr.bf16.mxu1 %v1959_v24  ;;  %2251 = vmatprep.subr.bf16.mxu0 %v1897_v37  ;;  %v5090_v37 = vld [vmem:[%s6151_s10 + $0x3] ss:$0 sm:$0xff]  ;;  %s5632_s10 = smov [#allocation11]  }
 0x328   : > { %4374 = vperm.xlu1 %5377, %v5090_v37   ;;  %s5548_s18 = sshll.u32 %s5632_s10, 4  ;;  %s5549_s18 = int_to_ptr.vmem [resolvable:$false] %s5548_s18 }
 0x329   : > { %s5550_s26 = scalar_lea.vmem %s5549_s18, 256 }
 0x32a   : > { %2211 = vmatpush2.bf16.msra.mxu1 %v1958_v32  ;;  %2252 = vmatpush2.bf16.msra.mxu0 %v1896_v40  ;;  %v1928_v40 = vunpack.c.h.s8.bf16 %v4738_v34 }
 0x32b   : > { %2212 = vmatprep.subr.bf16.mxu1 %v1955_v42  ;;  %2253 = vmatprep.subr.bf16.mxu0 %v1893_v35  ;;  %v4631_v42 = vld [vmem:[%s6413_s0] ss:$0 sm:$0xff] }
 0x32e   : > { %2213 = vmatpush2.bf16.msra.mxu1 %v1954_v45  ;;  %2254 = vmatpush2.bf16.msra.mxu0 %v1892_v47  ;;  %v4772_v45 = vld [vmem:[%s6189_s12 + $0xb8] sm:$0xff] }
 0x32f   : > { %2214 = vmatprep.subr.bf16.mxu1 %v1951_v27  ;;  %2255 = vmatprep.subr.bf16.mxu0 %v1889_v51  ;;  %v4768_v47 = vld [vmem:[%s6189_s12 + $0x98] sm:$0xff]  ;;  %v2399_v51 = vunpack.c.h.s8.bf16 %v4772_v45 }
 0x330   : > { %v2391_v52 = vunpack.c.h.s8.bf16 %v4768_v47  ;;  %v2390_v62 = vunpack.c.l.s8.bf16 %v4768_v47 }
 0x332   : > { %2215 = vmatpush2.bf16.msra.mxu1 %v1950_v54  ;;  %2256 = vmatpush2.bf16.msra.mxu0 %v1888_v56  ;;  %v4771_v54 = vld [vmem:[%s6189_s12 + $0xb0] sm:$0xff] }
 0x333   : > { %2216 = vmatprep.subr.bf16.mxu1 %v1947_v17  ;;  %2257 = vmatprep.subr.bf16.mxu0 %v1885_v58  ;;  %v1924_v17 = vunpack.c.l.s8.bf16 %v4738_v34  ;;  %v1921_v58 = vunpack.c.h.s8.bf16 %v4735_v48  ;;  %v4770_v48 = vld [vmem:[%s6189_s12 + $0xa8] sm:$0xff] }
 0x336   : > { %2217 = vmatpush2.bf16.msra.mxu1 %v1946_v63  ;;  %2258 = vmatpush2.bf16.msra.mxu0 %v1884_v1  ;;  %v2397_v63 = vunpack.c.h.s8.bf16 %v4771_v54  ;;  %v4767_v1 = vld [vmem:[%s6189_s12 + $0x90] sm:$0xff] }
 0x337   : > { %2218 = vmatprep.subr.bf16.mxu1 %v1943_v2  ;;  %2259 = vmatprep.subr.bf16.mxu0 %v1881_v23  ;;  %v1920_v2 = vunpack.c.h.s8.bf16 %v4734_v59  ;;  %v2389_v23 = vunpack.c.h.s8.bf16 %v4767_v1  ;;  %v2388_v26 = vunpack.c.l.s8.bf16 %v4767_v1 }
 0x33a   : > { %2219 = vmatpush2.bf16.msra.mxu1 %v1942_v46  ;;  %2260 = vmatpush2.bf16.msra.mxu0 %v1880_v4  ;;  %v2396_v46 = vunpack.c.l.s8.bf16 %v4771_v54  ;;  %v1916_v4 = vunpack.c.l.s8.bf16 %v4734_v59 }
 0x33b   : > { %2220 = vmatprep.subr.bf16.mxu1 %v1939_v5  ;;  %2261 = vmatprep.subr.bf16.mxu0 %v1877_v7  ;;  %v1913_v5 = vunpack.c.h.s8.bf16 %v4731_v41  ;;  %v4730_v7 = vld [vmem:[%s6072_s20 + $0x310] sm:$0xff] }
 0x33c   : > { %v1908_v13 = vunpack.c.l.s8.bf16 %v4730_v7 }
 0x33e   : > { %2221 = vmatpush2.bf16.msra.mxu1 %v1938_v9  ;;  %2262 = vmatpush2.bf16.msra.mxu0 %v1876_v10  ;;  %v1912_v9 = vunpack.c.h.s8.bf16 %v4730_v7  ;;  %v1909_v10 = vunpack.c.l.s8.bf16 %v4731_v41 }
 0x33f   : > { %2272 = vmatprep.subr.bf16.mxu1 %v1937_v12  ;;  %5152 = vmatprep.subr.bf16.mxu0 %v2399_v51  ;;  %v4759_v12 = vld [vmem:[%s6072_s20 + $0x3f8] sm:$0xff]  ;;  %v2395_v51 = vunpack.c.h.s8.bf16 %v4770_v48 }
 0x341   : > { %2223 = vmatmul.mubr.bf16.vlgmr.msra.gmra.mxu1 %v6143_v29  ;;  %v5146_v18 = vpop.f32.mrf.mxu1  ;;  %2264 = vmatmul.mubr.bf16.vlgmr.msra.gmra.mxu0 %v6139_v28  ;;  %v6403_v19 = vpop.f32.mrf.mxu0 }
 0x342   : > { %2273 = vmatpush1.bf16.msra.mxu1 %v1936_v6  ;;  %2304 = vmatprep.mubr.bf16.mxu1 %v6092_v50  ;;  %v1969_v6 = vunpack.c.h.s8.bf16 %v4759_v12 }
 0x343   : > { %v5147_v33 = vpop.f32.mrf.mxu1  ;;  %2274 = vmatprep.subr.bf16.mxu1 %v1933_v14  ;;  %v6408_v22 = vpop.f32.mrf.mxu0  ;;  %5153 = vmatpush3.bf16.msra.mxu0 %v2391_v52  ;;  %v4758_v14 = vld [vmem:[%s6072_s20 + $0x3f0] sm:$0xff]  ;;  %v4766_v52 = vld [vmem:[%s6189_s12 + $0x88] sm:$0xff] }
 0x344   : > { %v5148_v31 = vadd.f32 %v5147_v33, %v5146_v18  ;;  %v1968_v16 = vunpack.c.h.s8.bf16 %v4758_v14  ;;  %v1965_v18 = vunpack.c.l.s8.bf16 %v4759_v12  ;;  %v1961_v33 = vunpack.c.h.s8.bf16 %v4755_v20 }
 0x345   : > { %v5149_v24 = vpop.f32.mrf.mxu1  ;;  %v2008_v25 = vpop.f32.mrf.mxu0  ;;  %v2386_v1 = vunpack.c.l.s8.bf16 %v4766_v52 }
 0x346   : > { %v1558_v32 = vadd.f32 %v5148_v31, %v6362_v30  ;;  %2275 = vmatpush1.bf16.msra.mxu1 %v1932_v11  ;;  %v2398_v30 = vunpack.c.l.s8.bf16 %v4772_v45  ;;  %v1964_v11 = vunpack.c.l.s8.bf16 %v4758_v14  ;;  %v1957_v31 = vunpack.c.l.s8.bf16 %v4755_v20  ;;  %v4751_v24 = vld [vmem:[%s6072_s20 + $0x3b8] sm:$0xff] }
 0x347   : > { %v5150_v35 = vpop.f32.mrf.mxu1  ;;  %2276 = vmatprep.subr.bf16.mxu1 %v1929_v21  ;;  %v2009_v44 = vpop.f32.mrf.mxu0  ;;  %v4754_v21 = vld [vmem:[%s6072_s20 + $0x3d0] sm:$0xff]  ;;  %v1953_v37 = vunpack.c.h.s8.bf16 %v4751_v24 }
 0x348   : > { %v1573_v27 = vmul.f32 %v1571_v38, %v1558_v32  ;;  %5154 = vmatprep.subr.bf16.mxu0 %v2398_v30  ;;  %v1960_v34 = vunpack.c.h.s8.bf16 %v4754_v21  ;;  %v1956_v25 = vunpack.c.l.s8.bf16 %v4754_v21  ;;  %v4750_v38 = vld [vmem:[%s6072_s20 + $0x3b0] sm:$0xff]  ;;  %v2387_v30 = vunpack.c.h.s8.bf16 %v4766_v52 }
 0x349   : > { %5155 = vmatpush3.bf16.msra.mxu0 %v2390_v62  ;;  %v1952_v32 = vunpack.c.h.s8.bf16 %v4750_v38  ;;  %v1948_v35 = vunpack.c.l.s8.bf16 %v4750_v38  ;;  %v4746_v44 = vld [vmem:[%s6072_s20 + $0x390] sm:$0xff]  ;;  %v2394_v62 = vunpack.c.l.s8.bf16 %v4770_v48 }
 0x34a   : > { %v1581_v56 = vadd.f32 %v4631_v42, %v1573_v27  ;;  %2277 = vmatpush1.bf16.msra.mxu1 %v1928_v40  ;;  %5156 = vmatprep.subr.bf16.mxu0 %v2397_v63  ;;  %v1949_v40 = vunpack.c.l.s8.bf16 %v4751_v24  ;;  %v4747_v42 = vld [vmem:[%s6072_s20 + $0x398] sm:$0xff]  ;;  %v1944_v45 = vunpack.c.h.s8.bf16 %v4746_v44  ;;  %v1940_v27 = vunpack.c.l.s8.bf16 %v4746_v44  ;;  %v4773_v48 = vld [vmem:[%s6189_s12 + $0xc0] sm:$0xff] }
 0x34b   : > { %2278 = vmatprep.subr.bf16.mxu1 %v1925_v43  ;;  %v1945_v43 = vunpack.c.h.s8.bf16 %v4747_v42  ;;  %v1941_v47 = vunpack.c.l.s8.bf16 %v4747_v42 }
 0x34c   : > { %1583 = vst.msk [vmem:[%s6421_s30] sm:$0x3] %vm1582_vm0, %v1581_v56 }
 0x34d   : > { %5157 = vmatpush3.bf16.msra.mxu0 %v2389_v23  ;;  %v4769_v23 = vld [vmem:[%s6189_s12 + $0xa0] sm:$0xff] }
 0x34e   : > { %2279 = vmatpush1.bf16.msra.mxu1 %v1924_v17  ;;  %5158 = vmatprep.subr.bf16.mxu0 %v2396_v46  ;;  %v2392_v7 = vunpack.c.l.s8.bf16 %v4769_v23 }
 0x34f   : > { %2280 = vmatprep.subr.bf16.mxu1 %v1921_v58 }
 0x351   : > { %5159 = vmatpush3.bf16.msra.mxu0 %v2388_v26  ;;  %v4780_v26 = vld [vmem:[%s6189_s12 + $0xf8] sm:$0xff] }
 0x352   : > { %2281 = vmatpush1.bf16.msra.mxu1 %v1920_v2  ;;  %5160 = vmatprep.subr.bf16.mxu0 %v2395_v51 }
 0x353   : > { %2282 = vmatprep.subr.bf16.mxu1 %v1917_v3 }
 0x355   : > { %5161 = vmatpush3.bf16.msra.mxu0 %v2387_v30  ;;  %v2401_v30 = vunpack.c.h.s8.bf16 %v4773_v48 }
 0x356   : > { %2283 = vmatpush1.bf16.msra.mxu1 %v1916_v4  ;;  %5162 = vmatprep.subr.bf16.mxu0 %v2394_v62  ;;  %v4765_v4 = vld [vmem:[%s6189_s12 + $0x80] sm:$0xff]  ;;  %v6461_v62 = vld [vmem:[%s5951_s19 + $0x568] sm:$0xff] }
 0x357   : > { %2284 = vmatprep.subr.bf16.mxu1 %v1913_v5  ;;  %v2385_v5 = vunpack.c.h.s8.bf16 %v4765_v4 }
 0x359   : > { %5163 = vmatpush3.bf16.msra.mxu0 %v2386_v1  ;;  %v2677_v1 = vunpack.c.h.s8.bf16 %v6461_v62 }
 0x35a   : > { %2285 = vmatpush1.bf16.msra.mxu1 %v1912_v9  ;;  %v4776_v9 = vld [vmem:[%s6189_s12 + $0xd8] sm:$0xff] }
 0x35b   : > { %2286 = vmatprep.subr.bf16.mxu1 %v1909_v10  ;;  %v2415_v10 = vunpack.c.h.s8.bf16 %v4780_v26  ;;  %v2407_v12 = vunpack.c.h.s8.bf16 %v4776_v9  ;;  %v2406_v14 = vunpack.c.l.s8.bf16 %v4776_v9 }
 0x35e   : > { %2287 = vmatpush1.bf16.msra.mxu1 %v1908_v13  ;;  %v2414_v13 = vunpack.c.l.s8.bf16 %v4780_v26 }
 0x35f   : > { %2288 = vmatprep.subr.bf16.mxu1 %v1969_v6  ;;  %v4779_v6 = vld [vmem:[%s6189_s12 + $0xf0] sm:$0xff] }
 0x362   : > { %2289 = vmatpush2.bf16.msra.mxu1 %v1968_v16  ;;  %v2413_v16 = vunpack.c.h.s8.bf16 %v4779_v6 }
 0x363   : > { %2290 = vmatprep.subr.bf16.mxu1 %v1965_v18  ;;  %v4775_v18 = vld [vmem:[%s6189_s12 + $0xd0] sm:$0xff] }
 0x364   : > { %v2405_v20 = vunpack.c.h.s8.bf16 %v4775_v18  ;;  %v2404_v21 = vunpack.c.l.s8.bf16 %v4775_v18 }
 0x366   : > { %2291 = vmatpush2.bf16.msra.mxu1 %v1964_v11  ;;  %v2412_v11 = vunpack.c.l.s8.bf16 %v4779_v6 }
 0x367   : > { %2292 = vmatprep.subr.bf16.mxu1 %v1961_v33  ;;  %v4778_v33 = vld [vmem:[%s6189_s12 + $0xe8] sm:$0xff] }
 0x36a   : > { %2293 = vmatpush2.bf16.msra.mxu1 %v1960_v34  ;;  %v2411_v34 = vunpack.c.h.s8.bf16 %v4778_v33 }
 0x36b   : > { %2294 = vmatprep.subr.bf16.mxu1 %v1957_v31  ;;  %v4774_v31 = vld [vmem:[%s6189_s12 + $0xc8] sm:$0xff] }
 0x36c   : > { %v2403_v24 = vunpack.c.h.s8.bf16 %v4774_v31 }
 0x36e   : > { %2295 = vmatpush2.bf16.msra.mxu1 %v1956_v25 }
 0x36f   : > { %2296 = vmatprep.subr.bf16.mxu1 %v1953_v37 }
 0x372   : > { %2297 = vmatpush2.bf16.msra.mxu1 %v1952_v32  ;;  %v2410_v32 = vunpack.c.l.s8.bf16 %v4778_v33 }
 0x373   : > { %2298 = vmatprep.subr.bf16.mxu1 %v1949_v40 }
 0x376   : > { %2299 = vmatpush2.bf16.msra.mxu1 %v1948_v35  ;;  %v2402_v35 = vunpack.c.l.s8.bf16 %v4774_v31 }
 0x377   : > { %2300 = vmatprep.subr.bf16.mxu1 %v1945_v43 }
 0x37a   : > { %2301 = vmatpush2.bf16.msra.mxu1 %v1944_v45 }
 0x37b   : > { %2302 = vmatprep.subr.bf16.mxu1 %v1941_v47  ;;  %v4777_v47 = vld [vmem:[%s6189_s12 + $0xe0] sm:$0xff] }
 0x37e   : > { %2303 = vmatpush2.bf16.msra.mxu1 %v1940_v27  ;;  %v2409_v27 = vunpack.c.h.s8.bf16 %v4777_v47 }
 0x37f   : > { %5174 = vmatprep.subr.bf16.mxu1 %v2415_v10 }
 0x381   : > { %v2045_v54 = vpop.f32.mrf.mxu1  ;;  %2305 = vmatmul.mubr.bf16.vlgmr.msra.gmra.mxu1 %v6143_v29  ;;  %v2086_v56 = vpop.f32.mrf.mxu0 }
 0x382   : > { %v6440_v17 = vadd.f32 %v2045_v54, %v6403_v19  ;;  %v2393_v19 = vunpack.c.h.s8.bf16 %v4769_v23  ;;  %5175 = vmatpush3.bf16.msra.mxu1 %v2407_v12  ;;  %v4799_v54 = vld [vmem:[%s5951_s19 + $0x468] sm:$0xff] }
 0x383   : > { %v2047_v58 = vpop.f32.mrf.mxu1  ;;  %v2088_v59 = vpop.f32.mrf.mxu0  ;;  %5176 = vmatprep.subr.bf16.mxu1 %v2414_v13 }
 0x384   : > { %v6443_v63 = vadd.f32 %v2047_v58, %v6408_v22  ;;  %5164 = vmatprep.subr.bf16.mxu0 %v2393_v19  ;;  %v2384_v22 = vunpack.c.l.s8.bf16 %v4765_v4  ;;  %v2408_v58 = vunpack.c.l.s8.bf16 %v4777_v47  ;;  %v4791_v47 = vld [vmem:[%s5951_s19 + $0x428] sm:$0xff] }
 0x385   : > { %v2049_v2 = vpop.f32.mrf.mxu1  ;;  %v2090_v3 = vpop.f32.mrf.mxu0  ;;  %5165 = vmatpush3.bf16.msra.mxu0 %v2385_v5 }
 0x386   : > { %5166 = vmatprep.subr.bf16.mxu0 %v2392_v7  ;;  %5177 = vmatpush3.bf16.msra.mxu1 %v2406_v14  ;;  %v6464_v2 = vpop.permute.xlu1 %2142 }
 0x387   : > { %v2050_v41 = vpop.f32.mrf.mxu1  ;;  %v2091_v46 = vpop.f32.mrf.mxu0  ;;  %5178 = vmatprep.subr.bf16.mxu1 %v2413_v16  ;;  %v2145_v7 = vmul.f32 %v6464_v2, %v6440_v17  ;;  %v2146_v13 = vmul.f32 %v6464_v2, %v6443_v63 }
 0x388   : > { %v6469_v41 = vld [vmem:[%s6230_s29 + $0x4] sm:$0xf] }
 0x389   : > { %5167 = vmatpush3.bf16.msra.mxu0 %v2384_v22  ;;  %v2338_v9 = vrot.slane %v6469_v41, %v6228_v36  ;;  %v2342_v16 = vrot.slane %v6469_v41, %v6236_v39 }
 0x38a   : > { %5179 = vmatpush3.bf16.msra.mxu1 %v2405_v20  ;;  %v6466_v3 = vpop.permute.xlu1 %2321 }
 0x38b   : > { %5180 = vmatprep.subr.bf16.mxu1 %v2412_v11 }
 0x38e   : > { %5181 = vmatpush3.bf16.msra.mxu1 %v2404_v21 }
 0x38f   : > { %5182 = vmatprep.subr.bf16.mxu1 %v2411_v34  ;;  %v4798_v34 = vld [vmem:[%s5951_s19 + $0x460] sm:$0xff] }
 0x392   : > { %5183 = vmatpush3.bf16.msra.mxu1 %v2403_v24 }
 0x393   : > { %5184 = vmatprep.subr.bf16.mxu1 %v2410_v32  ;;  %v4795_v32 = vld [vmem:[%s5951_s19 + $0x448] sm:$0xff] }
 0x396   : > { %5185 = vmatpush3.bf16.msra.mxu1 %v2402_v35  ;;  %v4794_v35 = vld [vmem:[%s5951_s19 + $0x440] sm:$0xff] }
 0x397   : > { %5186 = vmatprep.subr.bf16.mxu1 %v2409_v27  ;;  %v2600_v27 = vunpack.c.l.s8.bf16 %v4794_v35 }
 0x39a   : > { %5187 = vmatpush3.bf16.msra.mxu1 %v2401_v30  ;;  %v2593_v30 = vunpack.c.l.s8.bf16 %v4791_v47 }
 0x39b   : > { %5188 = vmatprep.subr.bf16.mxu1 %v2408_v58 }
 0x3c1   : > { %v2127_v25 = vpop.f32.mrf.mxu1  ;;  %v2183_v37 = vpop.f32.mrf.mxu0 }
 0x3c2   : > { %v6453_v38 = vadd.f32 %v2127_v25, %v2086_v56  ;;  %v2613_v56 = vunpack.c.h.s8.bf16 %v4799_v54  ;;  %v2612_v25 = vunpack.c.h.s8.bf16 %v4798_v34 }
 0x3c3   : > { %v2129_v40 = vpop.f32.mrf.mxu1  ;;  %v2185_v42 = vpop.f32.mrf.mxu0 }
 0x3c4   : > { %v6455_v43 = vadd.f32 %v2129_v40, %v2088_v59  ;;  %2905 = vmatprep.subr.bf16.mxu0 %v2613_v56  ;;  %v2400_v59 = vunpack.c.l.s8.bf16 %v4773_v48  ;;  %v2608_v40 = vunpack.c.l.s8.bf16 %v4798_v34  ;;  %v2597_v48 = vunpack.c.h.s8.bf16 %v4791_v47  ;;  %v4803_v34 = vld [vmem:[%s5951_s19 + $0x488] sm:$0xff] }
 0x3c5   : > { %v2131_v44 = vpop.f32.mrf.mxu1  ;;  %v2187_v45 = vpop.f32.mrf.mxu0 }
 0x3c6   : > { %5189 = vmatpush3.bf16.msra.mxu1 %v2400_v59  ;;  %v2604_v44 = vunpack.c.h.s8.bf16 %v4794_v35  ;;  %v2601_v45 = vunpack.c.l.s8.bf16 %v4795_v32  ;;  %v4786_v59 = vld [vmem:[%s5951_s19 + $0x400] sm:$0xff]  ;;  %v2346_v35 = vrot.slane %v6469_v41, %v6263_v57 }
 0x3c7   : > { %v2132_v51 = vpop.f32.mrf.mxu1  ;;  %v2188_v52 = vpop.f32.mrf.mxu0  ;;  %2946 = vmatprep.subr.bf16.mxu1 %v2677_v1  ;;  %v2588_v1 = vunpack.c.h.s8.bf16 %v4786_v59 }
 0x3c8   : > { %v4790_v51 = vld [vmem:[%s5951_s19 + $0x420] sm:$0xff] }
 0x3c9   : > { %v2596_v52 = vunpack.c.h.s8.bf16 %v4790_v51  ;;  %v2592_v56 = vunpack.c.l.s8.bf16 %v4790_v51 }
 0x401   : > { %v2224_v23 = vpop.f32.mrf.mxu1  ;;  %v6471_v46 = vpop.f32.mrf.mxu0 }
 0x402   : > { %v2225_v19 = vadd.f32 %v2224_v23, %v2183_v37  ;;  %v2609_v37 = vunpack.c.l.s8.bf16 %v4799_v54  ;;  %v4787_v54 = vld [vmem:[%s5951_s19 + $0x408] sm:$0xff] }
 0x403   : > { %v2226_v4 = vpop.f32.mrf.mxu1  ;;  %v6473_v5 = vpop.f32.mrf.mxu0  ;;  %v2589_v58 = vunpack.c.h.s8.bf16 %v4787_v54  ;;  %v2585_v23 = vunpack.c.l.s8.bf16 %v4787_v54 }
 0x404   : > { %v2324_v22 = vmul.f32 %v6466_v3, %v2225_v19  ;;  %v2227_v26 = vadd.f32 %v2226_v4, %v2185_v42  ;;  %v2605_v42 = vunpack.c.h.s8.bf16 %v4795_v32  ;;  %v4815_v19 = vld [vmem:[%s5951_s19 + $0x4e8] sm:$0xff]  ;;  %v2584_v4 = vunpack.c.l.s8.bf16 %v4786_v59  ;;  %v4802_v32 = vld [vmem:[%s5951_s19 + $0x480] sm:$0xff]  ;;  %v4800_v59 = vld [vmem:[%s5951_s19 + $0x470] sm:$0xff] }
 0x405   : > { %v2228_v10 = vpop.f32.mrf.mxu1  ;;  %v2269_v12 = vpop.f32.mrf.mxu0 }
 0x406   : > { %v2328_v6 = vadd.f32 %v2324_v22, %v2145_v7  ;;  %v2325_v14 = vmul.f32 %v6466_v3, %v2227_v26  ;;  %v2645_v7 = vunpack.c.h.s8.bf16 %v4815_v19  ;;  %v4814_v22 = vld [vmem:[%s5951_s19 + $0x4e0] sm:$0xff]  ;;  %v4811_v10 = vld [vmem:[%s5951_s19 + $0x4c8] sm:$0xff] }
 0x407   : > { %v2229_v17 = vpop.f32.mrf.mxu1  ;;  %v2270_v18 = vpop.f32.mrf.mxu0  ;;  %v2644_v26 = vunpack.c.h.s8.bf16 %v4814_v22  ;;  %v2640_v12 = vunpack.c.l.s8.bf16 %v4814_v22 }
 0x408   : > { %v2329_v20 = vadd.f32 %v2325_v14, %v2146_v13  ;;  %v2355_v11 = vadd.f32 %v2338_v9, %v2328_v6  ;;  %v2641_v9 = vunpack.c.l.s8.bf16 %v4815_v19  ;;  %v2637_v13 = vunpack.c.h.s8.bf16 %v4811_v10  ;;  %v4810_v6 = vld [vmem:[%s5951_s19 + $0x4c0] sm:$0xff]  ;;  %v4807_v17 = vld [vmem:[%s5951_s19 + $0x4a8] sm:$0xff] }
 0x409   : > { %v2636_v14 = vunpack.c.h.s8.bf16 %v4810_v6  ;;  %v2632_v18 = vunpack.c.l.s8.bf16 %v4810_v6  ;;  %v2614_v19 = vunpack.c.h.s8.bf16 %v4800_v59  ;;  %v4826_v6 = vld [vmem:[%s5951_s19 + $0x540] sm:$0xff] }
 0x40a   : > { %v2356_v33 = vadd.f32 %v2342_v16, %v2329_v20  ;;  %v2359_v21 = vmax.f32 %v2355_v11, 0.0  ;;  %v2633_v16 = vunpack.c.l.s8.bf16 %v4811_v10  ;;  %v2629_v20 = vunpack.c.h.s8.bf16 %v4807_v17  ;;  %v4806_v11 = vld [vmem:[%s5951_s19 + $0x4a0] sm:$0xff] }
 0x40c   : > { %v2360_v31 = vmax.f32 %v2356_v33, 0.0  ;;  %v2363_v63 = vpack.c.bf16 %v2359_v21, %v2359_v21  ;;  %v2628_v33 = vunpack.c.h.s8.bf16 %v4806_v11  ;;  %v2625_v21 = vunpack.c.l.s8.bf16 %v4807_v17 }
 0x40e   : > { %v2364_v24 = vpack.c.bf16 %v2360_v31, %v2360_v31 }
 0x410   : > { %2448 = vmatprep.mubr.bf16.mxu0 %v2364_v24 }
 0x411   : > { %2449 = vmatmul.mubr.bf16.vlgmr.msra.gmra.mxu0 %v2363_v63 }
 0x412   : > { %2906 = vmatpush1.bf16.msra.mxu0 %v2612_v25  ;;  %2937 = vmatprep.mubr.bf16.mxu0 %v5986_v53  ;;  %v2624_v25 = vunpack.c.l.s8.bf16 %v4806_v11  ;;  %v4823_v11 = vld [vmem:[%s5951_s19 + $0x528] sm:$0xff] }
 0x413   : > { %2907 = vmatprep.subr.bf16.mxu0 %v2609_v37  ;;  %v2621_v37 = vunpack.c.h.s8.bf16 %v4803_v34 }
 0x416   : > { %2908 = vmatpush1.bf16.msra.mxu0 %v2608_v40  ;;  %v2147_v40 = vmul.f32 %v6464_v2, %v6453_v38  ;;  %v2620_v38 = vunpack.c.h.s8.bf16 %v4802_v32 }
 0x417   : > { %2909 = vmatprep.subr.bf16.mxu0 %v2605_v42 }
 0x41a   : > { %2910 = vmatpush1.bf16.msra.mxu0 %v2604_v44 }
 0x41b   : > { %2911 = vmatprep.subr.bf16.mxu0 %v2601_v45 }
 0x41e   : > { %2912 = vmatpush1.bf16.msra.mxu0 %v2600_v27 }
 0x41f   : > { %2913 = vmatprep.subr.bf16.mxu0 %v2597_v48  ;;  %v2350_v48 = vrot.slane %v6469_v41, %v6267_v0 }
 0x422   : > { %2914 = vmatpush1.bf16.msra.mxu0 %v2596_v52  ;;  %v2617_v52 = vunpack.c.l.s8.bf16 %v4803_v34 }
 0x423   : > { %2915 = vmatprep.subr.bf16.mxu0 %v2593_v30 }
 0x426   : > { %2916 = vmatpush1.bf16.msra.mxu0 %v2592_v56 }
 0x427   : > { %2917 = vmatprep.subr.bf16.mxu0 %v2589_v58  ;;  %v4830_v58 = vld [vmem:[%s5951_s19 + $0x560] sm:$0xff] }
 0x428   : > { %v2672_v10 = vunpack.c.l.s8.bf16 %v4830_v58 }
 0x42a   : > { %2918 = vmatpush1.bf16.msra.mxu0 %v2588_v1 }
 0x42b   : > { %2919 = vmatprep.subr.bf16.mxu0 %v2585_v23  ;;  %v2676_v23 = vunpack.c.h.s8.bf16 %v4830_v58 }
 0x42e   : > { %2920 = vmatpush1.bf16.msra.mxu0 %v2584_v4 }
 0x42f   : > { %2921 = vmatprep.subr.bf16.mxu0 %v2645_v7  ;;  %v2673_v7 = vunpack.c.l.s8.bf16 %v6461_v62 }
 0x432   : > { %2922 = vmatpush2.bf16.msra.mxu0 %v2644_v26  ;;  %v4827_v26 = vld [vmem:[%s5951_s19 + $0x548] sm:$0xff] }
 0x433   : > { %2923 = vmatprep.subr.bf16.mxu0 %v2641_v9  ;;  %v4797_v9 = vld [vmem:[%s5951_s19 + $0x458] sm:$0xff] }
 0x434   : > { %v2607_v62 = vunpack.c.h.s8.bf16 %v4797_v9 }
 0x436   : > { %2924 = vmatpush2.bf16.msra.mxu0 %v2640_v12  ;;  %v2610_v12 = vunpack.c.l.s8.bf16 %v4800_v59 }
 0x437   : > { %2925 = vmatprep.subr.bf16.mxu0 %v2637_v13  ;;  %v2669_v13 = vunpack.c.h.s8.bf16 %v4827_v26 }
 0x43a   : > { %2926 = vmatpush2.bf16.msra.mxu0 %v2636_v14  ;;  %v4796_v14 = vld [vmem:[%s5951_s19 + $0x450] sm:$0xff] }
 0x43b   : > { %2927 = vmatprep.subr.bf16.mxu0 %v2633_v16  ;;  %v2668_v16 = vunpack.c.h.s8.bf16 %v4826_v6  ;;  %v2606_v17 = vunpack.c.h.s8.bf16 %v4796_v14  ;;  %v2602_v34 = vunpack.c.l.s8.bf16 %v4796_v14 }
 0x43e   : > { %2928 = vmatpush2.bf16.msra.mxu0 %v2632_v18  ;;  %v2665_v18 = vunpack.c.l.s8.bf16 %v4827_v26 }
 0x43f   : > { %2929 = vmatprep.subr.bf16.mxu0 %v2629_v20  ;;  %v2603_v20 = vunpack.c.l.s8.bf16 %v4797_v9 }
 0x441   : > { %v2306_v31 = vpop.f32.mrf.mxu1 }
 0x442   : > { %v2307_v24 = vadd.f32 %v2306_v31, %v6471_v46  ;;  %2930 = vmatpush2.bf16.msra.mxu0 %v2628_v33  ;;  %v2148_v46 = vmul.f32 %v6464_v2, %v6455_v43  ;;  %v2616_v43 = vunpack.c.l.s8.bf16 %v4802_v32  ;;  %v4793_v33 = vld [vmem:[%s5951_s19 + $0x438] sm:$0xff]  ;;  %v2661_v31 = vunpack.c.h.s8.bf16 %v4823_v11 }
 0x443   : > { %v2308_v63 = vpop.f32.mrf.mxu1  ;;  %2931 = vmatprep.subr.bf16.mxu0 %v2625_v21  ;;  %v2664_v21 = vunpack.c.l.s8.bf16 %v4826_v6  ;;  %v4812_v6 = vld [vmem:[%s5951_s19 + $0x4d0] sm:$0xff] }
 0x444   : > { %v2326_v42 = vmul.f32 %v6466_v3, %v2307_v24  ;;  %v2309_v44 = vadd.f32 %v2308_v63, %v6473_v5  ;;  %v4801_v5 = vld [vmem:[%s5951_s19 + $0x478] sm:$0xff]  ;;  %v4822_v24 = vld [vmem:[%s5951_s19 + $0x520] sm:$0xff]  ;;  %v4792_v63 = vld [vmem:[%s5951_s19 + $0x430] sm:$0xff]  ;;  %v2638_v14 = vunpack.c.h.s8.bf16 %v4812_v6 }
 0x445   : > { %v2310_v45 = vpop.f32.mrf.mxu1  ;;  %v2611_v22 = vunpack.c.l.s8.bf16 %v4801_v5  ;;  %v2598_v32 = vunpack.c.h.s8.bf16 %v4792_v63 }
 0x446   : > { %v2330_v47 = vadd.f32 %v2326_v42, %v2147_v40  ;;  %v2327_v27 = vmul.f32 %v6466_v3, %v2309_v44  ;;  %2932 = vmatpush2.bf16.msra.mxu0 %v2624_v25  ;;  %v2615_v3 = vunpack.c.h.s8.bf16 %v4801_v5  ;;  %v2599_v25 = vunpack.c.h.s8.bf16 %v4793_v33  ;;  %v4789_v44 = vld [vmem:[%s5951_s19 + $0x418] sm:$0xff]  ;;  %v4847_v5 = vld [vmem:[%s5951_s19 + $0x5e8] sm:$0xff] }
 0x447   : > { %v2311_v51 = vpop.f32.mrf.mxu1  ;;  %2933 = vmatprep.subr.bf16.mxu0 %v2621_v37  ;;  %v2660_v37 = vunpack.c.h.s8.bf16 %v4822_v24  ;;  %v2657_v40 = vunpack.c.l.s8.bf16 %v4823_v11  ;;  %v2595_v42 = vunpack.c.l.s8.bf16 %v4793_v33  ;;  %v2594_v45 = vunpack.c.l.s8.bf16 %v4792_v63 }
 0x448   : > { %v2357_v30 = vadd.f32 %v2346_v35, %v2330_v47  ;;  %v2331_v54 = vadd.f32 %v2327_v27, %v2148_v46  ;;  %v4819_v35 = vld [vmem:[%s5951_s19 + $0x508] sm:$0xff]  ;;  %v2656_v46 = vunpack.c.l.s8.bf16 %v4822_v24  ;;  %v4818_v27 = vld [vmem:[%s5951_s19 + $0x500] sm:$0xff]  ;;  %v2709_v58 = vunpack.c.h.s8.bf16 %v4847_v5  ;;  %v4808_v24 = vld [vmem:[%s5951_s19 + $0x4b0] sm:$0xff] }
 0x449   : > { %v2653_v47 = vunpack.c.h.s8.bf16 %v4819_v35  ;;  %v2652_v51 = vunpack.c.h.s8.bf16 %v4818_v27  ;;  %v2634_v33 = vunpack.c.l.s8.bf16 %v4812_v6  ;;  %v2630_v63 = vunpack.c.h.s8.bf16 %v4808_v24 }
 0x44a   : > { %v2358_v56 = vadd.f32 %v2350_v48, %v2331_v54  ;;  %2934 = vmatpush2.bf16.msra.mxu0 %v2620_v38  ;;  %v2361_v2 = vmax.f32 %v2357_v30, 0.0  ;;  %v2591_v48 = vunpack.c.h.s8.bf16 %v4789_v44  ;;  %v4788_v38 = vld [vmem:[%s5951_s19 + $0x410] sm:$0xff]  ;;  %v2649_v30 = vunpack.c.l.s8.bf16 %v4819_v35 }
 0x44b   : > { %2935 = vmatprep.subr.bf16.mxu0 %v2617_v52  ;;  %v2590_v52 = vunpack.c.h.s8.bf16 %v4788_v38  ;;  %v2587_v54 = vunpack.c.l.s8.bf16 %v4789_v44  ;;  %v2626_v44 = vunpack.c.l.s8.bf16 %v4808_v24 }
 0x44c   : > { %v2362_v41 = vmax.f32 %v2358_v56, 0.0  ;;  %v2365_v4 = vpack.c.bf16 %v2361_v2, %v2361_v2  ;;  %v4817_v56 = vld [vmem:[%s5951_s19 + $0x4f8] sm:$0xff]  ;;  %v2586_v2 = vunpack.c.l.s8.bf16 %v4788_v38 }
 0x44d   : > { %v2647_v59 = vunpack.c.h.s8.bf16 %v4817_v56 }
 0x44e   : > { %v2366_v1 = vpack.c.bf16 %v2362_v41, %v2362_v41  ;;  %2936 = vmatpush2.bf16.msra.mxu0 %v2616_v43  ;;  %v2648_v43 = vunpack.c.l.s8.bf16 %v4818_v27  ;;  %v4816_v41 = vld [vmem:[%s5951_s19 + $0x4f0] sm:$0xff] }
 0x44f   : > { %2987 = vmatprep.subr.bf16.mxu0 %v2615_v3  ;;  %v4846_v3 = vld [vmem:[%s5951_s19 + $0x5e0] sm:$0xff]  ;;  %v2642_v9 = vunpack.c.l.s8.bf16 %v4816_v41  ;;  %v4804_v27 = vld [vmem:[%s5951_s19 + $0x490] sm:$0xff] }
 0x450   : > { %2488 = vmatprep.mubr.bf16.mxu1 %v2366_v1  ;;  %v2708_v1 = vunpack.c.h.s8.bf16 %v4846_v3  ;;  %v2704_v26 = vunpack.c.l.s8.bf16 %v4846_v3  ;;  %v2622_v38 = vunpack.c.h.s8.bf16 %v4804_v27  ;;  %v4862_v3 = vld [vmem:[%s6072_s20 + $0x460] sm:$0xff] }
 0x451   : > { %2489 = vmatmul.mubr.bf16.vlgmr.msra.gmra.mxu1 %v2365_v4  ;;  %2938 = vmatmul.mubr.bf16.vlgmr.msra.gmra.mxu0 %v6032_v60  ;;  %v2643_v4 = vunpack.c.l.s8.bf16 %v4817_v56  ;;  %v2618_v56 = vunpack.c.l.s8.bf16 %v4804_v27 }
 0x452   : > { %2947 = vmatpush1.bf16.msra.mxu1 %v2676_v23  ;;  %2988 = vmatpush1.bf16.msra.mxu0 %v2614_v19  ;;  %v2646_v23 = vunpack.c.h.s8.bf16 %v4816_v41  ;;  %v2705_v19 = vunpack.c.l.s8.bf16 %v4847_v5  ;;  %v2805_v41 = vunpack.c.h.s8.bf16 %v4862_v3 }
 0x453   : > { %2948 = vmatprep.subr.bf16.mxu1 %v2673_v7  ;;  %2989 = vmatprep.subr.bf16.mxu0 %v2611_v22  ;;  %v4843_v7 = vld [vmem:[%s5951_s19 + $0x5c8] sm:$0xff]  ;;  %v4813_v22 = vld [vmem:[%s5951_s19 + $0x4d8] sm:$0xff] }
 0x454   : > { %2978 = vmatprep.mubr.bf16.mxu1 %v5992_v55  ;;  %3019 = vmatprep.mubr.bf16.mxu0 %v5986_v53 }
 0x456   : > { %2949 = vmatpush1.bf16.msra.mxu1 %v2672_v10  ;;  %2990 = vmatpush1.bf16.msra.mxu0 %v2610_v12  ;;  %v2701_v10 = vunpack.c.h.s8.bf16 %v4843_v7  ;;  %v4842_v12 = vld [vmem:[%s5951_s19 + $0x5c0] sm:$0xff] }
 0x457   : > { %2950 = vmatprep.subr.bf16.mxu1 %v2669_v13  ;;  %2991 = vmatprep.subr.bf16.mxu0 %v2607_v62  ;;  %v2639_v13 = vunpack.c.h.s8.bf16 %v4813_v22  ;;  %v2700_v62 = vunpack.c.h.s8.bf16 %v4842_v12  ;;  %v2696_v11 = vunpack.c.l.s8.bf16 %v4842_v12  ;;  %v4858_v12 = vld [vmem:[%s6072_s20 + $0x440] sm:$0xff] }
 0x458   : > { %v2797_v6 = vunpack.c.h.s8.bf16 %v4858_v12 }
 0x45a   : > { %2951 = vmatpush1.bf16.msra.mxu1 %v2668_v16  ;;  %2992 = vmatpush1.bf16.msra.mxu0 %v2606_v17  ;;  %v2697_v16 = vunpack.c.l.s8.bf16 %v4843_v7  ;;  %v2635_v17 = vunpack.c.l.s8.bf16 %v4813_v22  ;;  %v2801_v22 = vunpack.c.l.s8.bf16 %v4862_v3 }
 0x45b   : > { %2952 = vmatprep.subr.bf16.mxu1 %v2665_v18  ;;  %2993 = vmatprep.subr.bf16.mxu0 %v2603_v20  ;;  %v4839_v18 = vld [vmem:[%s5951_s19 + $0x5a8] sm:$0xff]  ;;  %v4809_v20 = vld [vmem:[%s5951_s19 + $0x4b8] sm:$0xff] }
 0x45e   : > { %2953 = vmatpush1.bf16.msra.mxu1 %v2664_v21  ;;  %2994 = vmatpush1.bf16.msra.mxu0 %v2602_v34  ;;  %v2693_v21 = vunpack.c.h.s8.bf16 %v4839_v18  ;;  %v4838_v34 = vld [vmem:[%s5951_s19 + $0x5a0] sm:$0xff] }
 0x45f   : > { %2954 = vmatprep.subr.bf16.mxu1 %v2661_v31  ;;  %2995 = vmatprep.subr.bf16.mxu0 %v2599_v25  ;;  %v2631_v31 = vunpack.c.h.s8.bf16 %v4809_v20  ;;  %v2692_v25 = vunpack.c.h.s8.bf16 %v4838_v34  ;;  %v2688_v35 = vunpack.c.l.s8.bf16 %v4838_v34  ;;  %v4854_v34 = vld [vmem:[%s6072_s20 + $0x420] sm:$0xff] }
 0x460   : > { %v2789_v24 = vunpack.c.h.s8.bf16 %v4854_v34 }
 0x462   : > { %2955 = vmatpush1.bf16.msra.mxu1 %v2660_v37  ;;  %2996 = vmatpush1.bf16.msra.mxu0 %v2598_v32  ;;  %v2689_v37 = vunpack.c.l.s8.bf16 %v4839_v18  ;;  %v2627_v32 = vunpack.c.l.s8.bf16 %v4809_v20  ;;  %v2793_v20 = vunpack.c.l.s8.bf16 %v4858_v12 }
 0x463   : > { %2956 = vmatprep.subr.bf16.mxu1 %v2657_v40  ;;  %2997 = vmatprep.subr.bf16.mxu0 %v2595_v42  ;;  %v4835_v40 = vld [vmem:[%s5951_s19 + $0x588] sm:$0xff]  ;;  %v4805_v42 = vld [vmem:[%s5951_s19 + $0x498] sm:$0xff] }
 0x466   : > { %2957 = vmatpush1.bf16.msra.mxu1 %v2656_v46  ;;  %2998 = vmatpush1.bf16.msra.mxu0 %v2594_v45  ;;  %v2685_v46 = vunpack.c.h.s8.bf16 %v4835_v40  ;;  %v4834_v45 = vld [vmem:[%s5951_s19 + $0x580] sm:$0xff] }
 0x467   : > { %2958 = vmatprep.subr.bf16.mxu1 %v2653_v47  ;;  %2999 = vmatprep.subr.bf16.mxu0 %v2591_v48  ;;  %v2623_v47 = vunpack.c.h.s8.bf16 %v4805_v42  ;;  %v2684_v48 = vunpack.c.h.s8.bf16 %v4834_v45  ;;  %v2680_v5 = vunpack.c.l.s8.bf16 %v4834_v45  ;;  %v4850_v45 = vld [vmem:[%s6072_s20 + $0x400] sm:$0xff] }
 0x468   : > { %v2781_v27 = vunpack.c.h.s8.bf16 %v4850_v45 }
 0x46a   : > { %2959 = vmatpush1.bf16.msra.mxu1 %v2652_v51  ;;  %3000 = vmatpush1.bf16.msra.mxu0 %v2590_v52  ;;  %v2681_v51 = vunpack.c.l.s8.bf16 %v4835_v40  ;;  %v2619_v52 = vunpack.c.l.s8.bf16 %v4805_v42  ;;  %v2785_v42 = vunpack.c.l.s8.bf16 %v4854_v34 }
 0x46b   : > { %2960 = vmatprep.subr.bf16.mxu1 %v2649_v30  ;;  %3001 = vmatprep.subr.bf16.mxu0 %v2587_v54  ;;  %v4833_v30 = vld [vmem:[%s5951_s19 + $0x578] sm:$0xff]  ;;  %v4863_v54 = vld [vmem:[%s6072_s20 + $0x468] sm:$0xff] }
 0x46e   : > { %2961 = vmatpush1.bf16.msra.mxu1 %v2648_v43  ;;  %3002 = vmatpush1.bf16.msra.mxu0 %v2586_v2  ;;  %v2679_v43 = vunpack.c.h.s8.bf16 %v4833_v30  ;;  %v4832_v2 = vld [vmem:[%s5951_s19 + $0x570] sm:$0xff] }
 0x46f   : > { %2962 = vmatprep.subr.bf16.mxu1 %v2709_v58  ;;  %3003 = vmatprep.subr.bf16.mxu0 %v2647_v59  ;;  %v2806_v58 = vunpack.c.h.s8.bf16 %v4863_v54  ;;  %v2678_v59 = vunpack.c.h.s8.bf16 %v4832_v2  ;;  %v2674_v7 = vunpack.c.l.s8.bf16 %v4832_v2  ;;  %v4878_v2 = vld [vmem:[%s6072_s20 + $0x4e0] sm:$0xff] }
 0x470   : > { %v2837_v3 = vunpack.c.h.s8.bf16 %v4878_v2 }
 0x472   : > { %2963 = vmatpush2.bf16.msra.mxu1 %v2708_v1  ;;  %3004 = vmatpush2.bf16.msra.mxu0 %v2646_v23  ;;  %v2675_v1 = vunpack.c.l.s8.bf16 %v4833_v30  ;;  %v2802_v23 = vunpack.c.l.s8.bf16 %v4863_v54  ;;  %v2777_v54 = vunpack.c.l.s8.bf16 %v4850_v45 }
 0x473   : > { %2964 = vmatprep.subr.bf16.mxu1 %v2705_v19  ;;  %3005 = vmatprep.subr.bf16.mxu0 %v2643_v4  ;;  %v4829_v19 = vld [vmem:[%s5951_s19 + $0x558] sm:$0xff]  ;;  %v4859_v4 = vld [vmem:[%s6072_s20 + $0x448] sm:$0xff] }
 0x476   : > { %2965 = vmatpush2.bf16.msra.mxu1 %v2704_v26  ;;  %3006 = vmatpush2.bf16.msra.mxu0 %v2642_v9  ;;  %v2671_v26 = vunpack.c.h.s8.bf16 %v4829_v19  ;;  %v4828_v9 = vld [vmem:[%s5951_s19 + $0x550] sm:$0xff] }
 0x477   : > { %2966 = vmatprep.subr.bf16.mxu1 %v2701_v10  ;;  %3007 = vmatprep.subr.bf16.mxu0 %v2639_v13  ;;  %v2798_v10 = vunpack.c.h.s8.bf16 %v4859_v4  ;;  %v2670_v13 = vunpack.c.h.s8.bf16 %v4828_v9  ;;  %v2666_v18 = vunpack.c.l.s8.bf16 %v4828_v9  ;;  %v4874_v9 = vld [vmem:[%s6072_s20 + $0x4c0] sm:$0xff] }
 0x478   : > { %v2829_v12 = vunpack.c.h.s8.bf16 %v4874_v9 }
 0x47a   : > { %2967 = vmatpush2.bf16.msra.mxu1 %v2700_v62  ;;  %3008 = vmatpush2.bf16.msra.mxu0 %v2638_v14  ;;  %v2667_v62 = vunpack.c.l.s8.bf16 %v4829_v19  ;;  %v2794_v14 = vunpack.c.l.s8.bf16 %v4859_v4  ;;  %v2833_v4 = vunpack.c.l.s8.bf16 %v4878_v2 }
 0x47b   : > { %2968 = vmatprep.subr.bf16.mxu1 %v2697_v16  ;;  %3009 = vmatprep.subr.bf16.mxu0 %v2635_v17  ;;  %v4825_v16 = vld [vmem:[%s5951_s19 + $0x538] sm:$0xff]  ;;  %v4855_v17 = vld [vmem:[%s6072_s20 + $0x428] sm:$0xff] }
 0x47e   : > { %2969 = vmatpush2.bf16.msra.mxu1 %v2696_v11  ;;  %3010 = vmatpush2.bf16.msra.mxu0 %v2634_v33  ;;  %v2663_v11 = vunpack.c.h.s8.bf16 %v4825_v16  ;;  %v4824_v33 = vld [vmem:[%s5951_s19 + $0x530] sm:$0xff] }
 0x47f   : > { %2970 = vmatprep.subr.bf16.mxu1 %v2693_v21  ;;  %3011 = vmatprep.subr.bf16.mxu0 %v2631_v31  ;;  %v2790_v21 = vunpack.c.h.s8.bf16 %v4855_v17  ;;  %v2662_v31 = vunpack.c.h.s8.bf16 %v4824_v33  ;;  %v2658_v40 = vunpack.c.l.s8.bf16 %v4824_v33  ;;  %v4870_v33 = vld [vmem:[%s6072_s20 + $0x4a0] sm:$0xff] }
 0x480   : > { %v2821_v34 = vunpack.c.h.s8.bf16 %v4870_v33 }
 0x482   : > { %2971 = vmatpush2.bf16.msra.mxu1 %v2692_v25  ;;  %3012 = vmatpush2.bf16.msra.mxu0 %v2630_v63  ;;  %v2659_v25 = vunpack.c.l.s8.bf16 %v4825_v16  ;;  %v2786_v63 = vunpack.c.l.s8.bf16 %v4855_v17  ;;  %v2825_v17 = vunpack.c.l.s8.bf16 %v4874_v9  ;;  %v4860_v9 = vld [vmem:[%s6072_s20 + $0x450] sm:$0xff] }
 0x483   : > { %2972 = vmatprep.subr.bf16.mxu1 %v2689_v37  ;;  %3013 = vmatprep.subr.bf16.mxu0 %v2627_v32  ;;  %v4821_v37 = vld [vmem:[%s5951_s19 + $0x518] sm:$0xff]  ;;  %v4851_v32 = vld [vmem:[%s6072_s20 + $0x408] sm:$0xff] }
 0x486   : > { %2973 = vmatpush2.bf16.msra.mxu1 %v2688_v35  ;;  %3014 = vmatpush2.bf16.msra.mxu0 %v2626_v44  ;;  %v2655_v35 = vunpack.c.h.s8.bf16 %v4821_v37  ;;  %v4820_v44 = vld [vmem:[%s5951_s19 + $0x510] sm:$0xff] }
 0x487   : > { %2974 = vmatprep.subr.bf16.mxu1 %v2685_v46  ;;  %3015 = vmatprep.subr.bf16.mxu0 %v2623_v47  ;;  %v2782_v46 = vunpack.c.h.s8.bf16 %v4851_v32  ;;  %v2654_v47 = vunpack.c.h.s8.bf16 %v4820_v44  ;;  %v2650_v30 = vunpack.c.l.s8.bf16 %v4820_v44  ;;  %v4866_v44 = vld [vmem:[%s6072_s20 + $0x480] sm:$0xff] }
 0x488   : > { %v2813_v45 = vunpack.c.h.s8.bf16 %v4866_v44 }
 0x48a   : > { %2975 = vmatpush2.bf16.msra.mxu1 %v2684_v48  ;;  %3016 = vmatpush2.bf16.msra.mxu0 %v2622_v38  ;;  %v2651_v48 = vunpack.c.l.s8.bf16 %v4821_v37  ;;  %v2778_v38 = vunpack.c.l.s8.bf16 %v4851_v32  ;;  %v2817_v32 = vunpack.c.l.s8.bf16 %v4870_v33 }
 0x48b   : > { %2976 = vmatprep.subr.bf16.mxu1 %v2681_v51  ;;  %3017 = vmatprep.subr.bf16.mxu0 %v2619_v52  ;;  %v4849_v51 = vld [vmem:[%s5951_s19 + $0x5f8] sm:$0xff]  ;;  %v4879_v52 = vld [vmem:[%s6072_s20 + $0x4e8] sm:$0xff] }
 0x48e   : > { %2977 = vmatpush2.bf16.msra.mxu1 %v2680_v5  ;;  %3018 = vmatpush2.bf16.msra.mxu0 %v2618_v56  ;;  %v2711_v5 = vunpack.c.h.s8.bf16 %v4849_v51  ;;  %v4848_v56 = vld [vmem:[%s5951_s19 + $0x5f0] sm:$0xff] }
 0x48f   : > { %3028 = vmatprep.subr.bf16.mxu1 %v2679_v43  ;;  %3084 = vmatprep.subr.bf16.mxu0 %v2806_v58  ;;  %v2838_v43 = vunpack.c.h.s8.bf16 %v4879_v52  ;;  %v2710_v58 = vunpack.c.h.s8.bf16 %v4848_v56  ;;  %v2706_v19 = vunpack.c.l.s8.bf16 %v4848_v56  ;;  %v4864_v56 = vld [vmem:[%s6072_s20 + $0x470] sm:$0xff] }
 0x490   : > { %v2807_v2 = vunpack.c.h.s8.bf16 %v4864_v56 }
 0x491   : > { %2979 = vmatmul.mubr.bf16.vlgmr.msra.gmra.mxu1 %v6036_v61  ;;  %3020 = vmatmul.mubr.bf16.vlgmr.msra.gmra.mxu0 %v6032_v60 }
 0x492   : > { %3029 = vmatpush1.bf16.msra.mxu1 %v2678_v59  ;;  %3085 = vmatpush1.bf16.msra.mxu0 %v2805_v41  ;;  %v2707_v59 = vunpack.c.l.s8.bf16 %v4849_v51  ;;  %v2834_v41 = vunpack.c.l.s8.bf16 %v4879_v52  ;;  %v2809_v52 = vunpack.c.l.s8.bf16 %v4866_v44 }
 0x493   : > { %3030 = vmatprep.subr.bf16.mxu1 %v2675_v1  ;;  %3086 = vmatprep.subr.bf16.mxu0 %v2802_v23  ;;  %v4845_v1 = vld [vmem:[%s5951_s19 + $0x5d8] sm:$0xff]  ;;  %v4875_v23 = vld [vmem:[%s6072_s20 + $0x4c8] sm:$0xff] }
 0x494   : > { %3060 = vmatprep.mubr.bf16.mxu1 %v5992_v55  ;;  %3116 = vmatprep.mubr.bf16.mxu0 %v6090_v49 }
 0x496   : > { %3031 = vmatpush1.bf16.msra.mxu1 %v2674_v7  ;;  %3087 = vmatpush1.bf16.msra.mxu0 %v2801_v22  ;;  %v2703_v7 = vunpack.c.h.s8.bf16 %v4845_v1  ;;  %v4844_v22 = vld [vmem:[%s5951_s19 + $0x5d0] sm:$0xff] }
 0x497   : > { %3032 = vmatprep.subr.bf16.mxu1 %v2671_v26  ;;  %3088 = vmatprep.subr.bf16.mxu0 %v2798_v10  ;;  %v2830_v26 = vunpack.c.h.s8.bf16 %v4875_v23  ;;  %v2702_v10 = vunpack.c.h.s8.bf16 %v4844_v22  ;;  %v2698_v16 = vunpack.c.l.s8.bf16 %v4844_v22  ;;  %v4890_v22 = vld [vmem:[%s6072_s20 + $0x540] sm:$0xff] }
 0x49a   : > { %3033 = vmatpush1.bf16.msra.mxu1 %v2670_v13  ;;  %3089 = vmatpush1.bf16.msra.mxu0 %v2797_v6  ;;  %v2699_v13 = vunpack.c.l.s8.bf16 %v4845_v1  ;;  %v2826_v6 = vunpack.c.l.s8.bf16 %v4875_v23 }
 0x49b   : > { %3034 = vmatprep.subr.bf16.mxu1 %v2667_v62  ;;  %3090 = vmatprep.subr.bf16.mxu0 %v2794_v14  ;;  %v4841_v62 = vld [vmem:[%s5951_s19 + $0x5b8] sm:$0xff]  ;;  %v4871_v14 = vld [vmem:[%s6072_s20 + $0x4a8] sm:$0xff] }
 0x49e   : > { %3035 = vmatpush1.bf16.msra.mxu1 %v2666_v18  ;;  %3091 = vmatpush1.bf16.msra.mxu0 %v2793_v20  ;;  %v2695_v18 = vunpack.c.h.s8.bf16 %v4841_v62  ;;  %v4840_v20 = vld [vmem:[%s5951_s19 + $0x5b0] sm:$0xff] }
 0x49f   : > { %3036 = vmatprep.subr.bf16.mxu1 %v2663_v11  ;;  %3092 = vmatprep.subr.bf16.mxu0 %v2790_v21  ;;  %v2822_v11 = vunpack.c.h.s8.bf16 %v4871_v14  ;;  %v2694_v21 = vunpack.c.h.s8.bf16 %v4840_v20  ;;  %v2690_v37 = vunpack.c.l.s8.bf16 %v4840_v20  ;;  %v2857_v20 = vunpack.c.l.s8.bf16 %v4890_v22 }
 0x4a2   : > { %3037 = vmatpush1.bf16.msra.mxu1 %v2662_v31  ;;  %3093 = vmatpush1.bf16.msra.mxu0 %v2789_v24  ;;  %v2691_v31 = vunpack.c.l.s8.bf16 %v4841_v62  ;;  %v2818_v24 = vunpack.c.l.s8.bf16 %v4871_v14 }
 0x4a3   : > { %3038 = vmatprep.subr.bf16.mxu1 %v2659_v25  ;;  %3094 = vmatprep.subr.bf16.mxu0 %v2786_v63  ;;  %v4837_v25 = vld [vmem:[%s5951_s19 + $0x598] sm:$0xff]  ;;  %v4867_v63 = vld [vmem:[%s6072_s20 + $0x488] sm:$0xff] }
 0x4a6   : > { %3039 = vmatpush1.bf16.msra.mxu1 %v2658_v40  ;;  %3095 = vmatpush1.bf16.msra.mxu0 %v2785_v42  ;;  %v2687_v40 = vunpack.c.h.s8.bf16 %v4837_v25  ;;  %v4836_v42 = vld [vmem:[%s5951_s19 + $0x590] sm:$0xff] }
 0x4a7   : > { %3040 = vmatprep.subr.bf16.mxu1 %v2655_v35  ;;  %3096 = vmatprep.subr.bf16.mxu0 %v2782_v46  ;;  %v2814_v35 = vunpack.c.h.s8.bf16 %v4867_v63  ;;  %v2686_v46 = vunpack.c.h.s8.bf16 %v4836_v42  ;;  %v2682_v51 = vunpack.c.l.s8.bf16 %v4836_v42 }
 0x4aa   : > { %3041 = vmatpush1.bf16.msra.mxu1 %v2654_v47  ;;  %3097 = vmatpush1.bf16.msra.mxu0 %v2781_v27  ;;  %v2683_v47 = vunpack.c.l.s8.bf16 %v4837_v25  ;;  %v2810_v27 = vunpack.c.l.s8.bf16 %v4867_v63 }
 0x4ab   : > { %3042 = vmatprep.subr.bf16.mxu1 %v2651_v48  ;;  %3098 = vmatprep.subr.bf16.mxu0 %v2778_v38  ;;  %v4895_v48 = vld [vmem:[%s6072_s20 + $0x568] sm:$0xff]  ;;  %v4865_v38 = vld [vmem:[%s6072_s20 + $0x478] sm:$0xff] }
 0x4ae   : > { %3043 = vmatpush1.bf16.msra.mxu1 %v2650_v30  ;;  %3099 = vmatpush1.bf16.msra.mxu0 %v2777_v54  ;;  %v2870_v30 = vunpack.c.h.s8.bf16 %v4895_v48  ;;  %v4894_v54 = vld [vmem:[%s6072_s20 + $0x560] sm:$0xff] }
 0x4af   : > { %3044 = vmatprep.subr.bf16.mxu1 %v2711_v5  ;;  %3100 = vmatprep.subr.bf16.mxu0 %v2838_v43  ;;  %v2808_v5 = vunpack.c.h.s8.bf16 %v4865_v38  ;;  %v2869_v43 = vunpack.c.h.s8.bf16 %v4894_v54  ;;  %v2865_v23 = vunpack.c.l.s8.bf16 %v4894_v54 }
 0x4b2   : > { %3045 = vmatpush2.bf16.msra.mxu1 %v2710_v58  ;;  %3101 = vmatpush2.bf16.msra.mxu0 %v2837_v3  ;;  %v2866_v58 = vunpack.c.l.s8.bf16 %v4895_v48  ;;  %v2804_v3 = vunpack.c.l.s8.bf16 %v4865_v38 }
 0x4b3   : > { %3046 = vmatprep.subr.bf16.mxu1 %v2707_v59  ;;  %3102 = vmatprep.subr.bf16.mxu0 %v2834_v41  ;;  %v4891_v59 = vld [vmem:[%s6072_s20 + $0x548] sm:$0xff]  ;;  %v4861_v41 = vld [vmem:[%s6072_s20 + $0x458] sm:$0xff] }
 0x4b4   : > { %v2858_v14 = vunpack.c.l.s8.bf16 %v4891_v59 }
 0x4b6   : > { %3047 = vmatpush2.bf16.msra.mxu1 %v2706_v19  ;;  %3103 = vmatpush2.bf16.msra.mxu0 %v2833_v4  ;;  %v2803_v19 = vunpack.c.l.s8.bf16 %v4864_v56 }
 0x4b7   : > { %3048 = vmatprep.subr.bf16.mxu1 %v2703_v7  ;;  %3104 = vmatprep.subr.bf16.mxu0 %v2830_v26  ;;  %v2862_v7 = vunpack.c.h.s8.bf16 %v4891_v59  ;;  %v2800_v26 = vunpack.c.h.s8.bf16 %v4861_v41 }
 0x4ba   : > { %3049 = vmatpush2.bf16.msra.mxu1 %v2702_v10  ;;  %3105 = vmatpush2.bf16.msra.mxu0 %v2829_v12 }
 0x4bb   : > { %3050 = vmatprep.subr.bf16.mxu1 %v2699_v13  ;;  %3106 = vmatprep.subr.bf16.mxu0 %v2826_v6  ;;  %v2861_v13 = vunpack.c.h.s8.bf16 %v4890_v22  ;;  %v2799_v6 = vunpack.c.h.s8.bf16 %v4860_v9 }
 0x4be   : > { %3051 = vmatpush2.bf16.msra.mxu1 %v2698_v16  ;;  %3107 = vmatpush2.bf16.msra.mxu0 %v2825_v17  ;;  %v2796_v16 = vunpack.c.l.s8.bf16 %v4861_v41  ;;  %v4887_v17 = vld [vmem:[%s6072_s20 + $0x528] sm:$0xff] }
 0x4bf   : > { %3052 = vmatprep.subr.bf16.mxu1 %v2695_v18  ;;  %3108 = vmatprep.subr.bf16.mxu0 %v2822_v11  ;;  %v4857_v18 = vld [vmem:[%s6072_s20 + $0x438] sm:$0xff]  ;;  %v2795_v11 = vunpack.c.l.s8.bf16 %v4860_v9  ;;  %v2854_v33 = vunpack.c.h.s8.bf16 %v4887_v17  ;;  %v2850_v63 = vunpack.c.l.s8.bf16 %v4887_v17 }
 0x4c0   : > { %v4873_v17 = vld [vmem:[%s6072_s20 + $0x4b8] sm:$0xff] }
 0x4c2   : > { %3053 = vmatpush2.bf16.msra.mxu1 %v2694_v21  ;;  %3109 = vmatpush2.bf16.msra.mxu0 %v2821_v34  ;;  %v4886_v21 = vld [vmem:[%s6072_s20 + $0x520] sm:$0xff]  ;;  %v2792_v34 = vunpack.c.h.s8.bf16 %v4857_v18 }
 0x4c3   : > { %3054 = vmatprep.subr.bf16.mxu1 %v2691_v31  ;;  %3110 = vmatprep.subr.bf16.mxu0 %v2818_v24  ;;  %v4856_v31 = vld [vmem:[%s6072_s20 + $0x430] sm:$0xff]  ;;  %v2853_v24 = vunpack.c.h.s8.bf16 %v4886_v21  ;;  %v2849_v42 = vunpack.c.l.s8.bf16 %v4886_v21  ;;  %v2824_v21 = vunpack.c.h.s8.bf16 %v4873_v17 }
 0x4c4   : > { %v2791_v25 = vunpack.c.h.s8.bf16 %v4856_v31 }
 0x4c6   : > { %3055 = vmatpush2.bf16.msra.mxu1 %v2690_v37  ;;  %3111 = vmatpush2.bf16.msra.mxu0 %v2817_v32  ;;  %v2788_v37 = vunpack.c.l.s8.bf16 %v4857_v18  ;;  %v4883_v32 = vld [vmem:[%s6072_s20 + $0x508] sm:$0xff] }
 0x4c7   : > { %3056 = vmatprep.subr.bf16.mxu1 %v2687_v40  ;;  %3112 = vmatprep.subr.bf16.mxu0 %v2814_v35  ;;  %v4853_v40 = vld [vmem:[%s6072_s20 + $0x418] sm:$0xff]  ;;  %v2787_v35 = vunpack.c.l.s8.bf16 %v4856_v31  ;;  %v2846_v44 = vunpack.c.h.s8.bf16 %v4883_v32  ;;  %v2842_v38 = vunpack.c.l.s8.bf16 %v4883_v32 }
 0x4c8   : > { %v4869_v32 = vld [vmem:[%s6072_s20 + $0x498] sm:$0xff] }
 0x4ca   : > { %3057 = vmatpush2.bf16.msra.mxu1 %v2686_v46  ;;  %3113 = vmatpush2.bf16.msra.mxu0 %v2813_v45  ;;  %v4882_v46 = vld [vmem:[%s6072_s20 + $0x500] sm:$0xff]  ;;  %v2784_v45 = vunpack.c.h.s8.bf16 %v4853_v40 }
 0x4cb   : > { %3058 = vmatprep.subr.bf16.mxu1 %v2683_v47  ;;  %3114 = vmatprep.subr.bf16.mxu0 %v2810_v27  ;;  %v4852_v47 = vld [vmem:[%s6072_s20 + $0x410] sm:$0xff]  ;;  %v2845_v27 = vunpack.c.h.s8.bf16 %v4882_v46  ;;  %v2841_v54 = vunpack.c.l.s8.bf16 %v4882_v46  ;;  %v2816_v46 = vunpack.c.h.s8.bf16 %v4869_v32 }
 0x4cc   : > { %v2783_v48 = vunpack.c.h.s8.bf16 %v4852_v47 }
 0x4ce   : > { %3059 = vmatpush2.bf16.msra.mxu1 %v2682_v51  ;;  %3115 = vmatpush2.bf16.msra.mxu0 %v2809_v52  ;;  %v2780_v51 = vunpack.c.l.s8.bf16 %v4853_v40  ;;  %v4911_v52 = vld [vmem:[%s6072_s20 + $0x5e8] sm:$0xff] }
 0x4cf   : > { %3125 = vmatprep.subr.bf16.mxu1 %v2870_v30  ;;  %3166 = vmatprep.subr.bf16.mxu0 %v2808_v5  ;;  %v4881_v30 = vld [vmem:[%s6072_s20 + $0x4f8] sm:$0xff]  ;;  %v2779_v5 = vunpack.c.l.s8.bf16 %v4852_v47  ;;  %v2902_v56 = vunpack.c.h.s8.bf16 %v4911_v52  ;;  %v2898_v41 = vunpack.c.l.s8.bf16 %v4911_v52  ;;  %v6623_v52 = vpop.permute.xlu1 %3256 }
 0x4d1   : > { %3061 = vmatmul.mubr.bf16.vlgmr.msra.gmra.mxu1 %v6036_v61  ;;  %v5168_v1 = vpop.f32.mrf.mxu0  ;;  %3117 = vmatmul.mubr.bf16.vlgmr.msra.gmra.mxu0 %v6139_v28 }
 0x4d2   : > { %3126 = vmatpush1.bf16.msra.mxu1 %v2869_v43  ;;  %3167 = vmatpush1.bf16.msra.mxu0 %v2807_v2  ;;  %v4910_v43 = vld [vmem:[%s6072_s20 + $0x5e0] sm:$0xff]  ;;  %v2840_v2 = vunpack.c.h.s8.bf16 %v4881_v30 }
 0x4d3   : > { %v5169_v4 = vpop.f32.mrf.mxu0  ;;  %3127 = vmatprep.subr.bf16.mxu1 %v2866_v58  ;;  %3168 = vmatprep.subr.bf16.mxu0 %v2804_v3  ;;  %v4880_v58 = vld [vmem:[%s6072_s20 + $0x4f0] sm:$0xff]  ;;  %v2901_v3 = vunpack.c.h.s8.bf16 %v4910_v43 }
 0x4d4   : > { %v6594_v10 = vadd.f32 %v5169_v4, %v5168_v1  ;;  %3157 = vmatprep.mubr.bf16.mxu1 %v6092_v50  ;;  %3198 = vmatprep.mubr.bf16.mxu0 %v6090_v49  ;;  %v2839_v59 = vunpack.c.h.s8.bf16 %v4880_v58  ;;  %v2836_v1 = vunpack.c.l.s8.bf16 %v4881_v30  ;;  %v2897_v4 = vunpack.c.l.s8.bf16 %v4910_v43 }
 0x4d5   : > { %v5171_v12 = vpop.f32.mrf.mxu0 }
 0x4d6   : > { %3128 = vmatpush1.bf16.msra.mxu1 %v2865_v23  ;;  %3169 = vmatpush1.bf16.msra.mxu0 %v2803_v19  ;;  %v4907_v23 = vld [vmem:[%s6072_s20 + $0x5c8] sm:$0xff]  ;;  %v4877_v19 = vld [vmem:[%s6072_s20 + $0x4d8] sm:$0xff]  ;;  %v4876_v12 = vld [vmem:[%s6072_s20 + $0x4d0] sm:$0xff] }
 0x4d7   : > { %v5172_v62 = vpop.f32.mrf.mxu0  ;;  %3129 = vmatprep.subr.bf16.mxu1 %v2862_v7  ;;  %3170 = vmatprep.subr.bf16.mxu0 %v2800_v26  ;;  %v2835_v7 = vunpack.c.l.s8.bf16 %v4880_v58  ;;  %v2894_v22 = vunpack.c.h.s8.bf16 %v4907_v23  ;;  %v4906_v26 = vld [vmem:[%s6072_s20 + $0x5c0] sm:$0xff]  ;;  %v2832_v9 = vunpack.c.h.s8.bf16 %v4877_v19  ;;  %v6626_v58 = vpop.permute.xlu1 %4191 }
 0x4d8   : > { %v2890_v62 = vunpack.c.l.s8.bf16 %v4907_v23  ;;  %v2889_v18 = vunpack.c.l.s8.bf16 %v4906_v26 }
 0x4da   : > { %3130 = vmatpush1.bf16.msra.mxu1 %v2861_v13  ;;  %3171 = vmatpush1.bf16.msra.mxu0 %v2799_v6  ;;  %v2893_v13 = vunpack.c.h.s8.bf16 %v4906_v26  ;;  %v2831_v6 = vunpack.c.h.s8.bf16 %v4876_v12 }
 0x4db   : > { %3131 = vmatprep.subr.bf16.mxu1 %v2858_v14  ;;  %3172 = vmatprep.subr.bf16.mxu0 %v2796_v16  ;;  %v2828_v14 = vunpack.c.l.s8.bf16 %v4877_v19  ;;  %v4903_v16 = vld [vmem:[%s6072_s20 + $0x5a8] sm:$0xff] }
 0x4de   : > { %3132 = vmatpush1.bf16.msra.mxu1 %v2857_v20  ;;  %3173 = vmatpush1.bf16.msra.mxu0 %v2795_v11  ;;  %v2827_v20 = vunpack.c.l.s8.bf16 %v4876_v12  ;;  %v2886_v11 = vunpack.c.h.s8.bf16 %v4903_v16  ;;  %v2505_v12 = vpop.permute.xlu1 %2504 }
 0x4df   : > { %3133 = vmatprep.subr.bf16.mxu1 %v2854_v33  ;;  %3174 = vmatprep.subr.bf16.mxu0 %v2792_v34  ;;  %v4902_v33 = vld [vmem:[%s6072_s20 + $0x5a0] sm:$0xff]  ;;  %v4872_v34 = vld [vmem:[%s6072_s20 + $0x4b0] sm:$0xff] }
 0x4e0   : > { %v2885_v31 = vunpack.c.h.s8.bf16 %v4902_v33  ;;  %v2881_v40 = vunpack.c.l.s8.bf16 %v4902_v33  ;;  %v4889_v33 = vld [vmem:[%s6072_s20 + $0x538] sm:$0xff] }
 0x4e2   : > { %3134 = vmatpush1.bf16.msra.mxu1 %v2853_v24  ;;  %3175 = vmatpush1.bf16.msra.mxu0 %v2791_v25  ;;  %v2823_v24 = vunpack.c.h.s8.bf16 %v4872_v34  ;;  %v2882_v25 = vunpack.c.l.s8.bf16 %v4903_v16 }
 0x4e3   : > { %3135 = vmatprep.subr.bf16.mxu1 %v2850_v63  ;;  %3176 = vmatprep.subr.bf16.mxu0 %v2788_v37  ;;  %v2820_v63 = vunpack.c.l.s8.bf16 %v4873_v17  ;;  %v4899_v37 = vld [vmem:[%s6072_s20 + $0x588] sm:$0xff] }
 0x4e6   : > { %3136 = vmatpush1.bf16.msra.mxu1 %v2849_v42  ;;  %3177 = vmatpush1.bf16.msra.mxu0 %v2787_v35  ;;  %v2819_v42 = vunpack.c.l.s8.bf16 %v4872_v34  ;;  %v2878_v35 = vunpack.c.h.s8.bf16 %v4899_v37 }
 0x4e7   : > { %3137 = vmatprep.subr.bf16.mxu1 %v2846_v44  ;;  %3178 = vmatprep.subr.bf16.mxu0 %v2784_v45  ;;  %v4898_v44 = vld [vmem:[%s6072_s20 + $0x580] sm:$0xff]  ;;  %v4868_v45 = vld [vmem:[%s6072_s20 + $0x490] sm:$0xff] }
 0x4e8   : > { %v2877_v47 = vunpack.c.h.s8.bf16 %v4898_v44  ;;  %v2873_v30 = vunpack.c.l.s8.bf16 %v4898_v44  ;;  %v2852_v44 = vunpack.c.l.s8.bf16 %v4889_v33 }
 0x4ea   : > { %3138 = vmatpush1.bf16.msra.mxu1 %v2845_v27  ;;  %3179 = vmatpush1.bf16.msra.mxu0 %v2783_v48  ;;  %v2815_v27 = vunpack.c.h.s8.bf16 %v4868_v45  ;;  %v2874_v48 = vunpack.c.l.s8.bf16 %v4899_v37  ;;  %v4888_v37 = vld [vmem:[%s6072_s20 + $0x530] sm:$0xff] }
 0x4eb   : > { %3139 = vmatprep.subr.bf16.mxu1 %v2842_v38  ;;  %3180 = vmatprep.subr.bf16.mxu0 %v2780_v51  ;;  %v2812_v38 = vunpack.c.l.s8.bf16 %v4869_v32  ;;  %v4897_v51 = vld [vmem:[%s6072_s20 + $0x578] sm:$0xff] }
 0x4ee   : > { %3140 = vmatpush1.bf16.msra.mxu1 %v2841_v54  ;;  %3181 = vmatpush1.bf16.msra.mxu0 %v2779_v5  ;;  %v2811_v54 = vunpack.c.l.s8.bf16 %v4868_v45  ;;  %v2872_v5 = vunpack.c.h.s8.bf16 %v4897_v51  ;;  %v4885_v45 = vld [vmem:[%s6072_s20 + $0x518] sm:$0xff] }
 0x4ef   : > { %3141 = vmatprep.subr.bf16.mxu1 %v2902_v56  ;;  %3182 = vmatprep.subr.bf16.mxu0 %v2840_v2  ;;  %v4896_v56 = vld [vmem:[%s6072_s20 + $0x570] sm:$0xff]  ;;  %v2868_v2 = vunpack.c.l.s8.bf16 %v4897_v51 }
 0x4f0   : > { %v2871_v43 = vunpack.c.h.s8.bf16 %v4896_v56 }
 0x4f2   : > { %3142 = vmatpush2.bf16.msra.mxu1 %v2901_v3  ;;  %3183 = vmatpush2.bf16.msra.mxu0 %v2839_v59  ;;  %v4893_v3 = vld [vmem:[%s6072_s20 + $0x558] sm:$0xff] }
 0x4f3   : > { %3143 = vmatprep.subr.bf16.mxu1 %v2898_v41  ;;  %3184 = vmatprep.subr.bf16.mxu0 %v2836_v1  ;;  %v2867_v1 = vunpack.c.l.s8.bf16 %v4896_v56  ;;  %v2864_v19 = vunpack.c.h.s8.bf16 %v4893_v3  ;;  %v2860_v16 = vunpack.c.l.s8.bf16 %v4893_v3 }
 0x4f6   : > { %3144 = vmatpush2.bf16.msra.mxu1 %v2897_v4  ;;  %3185 = vmatpush2.bf16.msra.mxu0 %v2835_v7  ;;  %v4892_v4 = vld [vmem:[%s6072_s20 + $0x550] sm:$0xff] }
 0x4f7   : > { %3145 = vmatprep.subr.bf16.mxu1 %v2894_v22  ;;  %3186 = vmatprep.subr.bf16.mxu0 %v2832_v9 }
 0x4fa   : > { %3146 = vmatpush2.bf16.msra.mxu1 %v2893_v13  ;;  %3187 = vmatpush2.bf16.msra.mxu0 %v2831_v6  ;;  %v2863_v6 = vunpack.c.h.s8.bf16 %v4892_v4 }
 0x4fb   : > { %3147 = vmatprep.subr.bf16.mxu1 %v2890_v62  ;;  %3188 = vmatprep.subr.bf16.mxu0 %v2828_v14  ;;  %v4784_v62 = vld [vmem:[%s6413_s0 + $0x1] ss:$0 sm:$0xff] }
 0x4fe   : > { %3148 = vmatpush2.bf16.msra.mxu1 %v2889_v18  ;;  %3189 = vmatpush2.bf16.msra.mxu0 %v2827_v20  ;;  %v4926_v18 = vld [vmem:[%s6189_s12 + $0x138] sm:$0xff] }
 0x4ff   : > { %3149 = vmatprep.subr.bf16.mxu1 %v2886_v11  ;;  %3190 = vmatprep.subr.bf16.mxu0 %v2824_v21  ;;  %v4922_v20 = vld [vmem:[%s6189_s12 + $0x118] sm:$0xff]  ;;  %v3334_v21 = vunpack.c.h.s8.bf16 %v4926_v18 }
 0x500   : > { %v3326_v34 = vunpack.c.h.s8.bf16 %v4922_v20  ;;  %v3325_v32 = vunpack.c.l.s8.bf16 %v4922_v20  ;;  %v4900_v20 = vld [vmem:[%s6072_s20 + $0x590] sm:$0xff] }
 0x502   : > { %3150 = vmatpush2.bf16.msra.mxu1 %v2885_v31  ;;  %3191 = vmatpush2.bf16.msra.mxu0 %v2823_v24  ;;  %v3333_v31 = vunpack.c.l.s8.bf16 %v4926_v18  ;;  %v4925_v24 = vld [vmem:[%s6189_s12 + $0x130] sm:$0xff] }
 0x503   : > { %3151 = vmatprep.subr.bf16.mxu1 %v2882_v25  ;;  %3192 = vmatprep.subr.bf16.mxu0 %v2820_v63  ;;  %v2856_v63 = vunpack.c.h.s8.bf16 %v4889_v33 }
 0x506   : > { %3152 = vmatpush2.bf16.msra.mxu1 %v2881_v40  ;;  %3193 = vmatpush2.bf16.msra.mxu0 %v2819_v42  ;;  %v3332_v40 = vunpack.c.h.s8.bf16 %v4925_v24  ;;  %v4921_v42 = vld [vmem:[%s6189_s12 + $0x110] sm:$0xff] }
 0x507   : > { %3153 = vmatprep.subr.bf16.mxu1 %v2878_v35  ;;  %3194 = vmatprep.subr.bf16.mxu0 %v2816_v46  ;;  %v2855_v35 = vunpack.c.h.s8.bf16 %v4888_v37  ;;  %v3324_v46 = vunpack.c.h.s8.bf16 %v4921_v42  ;;  %v3323_v51 = vunpack.c.l.s8.bf16 %v4921_v42 }
 0x50a   : > { %3154 = vmatpush2.bf16.msra.mxu1 %v2877_v47  ;;  %3195 = vmatpush2.bf16.msra.mxu0 %v2815_v27  ;;  %v3331_v47 = vunpack.c.l.s8.bf16 %v4925_v24  ;;  %v2851_v27 = vunpack.c.l.s8.bf16 %v4888_v37  ;;  %v4920_v24 = vld [vmem:[%s6189_s12 + $0x108] sm:$0xff] }
 0x50b   : > { %3155 = vmatprep.subr.bf16.mxu1 %v2874_v48  ;;  %3196 = vmatprep.subr.bf16.mxu0 %v2812_v38  ;;  %v2848_v48 = vunpack.c.h.s8.bf16 %v4885_v45  ;;  %v4884_v38 = vld [vmem:[%s6072_s20 + $0x510] sm:$0xff] }
 0x50c   : > { %v2843_v56 = vunpack.c.l.s8.bf16 %v4884_v38 }
 0x50e   : > { %3156 = vmatpush2.bf16.msra.mxu1 %v2873_v30  ;;  %3197 = vmatpush2.bf16.msra.mxu0 %v2811_v54  ;;  %v2847_v30 = vunpack.c.h.s8.bf16 %v4884_v38  ;;  %v2844_v54 = vunpack.c.l.s8.bf16 %v4885_v45  ;;  %v4919_v38 = vld [vmem:[%s6189_s12 + $0x100] sm:$0xff] }
 0x50f   : > { %3207 = vmatprep.subr.bf16.mxu1 %v2872_v5  ;;  %5196 = vmatprep.subr.bf16.mxu0 %v3334_v21  ;;  %v4913_v5 = vld [vmem:[%s6072_s20 + $0x5f8] sm:$0xff]  ;;  %v2875_v21 = vunpack.c.l.s8.bf16 %v4900_v20 }
 0x511   : > { %3158 = vmatmul.mubr.bf16.vlgmr.msra.gmra.mxu1 %v6143_v29  ;;  %v5190_v59 = vpop.f32.mrf.mxu1  ;;  %3199 = vmatmul.mubr.bf16.vlgmr.msra.gmra.mxu0 %v6139_v28  ;;  %v6631_v41 = vpop.f32.mrf.mxu0 }
 0x512   : > { %3208 = vmatpush1.bf16.msra.mxu1 %v2871_v43  ;;  %3239 = vmatprep.mubr.bf16.mxu1 %v6092_v50  ;;  %v2904_v43 = vunpack.c.h.s8.bf16 %v4913_v5 }
 0x513   : > { %v5191_v23 = vpop.f32.mrf.mxu1  ;;  %3209 = vmatprep.subr.bf16.mxu1 %v2868_v2  ;;  %v6635_v7 = vpop.f32.mrf.mxu0  ;;  %5197 = vmatpush3.bf16.msra.mxu0 %v3326_v34  ;;  %v4912_v2 = vld [vmem:[%s6072_s20 + $0x5f0] sm:$0xff]  ;;  %v4924_v34 = vld [vmem:[%s6189_s12 + $0x128] sm:$0xff] }
 0x514   : > { %v5192_v22 = vadd.f32 %v5191_v23, %v5190_v59  ;;  %5198 = vmatprep.subr.bf16.mxu0 %v3333_v31  ;;  %v2903_v3 = vunpack.c.h.s8.bf16 %v4912_v2  ;;  %v2900_v59 = vunpack.c.l.s8.bf16 %v4913_v5  ;;  %v2899_v23 = vunpack.c.l.s8.bf16 %v4912_v2  ;;  %v4930_v5 = vld [vmem:[%s6189_s12 + $0x158] sm:$0xff] }
 0x515   : > { %v5193_v26 = vpop.f32.mrf.mxu1  ;;  %v2943_v9 = vpop.f32.mrf.mxu0  ;;  %v3330_v31 = vunpack.c.h.s8.bf16 %v4924_v34  ;;  %v3329_v42 = vunpack.c.l.s8.bf16 %v4924_v34  ;;  %v4931_v34 = vld [vmem:[%s6189_s12 + $0x160] sm:$0xff] }
 0x516   : > { %v2491_v13 = vadd.f32 %v5192_v22, %v6594_v10  ;;  %3210 = vmatpush1.bf16.msra.mxu1 %v2867_v1  ;;  %v2859_v10 = vunpack.c.l.s8.bf16 %v4892_v4  ;;  %v4909_v1 = vld [vmem:[%s6072_s20 + $0x5d8] sm:$0xff]  ;;  %v4908_v4 = vld [vmem:[%s6072_s20 + $0x5d0] sm:$0xff] }
 0x517   : > { %v5194_v14 = vpop.f32.mrf.mxu1  ;;  %3211 = vmatprep.subr.bf16.mxu1 %v2864_v19  ;;  %v2944_v17 = vpop.f32.mrf.mxu0  ;;  %5199 = vmatpush3.bf16.msra.mxu0 %v3325_v32  ;;  %v2896_v19 = vunpack.c.h.s8.bf16 %v4909_v1  ;;  %v2895_v22 = vunpack.c.h.s8.bf16 %v4908_v4  ;;  %v2892_v26 = vunpack.c.l.s8.bf16 %v4909_v1  ;;  %v4905_v9 = vld [vmem:[%s6072_s20 + $0x5b8] sm:$0xff] }
 0x518   : > { %v2507_v11 = vmul.f32 %v2505_v12, %v2491_v13  ;;  %5200 = vmatprep.subr.bf16.mxu0 %v3332_v40  ;;  %v2891_v12 = vunpack.c.l.s8.bf16 %v4908_v4  ;;  %v2888_v13 = vunpack.c.h.s8.bf16 %v4905_v9  ;;  %v2884_v14 = vunpack.c.l.s8.bf16 %v4905_v9 }
 0x51a   : > { %v2516_v25 = vadd.f32 %v4784_v62, %v2507_v11  ;;  %3212 = vmatpush1.bf16.msra.mxu1 %v2863_v6  ;;  %v4904_v6 = vld [vmem:[%s6072_s20 + $0x5b0] sm:$0xff]  ;;  %v2879_v11 = vunpack.c.h.s8.bf16 %v4900_v20 }
 0x51b   : > { %3213 = vmatprep.subr.bf16.mxu1 %v2860_v16  ;;  %5201 = vmatpush3.bf16.msra.mxu0 %v3324_v46  ;;  %v2887_v62 = vunpack.c.h.s8.bf16 %v4904_v6  ;;  %v4901_v16 = vld [vmem:[%s6072_s20 + $0x598] sm:$0xff]  ;;  %v2883_v17 = vunpack.c.l.s8.bf16 %v4904_v6 }
 0x51c   : > { %4785 = vst.msk [vmem:[%s6421_s30 + $0x2] sm:$0x3] %vm1582_vm0, %v2516_v25  ;;  %5202 = vmatprep.subr.bf16.mxu0 %v3331_v47  ;;  %v2880_v18 = vunpack.c.h.s8.bf16 %v4901_v16  ;;  %v2876_v33 = vunpack.c.l.s8.bf16 %v4901_v16  ;;  %v3322_v25 = vunpack.c.h.s8.bf16 %v4920_v24  ;;  %v4923_v47 = vld [vmem:[%s6189_s12 + $0x120] sm:$0xff] }
 0x51e   : > { %3214 = vmatpush1.bf16.msra.mxu1 %v2859_v10 }
 0x51f   : > { %3215 = vmatprep.subr.bf16.mxu1 %v2856_v63  ;;  %5203 = vmatpush3.bf16.msra.mxu0 %v3323_v51  ;;  %v3320_v51 = vunpack.c.h.s8.bf16 %v4919_v38 }
 0x520   : > { %5204 = vmatprep.subr.bf16.mxu0 %v3330_v31  ;;  %v3344_v31 = vunpack.c.h.s8.bf16 %v4931_v34 }
 0x522   : > { %3216 = vmatpush1.bf16.msra.mxu1 %v2855_v35 }
 0x523   : > { %3217 = vmatprep.subr.bf16.mxu1 %v2852_v44  ;;  %5205 = vmatpush3.bf16.msra.mxu0 %v3322_v25  ;;  %v3321_v44 = vunpack.c.l.s8.bf16 %v4920_v24  ;;  %v4927_v24 = vld [vmem:[%s6189_s12 + $0x140] sm:$0xff] }
 0x524   : > { %5206 = vmatprep.subr.bf16.mxu0 %v3329_v42 }
 0x526   : > { %3218 = vmatpush1.bf16.msra.mxu1 %v2851_v27 }
 0x527   : > { %3219 = vmatprep.subr.bf16.mxu1 %v2848_v48  ;;  %5207 = vmatpush3.bf16.msra.mxu0 %v3321_v44  ;;  %v3343_v44 = vunpack.c.l.s8.bf16 %v4931_v34  ;;  %v4945_v34 = vld [vmem:[%s5951_s19 + $0x628] sm:$0xff] }
 0x52a   : > { %3220 = vmatpush1.bf16.msra.mxu1 %v2847_v30  ;;  %v3327_v30 = vunpack.c.l.s8.bf16 %v4923_v47 }
 0x52b   : > { %3221 = vmatprep.subr.bf16.mxu1 %v2844_v54  ;;  %v4934_v54 = vld [vmem:[%s6189_s12 + $0x178] sm:$0xff] }
 0x52c   : > { %v3349_v2 = vunpack.c.l.s8.bf16 %v4934_v54 }
 0x52e   : > { %3222 = vmatpush1.bf16.msra.mxu1 %v2843_v56  ;;  %v3350_v56 = vunpack.c.h.s8.bf16 %v4934_v54 }
 0x52f   : > { %3223 = vmatprep.subr.bf16.mxu1 %v2904_v43  ;;  %v3342_v43 = vunpack.c.h.s8.bf16 %v4930_v5 }
 0x532   : > { %3224 = vmatpush2.bf16.msra.mxu1 %v2903_v3  ;;  %v4933_v3 = vld [vmem:[%s6189_s12 + $0x170] sm:$0xff] }
 0x533   : > { %3225 = vmatprep.subr.bf16.mxu1 %v2900_v59  ;;  %v3341_v59 = vunpack.c.l.s8.bf16 %v4930_v5  ;;  %v3348_v1 = vunpack.c.h.s8.bf16 %v4933_v3  ;;  %v3347_v4 = vunpack.c.l.s8.bf16 %v4933_v3 }
 0x536   : > { %3226 = vmatpush2.bf16.msra.mxu1 %v2899_v23  ;;  %v4929_v23 = vld [vmem:[%s6189_s12 + $0x150] sm:$0xff] }
 0x537   : > { %3227 = vmatprep.subr.bf16.mxu1 %v2896_v19  ;;  %v3340_v19 = vunpack.c.h.s8.bf16 %v4929_v23 }
 0x53a   : > { %3228 = vmatpush2.bf16.msra.mxu1 %v2895_v22  ;;  %v4932_v22 = vld [vmem:[%s6189_s12 + $0x168] sm:$0xff] }
 0x53b   : > { %3229 = vmatprep.subr.bf16.mxu1 %v2892_v26  ;;  %v3339_v26 = vunpack.c.l.s8.bf16 %v4929_v23  ;;  %v3346_v9 = vunpack.c.h.s8.bf16 %v4932_v22  ;;  %v3345_v16 = vunpack.c.l.s8.bf16 %v4932_v22 }
 0x53e   : > { %3230 = vmatpush2.bf16.msra.mxu1 %v2891_v12  ;;  %v4928_v12 = vld [vmem:[%s6189_s12 + $0x148] sm:$0xff] }
 0x53f   : > { %3231 = vmatprep.subr.bf16.mxu1 %v2888_v13  ;;  %v3338_v13 = vunpack.c.h.s8.bf16 %v4928_v12  ;;  %v3337_v20 = vunpack.c.l.s8.bf16 %v4928_v12 }
 0x542   : > { %3232 = vmatpush2.bf16.msra.mxu1 %v2887_v62 }
 0x543   : > { %3233 = vmatprep.subr.bf16.mxu1 %v2884_v14 }
 0x546   : > { %3234 = vmatpush2.bf16.msra.mxu1 %v2883_v17 }
 0x547   : > { %3235 = vmatprep.subr.bf16.mxu1 %v2880_v18 }
 0x54a   : > { %3236 = vmatpush2.bf16.msra.mxu1 %v2879_v11 }
 0x54b   : > { %3237 = vmatprep.subr.bf16.mxu1 %v2876_v33 }
 0x54e   : > { %3238 = vmatpush2.bf16.msra.mxu1 %v2875_v21 }
 0x54f   : > { %5218 = vmatprep.subr.bf16.mxu1 %v3350_v56 }
 0x551   : > { %v2980_v10 = vpop.f32.mrf.mxu1  ;;  %3240 = vmatmul.mubr.bf16.vlgmr.msra.gmra.mxu1 %v6143_v29  ;;  %v3021_v63 = vpop.f32.mrf.mxu0 }
 0x552   : > { %v6661_v37 = vadd.f32 %v2980_v10, %v6631_v41  ;;  %v3328_v41 = vunpack.c.h.s8.bf16 %v4923_v47  ;;  %5219 = vmatpush3.bf16.msra.mxu1 %v3342_v43 }
 0x553   : > { %v2982_v32 = vpop.f32.mrf.mxu1  ;;  %v3023_v40 = vpop.f32.mrf.mxu0  ;;  %5220 = vmatprep.subr.bf16.mxu1 %v3349_v2 }
 0x554   : > { %v6664_v35 = vadd.f32 %v2982_v32, %v6635_v7  ;;  %5208 = vmatprep.subr.bf16.mxu0 %v3328_v41  ;;  %v3319_v7 = vunpack.c.l.s8.bf16 %v4919_v38  ;;  %v4953_v32 = vld [vmem:[%s5951_s19 + $0x668] sm:$0xff] }
 0x555   : > { %v2984_v46 = vpop.f32.mrf.mxu1  ;;  %v3025_v45 = vpop.f32.mrf.mxu0  ;;  %5209 = vmatpush3.bf16.msra.mxu0 %v3320_v51  ;;  %v3548_v42 = vunpack.c.h.s8.bf16 %v4953_v32 }
 0x556   : > { %5210 = vmatprep.subr.bf16.mxu0 %v3327_v30  ;;  %5221 = vmatpush3.bf16.msra.mxu1 %v3341_v59  ;;  %v6682_v46 = vld [vmem:[%s5951_s19 + $0x768] sm:$0xff]  ;;  %v3080_v30 = vmul.f32 %v6394_v8, %v6661_v37  ;;  %v3081_v2 = vmul.f32 %v6394_v8, %v6664_v35 }
 0x557   : > { %v2985_v27 = vpop.f32.mrf.mxu1  ;;  %v3026_v48 = vpop.f32.mrf.mxu0  ;;  %5222 = vmatprep.subr.bf16.mxu1 %v3348_v1  ;;  %v3612_v45 = vunpack.c.h.s8.bf16 %v6682_v46 }
 0x558   : > { %v6686_v27 = vld [vmem:[%s6230_s29 + $0x8] sm:$0xf] }
 0x559   : > { %5211 = vmatpush3.bf16.msra.mxu0 %v3319_v7  ;;  %v3273_v54 = vrot.slane %v6686_v27, %v6228_v36  ;;  %v3277_v1 = vrot.slane %v6686_v27, %v6236_v39 }
 0x55a   : > { %5223 = vmatpush3.bf16.msra.mxu1 %v3340_v19  ;;  %3840 = vmatprep.subr.bf16.mxu0 %v3548_v42 }
 0x55b   : > { %5224 = vmatprep.subr.bf16.mxu1 %v3347_v4 }
 0x55e   : > { %5225 = vmatpush3.bf16.msra.mxu1 %v3339_v26 }
 0x55f   : > { %5226 = vmatprep.subr.bf16.mxu1 %v3346_v9  ;;  %v4952_v9 = vld [vmem:[%s5951_s19 + $0x660] sm:$0xff] }
 0x562   : > { %5227 = vmatpush3.bf16.msra.mxu1 %v3338_v13 }
 0x563   : > { %5228 = vmatprep.subr.bf16.mxu1 %v3345_v16  ;;  %v4949_v16 = vld [vmem:[%s5951_s19 + $0x648] sm:$0xff] }
 0x566   : > { %5229 = vmatpush3.bf16.msra.mxu1 %v3337_v20  ;;  %v4948_v20 = vld [vmem:[%s5951_s19 + $0x640] sm:$0xff] }
 0x567   : > { %5230 = vmatprep.subr.bf16.mxu1 %v3344_v31  ;;  %v3535_v31 = vunpack.c.l.s8.bf16 %v4948_v20 }
 0x591   : > { %v3062_v6 = vpop.f32.mrf.mxu1  ;;  %v3118_v62 = vpop.f32.mrf.mxu0 }
 0x592   : > { %v6674_v14 = vadd.f32 %v3062_v6, %v3021_v63  ;;  %v3336_v63 = vunpack.c.h.s8.bf16 %v4927_v24  ;;  %v3547_v6 = vunpack.c.h.s8.bf16 %v4952_v9 }
 0x593   : > { %v3064_v17 = vpop.f32.mrf.mxu1  ;;  %v3120_v18 = vpop.f32.mrf.mxu0 }
 0x594   : > { %v6676_v11 = vadd.f32 %v3064_v17, %v3023_v40  ;;  %5231 = vmatpush3.bf16.msra.mxu1 %v3336_v63  ;;  %v3335_v40 = vunpack.c.l.s8.bf16 %v4927_v24  ;;  %v3543_v17 = vunpack.c.l.s8.bf16 %v4952_v9  ;;  %v3532_v24 = vunpack.c.h.s8.bf16 %v4945_v34  ;;  %v4957_v9 = vld [vmem:[%s5951_s19 + $0x688] sm:$0xff] }
 0x595   : > { %v3066_v33 = vpop.f32.mrf.mxu1  ;;  %v3122_v21 = vpop.f32.mrf.mxu0  ;;  %5232 = vmatprep.subr.bf16.mxu1 %v3343_v44  ;;  %v3528_v63 = vunpack.c.l.s8.bf16 %v4945_v34 }
 0x596   : > { %v3539_v33 = vunpack.c.h.s8.bf16 %v4948_v20  ;;  %v3536_v21 = vunpack.c.l.s8.bf16 %v4949_v16  ;;  %v3281_v20 = vrot.slane %v6686_v27, %v6263_v57 }
 0x597   : > { %v3067_v25 = vpop.f32.mrf.mxu1  ;;  %v3123_v10 = vpop.f32.mrf.mxu0 }
 0x598   : > { %5233 = vmatpush3.bf16.msra.mxu1 %v3335_v40  ;;  %v4944_v25 = vld [vmem:[%s5951_s19 + $0x620] sm:$0xff] }
 0x599   : > { %3881 = vmatprep.subr.bf16.mxu1 %v3612_v45  ;;  %v3531_v10 = vunpack.c.h.s8.bf16 %v4944_v25  ;;  %v3527_v42 = vunpack.c.l.s8.bf16 %v4944_v25  ;;  %v4940_v40 = vld [vmem:[%s5951_s19 + $0x600] sm:$0xff] }
 0x59a   : > { %v3523_v45 = vunpack.c.h.s8.bf16 %v4940_v40 }
 0x5d1   : > { %v3159_v47 = vpop.f32.mrf.mxu1  ;;  %v6688_v48 = vpop.f32.mrf.mxu0 }
 0x5d2   : > { %v3160_v41 = vadd.f32 %v3159_v47, %v3118_v62  ;;  %v3544_v62 = vunpack.c.l.s8.bf16 %v4953_v32  ;;  %v4941_v32 = vld [vmem:[%s5951_s19 + $0x608] sm:$0xff] }
 0x5d3   : > { %v3161_v38 = vpop.f32.mrf.mxu1  ;;  %v6690_v51 = vpop.f32.mrf.mxu0  ;;  %v3524_v44 = vunpack.c.h.s8.bf16 %v4941_v32  ;;  %v3520_v47 = vunpack.c.l.s8.bf16 %v4941_v32 }
 0x5d4   : > { %v3259_v7 = vmul.f32 %v6623_v52, %v3160_v41  ;;  %v3162_v5 = vadd.f32 %v3161_v38, %v3120_v18  ;;  %v3540_v18 = vunpack.c.h.s8.bf16 %v4949_v16  ;;  %v4969_v41 = vld [vmem:[%s5951_s19 + $0x6e8] sm:$0xff]  ;;  %v3519_v38 = vunpack.c.l.s8.bf16 %v4940_v40  ;;  %v4956_v16 = vld [vmem:[%s5951_s19 + $0x680] sm:$0xff]  ;;  %v4954_v40 = vld [vmem:[%s5951_s19 + $0x670] sm:$0xff] }
 0x5d5   : > { %v3163_v56 = vpop.f32.mrf.mxu1  ;;  %v3204_v43 = vpop.f32.mrf.mxu0 }
 0x5d6   : > { %v3263_v3 = vadd.f32 %v3259_v7, %v3080_v30  ;;  %v3260_v59 = vmul.f32 %v6623_v52, %v3162_v5  ;;  %v3580_v30 = vunpack.c.h.s8.bf16 %v4969_v41  ;;  %v4968_v7 = vld [vmem:[%s5951_s19 + $0x6e0] sm:$0xff]  ;;  %v3576_v5 = vunpack.c.l.s8.bf16 %v4969_v41  ;;  %v4965_v56 = vld [vmem:[%s5951_s19 + $0x6c8] sm:$0xff] }
 0x5d7   : > { %v3164_v37 = vpop.f32.mrf.mxu1  ;;  %v3205_v23 = vpop.f32.mrf.mxu0  ;;  %v3575_v43 = vunpack.c.l.s8.bf16 %v4968_v7  ;;  %v3549_v41 = vunpack.c.h.s8.bf16 %v4954_v40 }
 0x5d8   : > { %v3290_v19 = vadd.f32 %v3273_v54, %v3263_v3  ;;  %v3264_v4 = vadd.f32 %v3260_v59, %v3081_v2  ;;  %v3579_v54 = vunpack.c.h.s8.bf16 %v4968_v7  ;;  %v3572_v2 = vunpack.c.h.s8.bf16 %v4965_v56  ;;  %v4964_v3 = vld [vmem:[%s5951_s19 + $0x6c0] sm:$0xff]  ;;  %v4961_v37 = vld [vmem:[%s5951_s19 + $0x6a8] sm:$0xff] }
 0x5d9   : > { %v3571_v59 = vunpack.c.h.s8.bf16 %v4964_v3  ;;  %v3567_v23 = vunpack.c.l.s8.bf16 %v4964_v3  ;;  %v4980_v3 = vld [vmem:[%s5951_s19 + $0x740] sm:$0xff] }
 0x5da   : > { %v3291_v22 = vadd.f32 %v3277_v1, %v3264_v4  ;;  %v3294_v26 = vmax.f32 %v3290_v19, 0.0  ;;  %v3568_v1 = vunpack.c.l.s8.bf16 %v4965_v56  ;;  %v3564_v19 = vunpack.c.h.s8.bf16 %v4961_v37  ;;  %v4960_v4 = vld [vmem:[%s5951_s19 + $0x6a0] sm:$0xff] }
 0x5dc   : > { %v3295_v12 = vmax.f32 %v3291_v22, 0.0  ;;  %v3298_v35 = vpack.c.bf16 %v3294_v26, %v3294_v26  ;;  %v3563_v22 = vunpack.c.h.s8.bf16 %v4960_v4  ;;  %v3560_v26 = vunpack.c.l.s8.bf16 %v4961_v37 }
 0x5de   : > { %v3299_v13 = vpack.c.bf16 %v3295_v12, %v3295_v12 }
 0x5e0   : > { %3383 = vmatprep.mubr.bf16.mxu0 %v3299_v13 }
 0x5e1   : > { %3384 = vmatmul.mubr.bf16.vlgmr.msra.gmra.mxu0 %v3298_v35 }
 0x5e2   : > { %3841 = vmatpush1.bf16.msra.mxu0 %v3547_v6  ;;  %3872 = vmatprep.mubr.bf16.mxu0 %v5986_v53  ;;  %v3559_v6 = vunpack.c.l.s8.bf16 %v4960_v4  ;;  %v4977_v4 = vld [vmem:[%s5951_s19 + $0x728] sm:$0xff] }
 0x5e3   : > { %3842 = vmatprep.subr.bf16.mxu0 %v3544_v62  ;;  %v3556_v62 = vunpack.c.h.s8.bf16 %v4957_v9 }
 0x5e6   : > { %3843 = vmatpush1.bf16.msra.mxu0 %v3543_v17  ;;  %v3082_v17 = vmul.f32 %v6394_v8, %v6674_v14  ;;  %v3555_v14 = vunpack.c.h.s8.bf16 %v4956_v16 }
 0x5e7   : > { %3844 = vmatprep.subr.bf16.mxu0 %v3540_v18 }
 0x5ea   : > { %3845 = vmatpush1.bf16.msra.mxu0 %v3539_v33 }
 0x5eb   : > { %3846 = vmatprep.subr.bf16.mxu0 %v3536_v21 }
 0x5ee   : > { %3847 = vmatpush1.bf16.msra.mxu0 %v3535_v31 }
 0x5ef   : > { %3848 = vmatprep.subr.bf16.mxu0 %v3532_v24  ;;  %v3285_v24 = vrot.slane %v6686_v27, %v6267_v0 }
 0x5f2   : > { %3849 = vmatpush1.bf16.msra.mxu0 %v3531_v10  ;;  %v3552_v10 = vunpack.c.l.s8.bf16 %v4957_v9 }
 0x5f3   : > { %3850 = vmatprep.subr.bf16.mxu0 %v3528_v63 }
 0x5f6   : > { %3851 = vmatpush1.bf16.msra.mxu0 %v3527_v42 }
 0x5f7   : > { %3852 = vmatprep.subr.bf16.mxu0 %v3524_v44  ;;  %v4984_v44 = vld [vmem:[%s5951_s19 + $0x760] sm:$0xff] }
 0x5f8   : > { %v3607_v56 = vunpack.c.l.s8.bf16 %v4984_v44 }
 0x5fa   : > { %3853 = vmatpush1.bf16.msra.mxu0 %v3523_v45 }
 0x5fb   : > { %3854 = vmatprep.subr.bf16.mxu0 %v3520_v47  ;;  %v3611_v47 = vunpack.c.h.s8.bf16 %v4984_v44  ;;  %v5000_v44 = vld [vmem:[%s5951_s19 + $0x7e0] sm:$0xff] }
 0x5fe   : > { %3855 = vmatpush1.bf16.msra.mxu0 %v3519_v38 }
 0x5ff   : > { %3856 = vmatprep.subr.bf16.mxu0 %v3580_v30  ;;  %v3608_v30 = vunpack.c.l.s8.bf16 %v6682_v46 }
 0x602   : > { %3857 = vmatpush2.bf16.msra.mxu0 %v3579_v54  ;;  %v4981_v54 = vld [vmem:[%s5951_s19 + $0x748] sm:$0xff] }
 0x603   : > { %3858 = vmatprep.subr.bf16.mxu0 %v3576_v5  ;;  %v4951_v5 = vld [vmem:[%s5951_s19 + $0x658] sm:$0xff] }
 0x604   : > { %v3542_v46 = vunpack.c.h.s8.bf16 %v4951_v5 }
 0x606   : > { %3859 = vmatpush2.bf16.msra.mxu0 %v3575_v43  ;;  %v3545_v43 = vunpack.c.l.s8.bf16 %v4954_v40  ;;  %v4970_v40 = vld [vmem:[%s5951_s19 + $0x6f0] sm:$0xff] }
 0x607   : > { %3860 = vmatprep.subr.bf16.mxu0 %v3572_v2  ;;  %v3604_v2 = vunpack.c.h.s8.bf16 %v4981_v54 }
 0x60a   : > { %3861 = vmatpush2.bf16.msra.mxu0 %v3571_v59  ;;  %v4950_v59 = vld [vmem:[%s5951_s19 + $0x650] sm:$0xff] }
 0x60b   : > { %3862 = vmatprep.subr.bf16.mxu0 %v3568_v1  ;;  %v3603_v1 = vunpack.c.h.s8.bf16 %v4980_v3  ;;  %v3541_v37 = vunpack.c.h.s8.bf16 %v4950_v59  ;;  %v3537_v9 = vunpack.c.l.s8.bf16 %v4950_v59 }
 0x60e   : > { %3863 = vmatpush2.bf16.msra.mxu0 %v3567_v23  ;;  %v3600_v23 = vunpack.c.l.s8.bf16 %v4981_v54  ;;  %v3577_v54 = vunpack.c.l.s8.bf16 %v4970_v40 }
 0x60f   : > { %3864 = vmatprep.subr.bf16.mxu0 %v3564_v19  ;;  %v3538_v19 = vunpack.c.l.s8.bf16 %v4951_v5 }
 0x611   : > { %v3241_v12 = vpop.f32.mrf.mxu1 }
 0x612   : > { %v3242_v13 = vadd.f32 %v3241_v12, %v6688_v48  ;;  %3865 = vmatpush2.bf16.msra.mxu0 %v3563_v22  ;;  %v3083_v48 = vmul.f32 %v6394_v8, %v6676_v11  ;;  %v3551_v8 = vunpack.c.l.s8.bf16 %v4956_v16  ;;  %v4947_v22 = vld [vmem:[%s5951_s19 + $0x638] sm:$0xff]  ;;  %v4976_v12 = vld [vmem:[%s5951_s19 + $0x720] sm:$0xff]  ;;  %v3592_v16 = vunpack.c.l.s8.bf16 %v4977_v4 }
 0x613   : > { %v3243_v35 = vpop.f32.mrf.mxu1  ;;  %3866 = vmatprep.subr.bf16.mxu0 %v3560_v26  ;;  %v3599_v26 = vunpack.c.l.s8.bf16 %v4980_v3 }
 0x614   : > { %v3261_v18 = vmul.f32 %v6623_v52, %v3242_v13  ;;  %v3244_v33 = vadd.f32 %v3243_v35, %v6690_v51  ;;  %v4955_v51 = vld [vmem:[%s5951_s19 + $0x678] sm:$0xff]  ;;  %v3534_v13 = vunpack.c.h.s8.bf16 %v4947_v22  ;;  %v3595_v35 = vunpack.c.h.s8.bf16 %v4976_v12 }
 0x615   : > { %v3245_v21 = vpop.f32.mrf.mxu1  ;;  %v3546_v7 = vunpack.c.l.s8.bf16 %v4955_v51 }
 0x616   : > { %v3265_v34 = vadd.f32 %v3261_v18, %v3082_v17  ;;  %v3262_v31 = vmul.f32 %v6623_v52, %v3244_v33  ;;  %3867 = vmatpush2.bf16.msra.mxu0 %v3559_v6  ;;  %v3550_v52 = vunpack.c.h.s8.bf16 %v4955_v51  ;;  %v4946_v6 = vld [vmem:[%s5951_s19 + $0x630] sm:$0xff]  ;;  %v3530_v17 = vunpack.c.l.s8.bf16 %v4947_v22  ;;  %v4973_v18 = vld [vmem:[%s5951_s19 + $0x708] sm:$0xff]  ;;  %v4971_v51 = vld [vmem:[%s5951_s19 + $0x6f8] sm:$0xff] }
 0x617   : > { %v3246_v25 = vpop.f32.mrf.mxu1  ;;  %3868 = vmatprep.subr.bf16.mxu0 %v3556_v62  ;;  %v3533_v62 = vunpack.c.h.s8.bf16 %v4946_v6  ;;  %v3591_v33 = vunpack.c.l.s8.bf16 %v4976_v12  ;;  %v3588_v21 = vunpack.c.h.s8.bf16 %v4973_v18 }
 0x618   : > { %v3292_v63 = vadd.f32 %v3281_v20, %v3265_v34  ;;  %v3266_v32 = vadd.f32 %v3262_v31, %v3083_v48  ;;  %v4943_v20 = vld [vmem:[%s5951_s19 + $0x618] sm:$0xff]  ;;  %v3529_v48 = vunpack.c.l.s8.bf16 %v4946_v6  ;;  %v4972_v34 = vld [vmem:[%s5951_s19 + $0x700] sm:$0xff] }
 0x619   : > { %v3526_v31 = vunpack.c.h.s8.bf16 %v4943_v20 }
 0x61a   : > { %v3293_v42 = vadd.f32 %v3285_v24, %v3266_v32  ;;  %3869 = vmatpush2.bf16.msra.mxu0 %v3555_v14  ;;  %v3296_v11 = vmax.f32 %v3292_v63, 0.0  ;;  %v4942_v24 = vld [vmem:[%s5951_s19 + $0x610] sm:$0xff]  ;;  %v3587_v14 = vunpack.c.h.s8.bf16 %v4972_v34  ;;  %v3522_v63 = vunpack.c.l.s8.bf16 %v4943_v20  ;;  %v5001_v32 = vld [vmem:[%s5951_s19 + $0x7e8] sm:$0xff] }
 0x61b   : > { %3870 = vmatprep.subr.bf16.mxu0 %v3552_v10  ;;  %v3525_v25 = vunpack.c.h.s8.bf16 %v4942_v24  ;;  %v3584_v10 = vunpack.c.l.s8.bf16 %v4973_v18 }
 0x61c   : > { %v3297_v27 = vmax.f32 %v3293_v42, 0.0  ;;  %v3300_v38 = vpack.c.bf16 %v3296_v11, %v3296_v11  ;;  %v3583_v42 = vunpack.c.l.s8.bf16 %v4972_v34  ;;  %v3644_v11 = vunpack.c.h.s8.bf16 %v5001_v32 }
 0x61e   : > { %v3301_v45 = vpack.c.bf16 %v3297_v27, %v3297_v27  ;;  %3871 = vmatpush2.bf16.msra.mxu0 %v3551_v8  ;;  %v3521_v8 = vunpack.c.l.s8.bf16 %v4942_v24  ;;  %v3643_v27 = vunpack.c.h.s8.bf16 %v5000_v44 }
 0x61f   : > { %3922 = vmatprep.subr.bf16.mxu0 %v3550_v52  ;;  %v3582_v52 = vunpack.c.h.s8.bf16 %v4971_v51 }
 0x620   : > { %3423 = vmatprep.mubr.bf16.mxu1 %v3301_v45  ;;  %v3581_v45 = vunpack.c.h.s8.bf16 %v4970_v40 }
 0x621   : > { %3424 = vmatmul.mubr.bf16.vlgmr.msra.gmra.mxu1 %v3300_v38  ;;  %3873 = vmatmul.mubr.bf16.vlgmr.msra.gmra.mxu0 %v6032_v60  ;;  %v4997_v38 = vld [vmem:[%s5951_s19 + $0x7c8] sm:$0xff] }
 0x622   : > { %3882 = vmatpush1.bf16.msra.mxu1 %v3611_v47  ;;  %3923 = vmatpush1.bf16.msra.mxu0 %v3549_v41  ;;  %v3640_v47 = vunpack.c.l.s8.bf16 %v5001_v32  ;;  %v3578_v41 = vunpack.c.l.s8.bf16 %v4971_v51  ;;  %v3636_v5 = vunpack.c.h.s8.bf16 %v4997_v38  ;;  %v3632_v59 = vunpack.c.l.s8.bf16 %v4997_v38 }
 0x623   : > { %3883 = vmatprep.subr.bf16.mxu1 %v3608_v30  ;;  %3924 = vmatprep.subr.bf16.mxu0 %v3546_v7  ;;  %v4967_v30 = vld [vmem:[%s5951_s19 + $0x6d8] sm:$0xff]  ;;  %v3639_v7 = vunpack.c.l.s8.bf16 %v5000_v44 }
 0x624   : > { %3913 = vmatprep.mubr.bf16.mxu1 %v5992_v55  ;;  %3954 = vmatprep.mubr.bf16.mxu0 %v5986_v53  ;;  %v3596_v53 = vunpack.c.h.s8.bf16 %v4977_v4 }
 0x626   : > { %3884 = vmatpush1.bf16.msra.mxu1 %v3607_v56  ;;  %3925 = vmatpush1.bf16.msra.mxu0 %v3545_v43  ;;  %v4996_v56 = vld [vmem:[%s5951_s19 + $0x7c0] sm:$0xff]  ;;  %v3574_v43 = vunpack.c.h.s8.bf16 %v4967_v30 }
 0x627   : > { %3885 = vmatprep.subr.bf16.mxu1 %v3604_v2  ;;  %3926 = vmatprep.subr.bf16.mxu0 %v3542_v46  ;;  %v4966_v2 = vld [vmem:[%s5951_s19 + $0x6d0] sm:$0xff]  ;;  %v3635_v3 = vunpack.c.h.s8.bf16 %v4996_v56 }
 0x628   : > { %v3573_v46 = vunpack.c.h.s8.bf16 %v4966_v2  ;;  %v3569_v4 = vunpack.c.l.s8.bf16 %v4966_v2 }
 0x62a   : > { %3886 = vmatpush1.bf16.msra.mxu1 %v3603_v1  ;;  %3927 = vmatpush1.bf16.msra.mxu0 %v3541_v37  ;;  %v3570_v1 = vunpack.c.l.s8.bf16 %v4967_v30  ;;  %v4993_v37 = vld [vmem:[%s5951_s19 + $0x7a8] sm:$0xff] }
 0x62b   : > { %3887 = vmatprep.subr.bf16.mxu1 %v3600_v23  ;;  %3928 = vmatprep.subr.bf16.mxu0 %v3538_v19  ;;  %v4963_v23 = vld [vmem:[%s5951_s19 + $0x6b8] sm:$0xff]  ;;  %v3631_v19 = vunpack.c.l.s8.bf16 %v4996_v56  ;;  %v3628_v22 = vunpack.c.h.s8.bf16 %v4993_v37  ;;  %v3624_v6 = vunpack.c.l.s8.bf16 %v4993_v37  ;;  %v4978_v37 = vld [vmem:[%s5951_s19 + $0x730] sm:$0xff] }
 0x62e   : > { %3888 = vmatpush1.bf16.msra.mxu1 %v3599_v26  ;;  %3929 = vmatpush1.bf16.msra.mxu0 %v3537_v9  ;;  %v4992_v26 = vld [vmem:[%s5951_s19 + $0x7a0] sm:$0xff]  ;;  %v3566_v9 = vunpack.c.h.s8.bf16 %v4963_v23 }
 0x62f   : > { %3889 = vmatprep.subr.bf16.mxu1 %v3596_v53  ;;  %3930 = vmatprep.subr.bf16.mxu0 %v3534_v13  ;;  %v4962_v53 = vld [vmem:[%s5951_s19 + $0x6b0] sm:$0xff]  ;;  %v3627_v12 = vunpack.c.h.s8.bf16 %v4992_v26 }
 0x630   : > { %v3565_v13 = vunpack.c.h.s8.bf16 %v4962_v53  ;;  %v3561_v18 = vunpack.c.l.s8.bf16 %v4962_v53  ;;  %v4975_v53 = vld [vmem:[%s5951_s19 + $0x718] sm:$0xff] }
 0x632   : > { %3890 = vmatpush1.bf16.msra.mxu1 %v3595_v35  ;;  %3931 = vmatpush1.bf16.msra.mxu0 %v3533_v62  ;;  %v3562_v35 = vunpack.c.l.s8.bf16 %v4963_v23  ;;  %v4989_v62 = vld [vmem:[%s5951_s19 + $0x788] sm:$0xff] }
 0x633   : > { %3891 = vmatprep.subr.bf16.mxu1 %v3592_v16  ;;  %3932 = vmatprep.subr.bf16.mxu0 %v3530_v17  ;;  %v4959_v16 = vld [vmem:[%s5951_s19 + $0x698] sm:$0xff]  ;;  %v3623_v17 = vunpack.c.l.s8.bf16 %v4992_v26  ;;  %v3620_v20 = vunpack.c.h.s8.bf16 %v4989_v62  ;;  %v3616_v24 = vunpack.c.l.s8.bf16 %v4989_v62  ;;  %v4974_v62 = vld [vmem:[%s5951_s19 + $0x710] sm:$0xff] }
 0x636   : > { %3892 = vmatpush1.bf16.msra.mxu1 %v3591_v33  ;;  %3933 = vmatpush1.bf16.msra.mxu0 %v3529_v48  ;;  %v4988_v33 = vld [vmem:[%s5951_s19 + $0x780] sm:$0xff]  ;;  %v3558_v48 = vunpack.c.h.s8.bf16 %v4959_v16 }
 0x637   : > { %3893 = vmatprep.subr.bf16.mxu1 %v3588_v21  ;;  %3934 = vmatprep.subr.bf16.mxu0 %v3526_v31  ;;  %v4958_v21 = vld [vmem:[%s5951_s19 + $0x690] sm:$0xff]  ;;  %v3619_v34 = vunpack.c.h.s8.bf16 %v4988_v33 }
 0x638   : > { %v3557_v31 = vunpack.c.h.s8.bf16 %v4958_v21  ;;  %v3553_v32 = vunpack.c.l.s8.bf16 %v4958_v21  ;;  %v5003_v21 = vld [vmem:[%s5951_s19 + $0x7f8] sm:$0xff] }
 0x63a   : > { %3894 = vmatpush1.bf16.msra.mxu1 %v3587_v14  ;;  %3935 = vmatpush1.bf16.msra.mxu0 %v3525_v25  ;;  %v3554_v14 = vunpack.c.l.s8.bf16 %v4959_v16  ;;  %v4987_v25 = vld [vmem:[%s5951_s19 + $0x778] sm:$0xff] }
 0x63b   : > { %3895 = vmatprep.subr.bf16.mxu1 %v3584_v10  ;;  %3936 = vmatprep.subr.bf16.mxu0 %v3522_v63  ;;  %v5017_v10 = vld [vmem:[%s6072_s20 + $0x668] sm:$0xff]  ;;  %v3615_v63 = vunpack.c.l.s8.bf16 %v4988_v33  ;;  %v3614_v51 = vunpack.c.h.s8.bf16 %v4987_v25  ;;  %v3610_v40 = vunpack.c.l.s8.bf16 %v4987_v25  ;;  %v3586_v33 = vunpack.c.l.s8.bf16 %v4975_v53  ;;  %v5002_v25 = vld [vmem:[%s5951_s19 + $0x7f0] sm:$0xff] }
 0x63e   : > { %3896 = vmatpush1.bf16.msra.mxu1 %v3583_v42  ;;  %3937 = vmatpush1.bf16.msra.mxu0 %v3521_v8  ;;  %v4986_v42 = vld [vmem:[%s5951_s19 + $0x770] sm:$0xff]  ;;  %v3741_v8 = vunpack.c.h.s8.bf16 %v5017_v10 }
 0x63f   : > { %3897 = vmatprep.subr.bf16.mxu1 %v3644_v11  ;;  %3938 = vmatprep.subr.bf16.mxu0 %v3582_v52  ;;  %v5016_v11 = vld [vmem:[%s6072_s20 + $0x660] sm:$0xff]  ;;  %v3613_v44 = vunpack.c.h.s8.bf16 %v4986_v42 }
 0x640   : > { %v3740_v52 = vunpack.c.h.s8.bf16 %v5016_v11  ;;  %v3736_v38 = vunpack.c.l.s8.bf16 %v5016_v11  ;;  %v4999_v11 = vld [vmem:[%s5951_s19 + $0x7d8] sm:$0xff] }
 0x642   : > { %3898 = vmatpush2.bf16.msra.mxu1 %v3643_v27  ;;  %3939 = vmatpush2.bf16.msra.mxu0 %v3581_v45  ;;  %v3737_v27 = vunpack.c.l.s8.bf16 %v5017_v10  ;;  %v4983_v45 = vld [vmem:[%s5951_s19 + $0x758] sm:$0xff] }
 0x643   : > { %3899 = vmatprep.subr.bf16.mxu1 %v3640_v47  ;;  %3940 = vmatprep.subr.bf16.mxu0 %v3578_v41  ;;  %v5013_v47 = vld [vmem:[%s6072_s20 + $0x648] sm:$0xff]  ;;  %v3609_v41 = vunpack.c.l.s8.bf16 %v4986_v42  ;;  %v3606_v30 = vunpack.c.h.s8.bf16 %v4983_v45  ;;  %v3642_v42 = vunpack.c.l.s8.bf16 %v5003_v21 }
 0x644   : > { %v3729_v2 = vunpack.c.l.s8.bf16 %v5013_v47 }
 0x646   : > { %3900 = vmatpush2.bf16.msra.mxu1 %v3639_v7  ;;  %3941 = vmatpush2.bf16.msra.mxu0 %v3577_v54  ;;  %v4982_v7 = vld [vmem:[%s5951_s19 + $0x750] sm:$0xff]  ;;  %v3733_v54 = vunpack.c.h.s8.bf16 %v5013_v47 }
 0x647   : > { %3901 = vmatprep.subr.bf16.mxu1 %v3636_v5  ;;  %3942 = vmatprep.subr.bf16.mxu0 %v3574_v43  ;;  %v5012_v5 = vld [vmem:[%s6072_s20 + $0x640] sm:$0xff]  ;;  %v3605_v56 = vunpack.c.h.s8.bf16 %v4982_v7  ;;  %v3602_v43 = vunpack.c.l.s8.bf16 %v4983_v45  ;;  %v4998_v45 = vld [vmem:[%s5951_s19 + $0x7d0] sm:$0xff] }
 0x64a   : > { %3902 = vmatpush2.bf16.msra.mxu1 %v3635_v3  ;;  %3943 = vmatpush2.bf16.msra.mxu0 %v3573_v46  ;;  %v4979_v3 = vld [vmem:[%s5951_s19 + $0x738] sm:$0xff]  ;;  %v5009_v46 = vld [vmem:[%s6072_s20 + $0x628] sm:$0xff] }
 0x64b   : > { %3903 = vmatprep.subr.bf16.mxu1 %v3632_v59  ;;  %3944 = vmatprep.subr.bf16.mxu0 %v3570_v1  ;;  %v3601_v59 = vunpack.c.l.s8.bf16 %v4982_v7  ;;  %v3728_v1 = vunpack.c.l.s8.bf16 %v5012_v5  ;;  %v3725_v23 = vunpack.c.h.s8.bf16 %v5009_v46  ;;  %v3594_v26 = vunpack.c.l.s8.bf16 %v4979_v3 }
 0x64c   : > { %v3634_v7 = vunpack.c.l.s8.bf16 %v4999_v11 }
 0x64e   : > { %3904 = vmatpush2.bf16.msra.mxu1 %v3631_v19  ;;  %3945 = vmatpush2.bf16.msra.mxu0 %v3569_v4  ;;  %v5008_v19 = vld [vmem:[%s6072_s20 + $0x620] sm:$0xff]  ;;  %v3597_v4 = vunpack.c.h.s8.bf16 %v4978_v37 }
 0x64f   : > { %3905 = vmatprep.subr.bf16.mxu1 %v3628_v22  ;;  %3946 = vmatprep.subr.bf16.mxu0 %v3566_v9  ;;  %v3724_v22 = vunpack.c.h.s8.bf16 %v5008_v19  ;;  %v3721_v9 = vunpack.c.l.s8.bf16 %v5009_v46 }
 0x652   : > { %3906 = vmatpush2.bf16.msra.mxu1 %v3627_v12  ;;  %3947 = vmatpush2.bf16.msra.mxu0 %v3565_v13  ;;  %v5005_v12 = vld [vmem:[%s6072_s20 + $0x608] sm:$0xff]  ;;  %v3593_v13 = vunpack.c.l.s8.bf16 %v4978_v37 }
 0x653   : > { %3907 = vmatprep.subr.bf16.mxu1 %v3624_v6  ;;  %3948 = vmatprep.subr.bf16.mxu0 %v3562_v35  ;;  %v3720_v6 = vunpack.c.l.s8.bf16 %v5008_v19  ;;  %v3590_v35 = vunpack.c.h.s8.bf16 %v4975_v53  ;;  %v3717_v16 = vunpack.c.h.s8.bf16 %v5005_v12  ;;  %v4991_v19 = vld [vmem:[%s5951_s19 + $0x798] sm:$0xff]  ;;  %v4990_v53 = vld [vmem:[%s5951_s19 + $0x790] sm:$0xff] }
 0x656   : > { %3908 = vmatpush2.bf16.msra.mxu1 %v3623_v17  ;;  %3949 = vmatpush2.bf16.msra.mxu0 %v3561_v18  ;;  %v5004_v17 = vld [vmem:[%s6072_s20 + $0x600] sm:$0xff]  ;;  %v3589_v18 = vunpack.c.h.s8.bf16 %v4974_v62 }
 0x657   : > { %3909 = vmatprep.subr.bf16.mxu1 %v3620_v20  ;;  %3950 = vmatprep.subr.bf16.mxu0 %v3558_v48  ;;  %v3716_v20 = vunpack.c.h.s8.bf16 %v5004_v17  ;;  %v3713_v48 = vunpack.c.l.s8.bf16 %v5005_v12 }
 0x65a   : > { %3910 = vmatpush2.bf16.msra.mxu1 %v3619_v34  ;;  %3951 = vmatpush2.bf16.msra.mxu0 %v3557_v31  ;;  %v5033_v34 = vld [vmem:[%s6072_s20 + $0x6e8] sm:$0xff]  ;;  %v3585_v31 = vunpack.c.l.s8.bf16 %v4974_v62  ;;  %v3618_v62 = vunpack.c.l.s8.bf16 %v4991_v19 }
 0x65b   : > { %3911 = vmatprep.subr.bf16.mxu1 %v3616_v24  ;;  %3952 = vmatprep.subr.bf16.mxu0 %v3554_v14  ;;  %v3712_v24 = vunpack.c.l.s8.bf16 %v5004_v17  ;;  %v3646_v14 = vunpack.c.h.s8.bf16 %v5003_v21  ;;  %v3773_v10 = vunpack.c.h.s8.bf16 %v5033_v34  ;;  %v5049_v17 = vld [vmem:[%s6072_s20 + $0x768] sm:$0xff]  ;;  %v5048_v21 = vld [vmem:[%s6072_s20 + $0x760] sm:$0xff] }
 0x65e   : > { %3912 = vmatpush2.bf16.msra.mxu1 %v3615_v63  ;;  %3953 = vmatpush2.bf16.msra.mxu0 %v3553_v32  ;;  %v5032_v63 = vld [vmem:[%s6072_s20 + $0x6e0] sm:$0xff]  ;;  %v3645_v32 = vunpack.c.h.s8.bf16 %v5002_v25 }
 0x65f   : > { %3963 = vmatprep.subr.bf16.mxu1 %v3614_v51  ;;  %4019 = vmatprep.subr.bf16.mxu0 %v3741_v8  ;;  %v3772_v51 = vunpack.c.h.s8.bf16 %v5032_v63  ;;  %v3769_v8 = vunpack.c.l.s8.bf16 %v5033_v34 }
 0x661   : > { %3914 = vmatmul.mubr.bf16.vlgmr.msra.gmra.mxu1 %v6036_v61  ;;  %3955 = vmatmul.mubr.bf16.vlgmr.msra.gmra.mxu0 %v6032_v60  ;;  %v3732_v60 = vunpack.c.h.s8.bf16 %v5012_v5  ;;  %v4995_v5 = vld [vmem:[%s5951_s19 + $0x7b8] sm:$0xff] }
 0x662   : > { %3964 = vmatpush1.bf16.msra.mxu1 %v3613_v44  ;;  %4020 = vmatpush1.bf16.msra.mxu0 %v3740_v52  ;;  %v5029_v44 = vld [vmem:[%s6072_s20 + $0x6c8] sm:$0xff]  ;;  %v3641_v52 = vunpack.c.l.s8.bf16 %v5002_v25  ;;  %v3626_v37 = vunpack.c.l.s8.bf16 %v4995_v5  ;;  %v3801_v25 = vunpack.c.l.s8.bf16 %v5049_v17 }
 0x663   : > { %3965 = vmatprep.subr.bf16.mxu1 %v3610_v40  ;;  %4021 = vmatprep.subr.bf16.mxu0 %v3737_v27  ;;  %v3768_v40 = vunpack.c.l.s8.bf16 %v5032_v63  ;;  %v3638_v27 = vunpack.c.h.s8.bf16 %v4999_v11  ;;  %v3765_v47 = vunpack.c.h.s8.bf16 %v5029_v44  ;;  %v5045_v63 = vld [vmem:[%s6072_s20 + $0x748] sm:$0xff] }
 0x664   : > { %3995 = vmatprep.mubr.bf16.mxu1 %v5992_v55  ;;  %4051 = vmatprep.mubr.bf16.mxu0 %v6090_v49  ;;  %v3598_v55 = vunpack.c.h.s8.bf16 %v4979_v3  ;;  %v4994_v3 = vld [vmem:[%s5951_s19 + $0x7b0] sm:$0xff]  ;;  %s7016_s19 = sld [smem:[#allocation20_spill]] }
 0x666   : > { %3966 = vmatpush1.bf16.msra.mxu1 %v3609_v41  ;;  %4022 = vmatpush1.bf16.msra.mxu0 %v3736_v38  ;;  %v5028_v41 = vld [vmem:[%s6072_s20 + $0x6c0] sm:$0xff]  ;;  %v3637_v38 = vunpack.c.h.s8.bf16 %v4998_v45 }
 0x667   : > { %3967 = vmatprep.subr.bf16.mxu1 %v3606_v30  ;;  %4023 = vmatprep.subr.bf16.mxu0 %v3733_v54  ;;  %v3764_v30 = vunpack.c.h.s8.bf16 %v5028_v41  ;;  %v3761_v54 = vunpack.c.l.s8.bf16 %v5029_v44  ;;  %v3797_v44 = vunpack.c.h.s8.bf16 %v5045_v63 }
 0x66a   : > { %3968 = vmatpush1.bf16.msra.mxu1 %v3605_v56  ;;  %4024 = vmatpush1.bf16.msra.mxu0 %v3732_v60  ;;  %v5025_v56 = vld [vmem:[%s6072_s20 + $0x6a8] sm:$0xff]  ;;  %v3633_v60 = vunpack.c.l.s8.bf16 %v4998_v45  ;;  %p7018_p0 = scmp.ne.s32.totalorder %s7016_s19, 0 }
 0x66b   : > { %3969 = vmatprep.subr.bf16.mxu1 %v3602_v43  ;;  %4025 = vmatprep.subr.bf16.mxu0 %v3729_v2  ;;  %v3760_v43 = vunpack.c.l.s8.bf16 %v5028_v41  ;;  %v3630_v2 = vunpack.c.h.s8.bf16 %v4995_v5  ;;  %v3757_v46 = vunpack.c.h.s8.bf16 %v5025_v56  ;;  %v5011_v5 = vld [vmem:[%s6072_s20 + $0x638] sm:$0xff] }
 0x66e   : > { %3970 = vmatpush1.bf16.msra.mxu1 %v3601_v59  ;;  %4026 = vmatpush1.bf16.msra.mxu0 %v3728_v1  ;;  %v5024_v59 = vld [vmem:[%s6072_s20 + $0x6a0] sm:$0xff]  ;;  %v3629_v1 = vunpack.c.h.s8.bf16 %v4994_v3 }
 0x66f   : > { %3971 = vmatprep.subr.bf16.mxu1 %v3598_v55  ;;  %4027 = vmatprep.subr.bf16.mxu0 %v3725_v23  ;;  %v3756_v55 = vunpack.c.h.s8.bf16 %v5024_v59  ;;  %v3753_v23 = vunpack.c.l.s8.bf16 %v5025_v56 }
 0x672   : > { %3972 = vmatpush1.bf16.msra.mxu1 %v3597_v4  ;;  %4028 = vmatpush1.bf16.msra.mxu0 %v3724_v22  ;;  %v5021_v4 = vld [vmem:[%s6072_s20 + $0x688] sm:$0xff]  ;;  %v3625_v22 = vunpack.c.l.s8.bf16 %v4994_v3  ;;  %v5010_v3 = vld [vmem:[%s6072_s20 + $0x630] sm:$0xff] }
 0x673   : > { %3973 = vmatprep.subr.bf16.mxu1 %v3594_v26  ;;  %4029 = vmatprep.subr.bf16.mxu0 %v3721_v9  ;;  %v3752_v26 = vunpack.c.l.s8.bf16 %v5024_v59  ;;  %v3622_v9 = vunpack.c.h.s8.bf16 %v4991_v19  ;;  %v3749_v12 = vunpack.c.h.s8.bf16 %v5021_v4  ;;  %v3726_v59 = vunpack.c.h.s8.bf16 %v5010_v3 }
 0x676   : > { %3974 = vmatpush1.bf16.msra.mxu1 %v3593_v13  ;;  %4030 = vmatpush1.bf16.msra.mxu0 %v3720_v6  ;;  %v5020_v13 = vld [vmem:[%s6072_s20 + $0x680] sm:$0xff]  ;;  %v3621_v6 = vunpack.c.h.s8.bf16 %v4990_v53 }
 0x677   : > { %3975 = vmatprep.subr.bf16.mxu1 %v3590_v35  ;;  %4031 = vmatprep.subr.bf16.mxu0 %v3717_v16  ;;  %v3748_v35 = vunpack.c.h.s8.bf16 %v5020_v13  ;;  %v3745_v16 = vunpack.c.l.s8.bf16 %v5021_v4  ;;  %v3722_v4 = vunpack.c.l.s8.bf16 %v5010_v3  ;;  %v5023_v3 = vld [vmem:[%s6072_s20 + $0x698] sm:$0xff] }
 0x67a   : > { %3976 = vmatpush1.bf16.msra.mxu1 %v3589_v18  ;;  %4032 = vmatpush1.bf16.msra.mxu0 %v3716_v20  ;;  %v5019_v18 = vld [vmem:[%s6072_s20 + $0x678] sm:$0xff]  ;;  %v3617_v20 = vunpack.c.l.s8.bf16 %v4990_v53  ;;  %v5006_v53 = vld [vmem:[%s6072_s20 + $0x610] sm:$0xff] }
 0x67b   : > { %3977 = vmatprep.subr.bf16.mxu1 %v3586_v33  ;;  %4033 = vmatprep.subr.bf16.mxu0 %v3713_v48  ;;  %v3744_v33 = vunpack.c.l.s8.bf16 %v5020_v13  ;;  %v3805_v48 = vunpack.c.h.s8.bf16 %v5049_v17  ;;  %v3743_v34 = vunpack.c.h.s8.bf16 %v5019_v18  ;;  %v3718_v13 = vunpack.c.h.s8.bf16 %v5006_v53 }
 0x67e   : > { %3978 = vmatpush1.bf16.msra.mxu1 %v3585_v31  ;;  %4034 = vmatpush1.bf16.msra.mxu0 %v3712_v24  ;;  %v5018_v31 = vld [vmem:[%s6072_s20 + $0x670] sm:$0xff]  ;;  %v3804_v24 = vunpack.c.h.s8.bf16 %v5048_v21 }
 0x67f   : > { %3979 = vmatprep.subr.bf16.mxu1 %v3646_v14  ;;  %4035 = vmatprep.subr.bf16.mxu0 %v3773_v10  ;;  %v3742_v14 = vunpack.c.h.s8.bf16 %v5018_v31  ;;  %v3739_v10 = vunpack.c.l.s8.bf16 %v5019_v18  ;;  %v3714_v18 = vunpack.c.l.s8.bf16 %v5006_v53 }
 0x682   : > { %3980 = vmatpush2.bf16.msra.mxu1 %v3645_v32  ;;  %4036 = vmatpush2.bf16.msra.mxu0 %v3772_v51  ;;  %v5015_v32 = vld [vmem:[%s6072_s20 + $0x658] sm:$0xff] }
 0x683   : > { %3981 = vmatprep.subr.bf16.mxu1 %v3642_v42  ;;  %4037 = vmatprep.subr.bf16.mxu0 %v3769_v8  ;;  %v3800_v42 = vunpack.c.l.s8.bf16 %v5048_v21  ;;  %v3738_v8 = vunpack.c.l.s8.bf16 %v5018_v31  ;;  %v5034_v21 = vld [vmem:[%s6072_s20 + $0x6f0] sm:$0xff] }
 0x684   : > { %v3774_v31 = vunpack.c.h.s8.bf16 %v5034_v21 }
 0x686   : > { %3982 = vmatpush2.bf16.msra.mxu1 %v3641_v52  ;;  %4038 = vmatpush2.bf16.msra.mxu0 %v3768_v40  ;;  %v5044_v52 = vld [vmem:[%s6072_s20 + $0x740] sm:$0xff]  ;;  %v3735_v40 = vunpack.c.h.s8.bf16 %v5015_v32 }
 0x687   : > { %3983 = vmatprep.subr.bf16.mxu1 %v3638_v27  ;;  %4039 = vmatprep.subr.bf16.mxu0 %v3765_v47  ;;  %v5014_v27 = vld [vmem:[%s6072_s20 + $0x650] sm:$0xff]  ;;  %v3796_v47 = vunpack.c.h.s8.bf16 %v5044_v52  ;;  %v3792_v56 = vunpack.c.l.s8.bf16 %v5044_v52 }
 0x688   : > { %v3734_v41 = vunpack.c.h.s8.bf16 %v5014_v27 }
 0x68a   : > { %3984 = vmatpush2.bf16.msra.mxu1 %v3637_v38  ;;  %4040 = vmatpush2.bf16.msra.mxu0 %v3764_v30  ;;  %v3793_v30 = vunpack.c.l.s8.bf16 %v5045_v63 }
 0x68b   : > { %3985 = vmatprep.subr.bf16.mxu1 %v3634_v7  ;;  %4041 = vmatprep.subr.bf16.mxu0 %v3761_v54  ;;  %v3731_v7 = vunpack.c.l.s8.bf16 %v5015_v32  ;;  %v5041_v54 = vld [vmem:[%s6072_s20 + $0x728] sm:$0xff]  ;;  %v3770_v32 = vunpack.c.l.s8.bf16 %v5034_v21  ;;  %v5046_v21 = vld [vmem:[%s6072_s20 + $0x750] sm:$0xff] }
 0x68e   : > { %3986 = vmatpush2.bf16.msra.mxu1 %v3633_v60  ;;  %4042 = vmatpush2.bf16.msra.mxu0 %v3760_v43  ;;  %v3730_v60 = vunpack.c.l.s8.bf16 %v5014_v27  ;;  %v5040_v43 = vld [vmem:[%s6072_s20 + $0x720] sm:$0xff] }
 0x68f   : > { %3987 = vmatprep.subr.bf16.mxu1 %v3630_v2  ;;  %4043 = vmatprep.subr.bf16.mxu0 %v3757_v46  ;;  %v3727_v2 = vunpack.c.h.s8.bf16 %v5011_v5  ;;  %v3788_v46 = vunpack.c.h.s8.bf16 %v5040_v43  ;;  %v3784_v19 = vunpack.c.l.s8.bf16 %v5040_v43 }
 0x692   : > { %3988 = vmatpush2.bf16.msra.mxu1 %v3629_v1  ;;  %4044 = vmatpush2.bf16.msra.mxu0 %v3756_v55  ;;  %v3785_v1 = vunpack.c.l.s8.bf16 %v5041_v54  ;;  %v3723_v55 = vunpack.c.l.s8.bf16 %v5011_v5  ;;  %v5026_v5 = vld [vmem:[%s6072_s20 + $0x6b0] sm:$0xff] }
 0x693   : > { %3989 = vmatprep.subr.bf16.mxu1 %v3626_v37  ;;  %4045 = vmatprep.subr.bf16.mxu0 %v3753_v23  ;;  %v5037_v37 = vld [vmem:[%s6072_s20 + $0x708] sm:$0xff]  ;;  %v5007_v23 = vld [vmem:[%s6072_s20 + $0x618] sm:$0xff] }
 0x696   : > { %3990 = vmatpush2.bf16.msra.mxu1 %v3625_v22  ;;  %4046 = vmatpush2.bf16.msra.mxu0 %v3752_v26  ;;  %v3781_v22 = vunpack.c.h.s8.bf16 %v5037_v37  ;;  %v5036_v26 = vld [vmem:[%s6072_s20 + $0x700] sm:$0xff] }
 0x697   : > { %3991 = vmatprep.subr.bf16.mxu1 %v3622_v9  ;;  %4047 = vmatprep.subr.bf16.mxu0 %v3749_v12  ;;  %v3719_v9 = vunpack.c.h.s8.bf16 %v5007_v23  ;;  %v3780_v12 = vunpack.c.h.s8.bf16 %v5036_v26  ;;  %v3776_v17 = vunpack.c.l.s8.bf16 %v5036_v26  ;;  %v3747_v26 = vunpack.c.l.s8.bf16 %v5023_v3 }
 0x69a   : > { %3992 = vmatpush2.bf16.msra.mxu1 %v3621_v6  ;;  %4048 = vmatpush2.bf16.msra.mxu0 %v3748_v35  ;;  %v3777_v6 = vunpack.c.l.s8.bf16 %v5037_v37  ;;  %v3715_v35 = vunpack.c.l.s8.bf16 %v5007_v23  ;;  %v3751_v37 = vunpack.c.h.s8.bf16 %v5023_v3  ;;  %v5022_v23 = vld [vmem:[%s6072_s20 + $0x690] sm:$0xff] }
 0x69b   : > { %3993 = vmatprep.subr.bf16.mxu1 %v3618_v62  ;;  %4049 = vmatprep.subr.bf16.mxu0 %v3745_v16  ;;  %v5065_v62 = vld [vmem:[%s6072_s20 + $0x7e8] sm:$0xff]  ;;  %v5035_v16 = vld [vmem:[%s6072_s20 + $0x6f8] sm:$0xff] }
 0x69e   : > { %3994 = vmatpush2.bf16.msra.mxu1 %v3617_v20  ;;  %4050 = vmatpush2.bf16.msra.mxu0 %v3744_v33  ;;  %v3837_v20 = vunpack.c.h.s8.bf16 %v5065_v62  ;;  %v5064_v33 = vld [vmem:[%s6072_s20 + $0x7e0] sm:$0xff] }
 0x69f   : > { %4060 = vmatprep.subr.bf16.mxu1 %v3805_v48  ;;  %4101 = vmatprep.subr.bf16.mxu0 %v3743_v34  ;;  %v3775_v48 = vunpack.c.h.s8.bf16 %v5035_v16  ;;  %v3836_v34 = vunpack.c.h.s8.bf16 %v5064_v33  ;;  %v3832_v63 = vunpack.c.l.s8.bf16 %v5064_v33 }
 0x6a1   : > { %3996 = vmatmul.mubr.bf16.vlgmr.msra.gmra.mxu1 %v6036_v61  ;;  %v5212_v51 = vpop.f32.mrf.mxu0  ;;  %4052 = vmatmul.mubr.bf16.vlgmr.msra.gmra.mxu0 %v6139_v28 }
 0x6a2   : > { %4061 = vmatpush1.bf16.msra.mxu1 %v3804_v24  ;;  %4102 = vmatpush1.bf16.msra.mxu0 %v3742_v14  ;;  %v3833_v24 = vunpack.c.l.s8.bf16 %v5065_v62  ;;  %v3771_v14 = vunpack.c.l.s8.bf16 %v5035_v16  ;;  %v5047_v16 = vld [vmem:[%s6072_s20 + $0x758] sm:$0xff] }
 0x6a3   : > { %v5213_v11 = vpop.f32.mrf.mxu0  ;;  %4062 = vmatprep.subr.bf16.mxu1 %v3801_v25  ;;  %4103 = vmatprep.subr.bf16.mxu0 %v3739_v10  ;;  %v5061_v25 = vld [vmem:[%s6072_s20 + $0x7c8] sm:$0xff]  ;;  %v5031_v10 = vld [vmem:[%s6072_s20 + $0x6d8] sm:$0xff] }
 0x6a4   : > { %v6811_v45 = vadd.f32 %v5213_v11, %v5212_v51  ;;  %4092 = vmatprep.mubr.bf16.mxu1 %v6092_v50  ;;  %4133 = vmatprep.mubr.bf16.mxu0 %v6090_v49  ;;  %v3789_v49 = vunpack.c.h.s8.bf16 %v5041_v54  ;;  %v3829_v51 = vunpack.c.h.s8.bf16 %v5061_v25  ;;  %v5030_v11 = vld [vmem:[%s6072_s20 + $0x6d0] sm:$0xff]  ;;  %v3763_v27 = vunpack.c.l.s8.bf16 %v5031_v10 }
 0x6a5   : > { %v5215_v61 = vpop.f32.mrf.mxu0  ;;  %v3766_v52 = vunpack.c.h.s8.bf16 %v5030_v11 }
 0x6a6   : > { %4063 = vmatpush1.bf16.msra.mxu1 %v3800_v42  ;;  %4104 = vmatpush1.bf16.msra.mxu0 %v3738_v8  ;;  %v5060_v42 = vld [vmem:[%s6072_s20 + $0x7c0] sm:$0xff]  ;;  %v3767_v8 = vunpack.c.h.s8.bf16 %v5031_v10  ;;  %v5057_v61 = vld [vmem:[%s6072_s20 + $0x7a8] sm:$0xff]  ;;  %v3798_v10 = vunpack.c.h.s8.bf16 %v5046_v21 }
 0x6a7   : > { %v5216_v38 = vpop.f32.mrf.mxu0  ;;  %4064 = vmatprep.subr.bf16.mxu1 %v3797_v44  ;;  %4105 = vmatprep.subr.bf16.mxu0 %v3735_v40  ;;  %v3828_v44 = vunpack.c.h.s8.bf16 %v5060_v42  ;;  %v3825_v40 = vunpack.c.l.s8.bf16 %v5061_v25 }
 0x6a8   : > { %v3762_v38 = vunpack.c.l.s8.bf16 %v5030_v11 }
 0x6aa   : > { %4065 = vmatpush1.bf16.msra.mxu1 %v3796_v47  ;;  %4106 = vmatpush1.bf16.msra.mxu0 %v3734_v41  ;;  %v5027_v47 = vld [vmem:[%s6072_s20 + $0x6b8] sm:$0xff]  ;;  %v3824_v41 = vunpack.c.l.s8.bf16 %v5060_v42  ;;  %v5080_v42 = vld [vmem:[%s6189_s12 + $0x1b8] sm:$0xff] }
 0x6ab   : > { %4066 = vmatprep.subr.bf16.mxu1 %v3793_v30  ;;  %4107 = vmatprep.subr.bf16.mxu0 %v3731_v7  ;;  %v3821_v30 = vunpack.c.h.s8.bf16 %v5057_v61  ;;  %v5056_v7 = vld [vmem:[%s6072_s20 + $0x7a0] sm:$0xff]  ;;  %v3759_v54 = vunpack.c.h.s8.bf16 %v5027_v47  ;;  %v3755_v43 = vunpack.c.l.s8.bf16 %v5027_v47 }
 0x6ae   : > { %4067 = vmatpush1.bf16.msra.mxu1 %v3792_v56  ;;  %4108 = vmatpush1.bf16.msra.mxu0 %v3730_v60  ;;  %v3820_v56 = vunpack.c.h.s8.bf16 %v5056_v7  ;;  %v3758_v60 = vunpack.c.h.s8.bf16 %v5026_v5 }
 0x6af   : > { %4068 = vmatprep.subr.bf16.mxu1 %v3789_v49  ;;  %4109 = vmatprep.subr.bf16.mxu0 %v3727_v2  ;;  %v3817_v49 = vunpack.c.l.s8.bf16 %v5057_v61  ;;  %v5053_v2 = vld [vmem:[%s6072_s20 + $0x788] sm:$0xff]  ;;  %v5079_v61 = vld [vmem:[%s6189_s12 + $0x1b0] sm:$0xff] }
 0x6b2   : > { %4069 = vmatpush1.bf16.msra.mxu1 %v3788_v46  ;;  %4110 = vmatpush1.bf16.msra.mxu0 %v3726_v59  ;;  %v3816_v46 = vunpack.c.l.s8.bf16 %v5056_v7  ;;  %v3754_v59 = vunpack.c.l.s8.bf16 %v5026_v5  ;;  %v4267_v7 = vunpack.c.h.s8.bf16 %v5079_v61 }
 0x6b3   : > { %4070 = vmatprep.subr.bf16.mxu1 %v3785_v1  ;;  %4111 = vmatprep.subr.bf16.mxu0 %v3723_v55  ;;  %v3813_v1 = vunpack.c.h.s8.bf16 %v5053_v2  ;;  %v5052_v55 = vld [vmem:[%s6072_s20 + $0x780] sm:$0xff] }
 0x6b4   : > { %v3808_v53 = vunpack.c.l.s8.bf16 %v5052_v55 }
 0x6b6   : > { %4071 = vmatpush1.bf16.msra.mxu1 %v3784_v19  ;;  %4112 = vmatpush1.bf16.msra.mxu0 %v3722_v4  ;;  %v3812_v19 = vunpack.c.h.s8.bf16 %v5052_v55  ;;  %v3750_v4 = vunpack.c.h.s8.bf16 %v5022_v23 }
 0x6b7   : > { %4072 = vmatprep.subr.bf16.mxu1 %v3781_v22  ;;  %4113 = vmatprep.subr.bf16.mxu0 %v3719_v9  ;;  %v3809_v22 = vunpack.c.l.s8.bf16 %v5053_v2  ;;  %v5051_v9 = vld [vmem:[%s6072_s20 + $0x778] sm:$0xff] }
 0x6b8   : > { %v3803_v62 = vunpack.c.l.s8.bf16 %v5051_v9 }
 0x6ba   : > { %4073 = vmatpush1.bf16.msra.mxu1 %v3780_v12  ;;  %4114 = vmatpush1.bf16.msra.mxu0 %v3718_v13  ;;  %v3746_v12 = vunpack.c.l.s8.bf16 %v5022_v23  ;;  %v3807_v13 = vunpack.c.h.s8.bf16 %v5051_v9  ;;  %v5063_v9 = vld [vmem:[%s6072_s20 + $0x7d8] sm:$0xff] }
 0x6bb   : > { %4074 = vmatprep.subr.bf16.mxu1 %v3777_v6  ;;  %4115 = vmatprep.subr.bf16.mxu0 %v3715_v35  ;;  %v5050_v6 = vld [vmem:[%s6072_s20 + $0x770] sm:$0xff] }
 0x6bc   : > { %v3806_v35 = vunpack.c.h.s8.bf16 %v5050_v6 }
 0x6be   : > { %4075 = vmatpush1.bf16.msra.mxu1 %v3776_v17  ;;  %4116 = vmatpush1.bf16.msra.mxu0 %v3714_v18 }
 0x6bf   : > { %4076 = vmatprep.subr.bf16.mxu1 %v3837_v20  ;;  %4117 = vmatprep.subr.bf16.mxu0 %v3775_v48  ;;  %v3802_v20 = vunpack.c.l.s8.bf16 %v5050_v6  ;;  %v3799_v48 = vunpack.c.h.s8.bf16 %v5047_v16 }
 0x6c2   : > { %4077 = vmatpush2.bf16.msra.mxu1 %v3836_v34  ;;  %4118 = vmatpush2.bf16.msra.mxu0 %v3774_v31 }
 0x6c3   : > { %4078 = vmatprep.subr.bf16.mxu1 %v3833_v24  ;;  %4119 = vmatprep.subr.bf16.mxu0 %v3771_v14 }
 0x6c6   : > { %4079 = vmatpush2.bf16.msra.mxu1 %v3832_v63  ;;  %4120 = vmatpush2.bf16.msra.mxu0 %v3770_v32  ;;  %v4938_v63 = vld [vmem:[%s6413_s0 + $0x2] ss:$0 sm:$0xff]  ;;  %v3795_v32 = vunpack.c.l.s8.bf16 %v5047_v16 }
 0x6c7   : > { %4080 = vmatprep.subr.bf16.mxu1 %v3829_v51  ;;  %4121 = vmatprep.subr.bf16.mxu0 %v3767_v8  ;;  %v5076_v8 = vld [vmem:[%s6189_s12 + $0x198] sm:$0xff] }
 0x6ca   : > { %4081 = vmatpush2.bf16.msra.mxu1 %v3828_v44  ;;  %4122 = vmatpush2.bf16.msra.mxu0 %v3766_v52  ;;  %v5043_v44 = vld [vmem:[%s6072_s20 + $0x738] sm:$0xff]  ;;  %v4269_v52 = vunpack.c.h.s8.bf16 %v5080_v42 }
 0x6cb   : > { %4082 = vmatprep.subr.bf16.mxu1 %v3825_v40  ;;  %4123 = vmatprep.subr.bf16.mxu0 %v3763_v27  ;;  %v4261_v40 = vunpack.c.h.s8.bf16 %v5076_v8  ;;  %v4268_v27 = vunpack.c.l.s8.bf16 %v5080_v42 }
 0x6ce   : > { %4083 = vmatpush2.bf16.msra.mxu1 %v3824_v41  ;;  %4124 = vmatpush2.bf16.msra.mxu0 %v3762_v38  ;;  %v3791_v41 = vunpack.c.h.s8.bf16 %v5043_v44  ;;  %v5042_v38 = vld [vmem:[%s6072_s20 + $0x730] sm:$0xff] }
 0x6cf   : > { %4084 = vmatprep.subr.bf16.mxu1 %v3821_v30  ;;  %4125 = vmatprep.subr.bf16.mxu0 %v3759_v54  ;;  %v4260_v30 = vunpack.c.l.s8.bf16 %v5076_v8  ;;  %v5075_v54 = vld [vmem:[%s6189_s12 + $0x190] sm:$0xff]  ;;  %v3790_v5 = vunpack.c.h.s8.bf16 %v5042_v38  ;;  %v3786_v2 = vunpack.c.l.s8.bf16 %v5042_v38 }
 0x6d2   : > { %4085 = vmatpush2.bf16.msra.mxu1 %v3820_v56  ;;  %4126 = vmatpush2.bf16.msra.mxu0 %v3758_v60  ;;  %v3787_v56 = vunpack.c.l.s8.bf16 %v5043_v44  ;;  %v4259_v60 = vunpack.c.h.s8.bf16 %v5075_v54 }
 0x6d3   : > { %4086 = vmatprep.subr.bf16.mxu1 %v3817_v49  ;;  %4127 = vmatprep.subr.bf16.mxu0 %v3755_v43  ;;  %v5039_v49 = vld [vmem:[%s6072_s20 + $0x718] sm:$0xff]  ;;  %v4266_v43 = vunpack.c.l.s8.bf16 %v5079_v61 }
 0x6d4   : > { %v3783_v3 = vunpack.c.h.s8.bf16 %v5039_v49  ;;  %v3779_v55 = vunpack.c.l.s8.bf16 %v5039_v49 }
 0x6d6   : > { %4087 = vmatpush2.bf16.msra.mxu1 %v3816_v46  ;;  %4128 = vmatpush2.bf16.msra.mxu0 %v3754_v59  ;;  %v5038_v46 = vld [vmem:[%s6072_s20 + $0x710] sm:$0xff]  ;;  %v4258_v59 = vunpack.c.l.s8.bf16 %v5075_v54 }
 0x6d7   : > { %4088 = vmatprep.subr.bf16.mxu1 %v3813_v1  ;;  %4129 = vmatprep.subr.bf16.mxu0 %v3751_v37  ;;  %v3782_v1 = vunpack.c.h.s8.bf16 %v5038_v46  ;;  %v5067_v37 = vld [vmem:[%s6072_s20 + $0x7f8] sm:$0xff]  ;;  %v3778_v23 = vunpack.c.l.s8.bf16 %v5038_v46 }
 0x6da   : > { %4089 = vmatpush2.bf16.msra.mxu1 %v3812_v19  ;;  %4130 = vmatpush2.bf16.msra.mxu0 %v3750_v4  ;;  %v3839_v19 = vunpack.c.h.s8.bf16 %v5067_v37  ;;  %v5066_v4 = vld [vmem:[%s6072_s20 + $0x7f0] sm:$0xff] }
 0x6db   : > { %4090 = vmatprep.subr.bf16.mxu1 %v3809_v22  ;;  %4131 = vmatprep.subr.bf16.mxu0 %v3747_v26  ;;  %v3838_v22 = vunpack.c.h.s8.bf16 %v5066_v4  ;;  %v3835_v26 = vunpack.c.l.s8.bf16 %v5067_v37 }
 0x6de   : > { %4091 = vmatpush2.bf16.msra.mxu1 %v3808_v53  ;;  %4132 = vmatpush2.bf16.msra.mxu0 %v3746_v12  ;;  %v3834_v53 = vunpack.c.l.s8.bf16 %v5066_v4  ;;  %v3831_v12 = vunpack.c.h.s8.bf16 %v5063_v9  ;;  %v5082_v4 = vld [vmem:[%s6189_s12 + $0x1c8] sm:$0xff] }
 0x6df   : > { %4142 = vmatprep.subr.bf16.mxu1 %v3807_v13  ;;  %5240 = vmatprep.subr.bf16.mxu0 %v4269_v52  ;;  %v5062_v13 = vld [vmem:[%s6072_s20 + $0x7d0] sm:$0xff] }
 0x6e0   : > { %v3830_v6 = vunpack.c.h.s8.bf16 %v5062_v13  ;;  %v3826_v16 = vunpack.c.l.s8.bf16 %v5062_v13 }
 0x6e1   : > { %4093 = vmatmul.mubr.bf16.vlgmr.msra.gmra.mxu1 %v6143_v29  ;;  %v5234_v17 = vpop.f32.mrf.mxu1  ;;  %4134 = vmatmul.mubr.bf16.vlgmr.msra.gmra.mxu0 %v6139_v28  ;;  %v6844_v18 = vpop.f32.mrf.mxu0 }
 0x6e2   : > { %4143 = vmatpush1.bf16.msra.mxu1 %v3806_v35  ;;  %4174 = vmatprep.mubr.bf16.mxu1 %v6092_v50  ;;  %v3440_v28 = vpop.permute.xlu0 %3439  ;;  %v3827_v35 = vunpack.c.l.s8.bf16 %v5063_v9 }
 0x6e3   : > { %v5235_v33 = vpop.f32.mrf.mxu1  ;;  %4144 = vmatprep.subr.bf16.mxu1 %v3803_v62  ;;  %v6848_v34 = vpop.f32.mrf.mxu0  ;;  %5241 = vmatpush3.bf16.msra.mxu0 %v4261_v40  ;;  %v5059_v62 = vld [vmem:[%s6072_s20 + $0x7b8] sm:$0xff] }
 0x6e4   : > { %v5236_v31 = vadd.f32 %v5235_v33, %v5234_v17  ;;  %5242 = vmatprep.subr.bf16.mxu0 %v4268_v27  ;;  %v3823_v17 = vunpack.c.h.s8.bf16 %v5059_v62 }
 0x6e5   : > { %v5237_v24 = vpop.f32.mrf.mxu1  ;;  %v3878_v14 = vpop.f32.mrf.mxu0 }
 0x6e6   : > { %v3426_v25 = vadd.f32 %v5236_v31, %v6811_v45  ;;  %4145 = vmatpush1.bf16.msra.mxu1 %v3802_v20  ;;  %v3794_v45 = vunpack.c.l.s8.bf16 %v5046_v21  ;;  %v5058_v20 = vld [vmem:[%s6072_s20 + $0x7b0] sm:$0xff]  ;;  %v5055_v21 = vld [vmem:[%s6072_s20 + $0x798] sm:$0xff] }
 0x6e7   : > { %v5238_v50 = vpop.f32.mrf.mxu1  ;;  %4146 = vmatprep.subr.bf16.mxu1 %v3799_v48  ;;  %v3879_v51 = vpop.f32.mrf.mxu0  ;;  %5243 = vmatpush3.bf16.msra.mxu0 %v4260_v30  ;;  %v3822_v33 = vunpack.c.h.s8.bf16 %v5058_v20  ;;  %v3819_v48 = vunpack.c.l.s8.bf16 %v5059_v62  ;;  %v3818_v31 = vunpack.c.l.s8.bf16 %v5058_v20  ;;  %v3815_v24 = vunpack.c.h.s8.bf16 %v5055_v21  ;;  %v5054_v14 = vld [vmem:[%s6072_s20 + $0x790] sm:$0xff]  ;;  %s4403_s20 = sshll.u32 %s6421_s30, 4  ;;  %s6912_s20 = int_to_ptr.vmem [resolvable:$true] %s4403_s20 }
 0x6e8   : > { %v3442_v11 = vmul.f32 %v3440_v28, %v3426_v25  ;;  %5244 = vmatprep.subr.bf16.mxu0 %v4267_v7  ;;  %v3814_v28 = vunpack.c.h.s8.bf16 %v5054_v14  ;;  %v3811_v25 = vunpack.c.l.s8.bf16 %v5055_v21  ;;  %v5073_v30 = vld [vmem:[%s6189_s12 + $0x180] sm:$0xff]  ;;  %v4272_v62 = vunpack.c.l.s8.bf16 %v5082_v4  ;;  %s5544_s17 = scalar_lea.vmem %s6912_s20, 128  ;;  %p5551_p6 = scmp.lt.s32.totalorder %s6912_s20, %s5549_s18 }
 0x6e9   : > { %v4255_v7 = vunpack.c.h.s8.bf16 %v5073_v30  ;;  %v5085_v20 = vld [vmem:[%s6189_s12 + $0x1e0] sm:$0xff]  ;;  %p5545_p2 = scmp.ne.s32.totalorder %s6912_s20, %s5544_s17  ;;  %p5552_p13 = scmp.lt.s32.totalorder %s5550_s26, %s5544_s17 }
 0x6ea   : > { %v3451_v47 = vadd.f32 %v4938_v63, %v3442_v11  ;;  %4147 = vmatpush1.bf16.msra.mxu1 %v3798_v10  ;;  %v3810_v10 = vunpack.c.l.s8.bf16 %v5054_v14  ;;  %v5078_v63 = vld [vmem:[%s6189_s12 + $0x1a8] sm:$0xff]  ;;  %v4279_v21 = vunpack.c.h.s8.bf16 %v5085_v20  ;;  %v4278_v14 = vunpack.c.l.s8.bf16 %v5085_v20  ;;  %v5092_v20 = vld [vmem:[%s6413_s0 + $0x3] ss:$0 sm:$0xff] }
 0x6eb   : > { %4148 = vmatprep.subr.bf16.mxu1 %v3795_v32  ;;  %5245 = vmatpush3.bf16.msra.mxu0 %v4259_v60  ;;  %v4265_v50 = vunpack.c.h.s8.bf16 %v5078_v63  ;;  %v5074_v32 = vld [vmem:[%s6189_s12 + $0x188] sm:$0xff]  ;;  %v4264_v40 = vunpack.c.l.s8.bf16 %v5078_v63  ;;  %p5546_p4 = pnand %p5545_p2, %p7018_p0  ;;  %p5553_p7 = por %p5552_p13, %p5551_p6 }
 0x6ec   : > { %4939 = vst.msk [vmem:[%s6421_s30 + $0x4] sm:$0x3] %vm1582_vm0, %v3451_v47  ;;  %5246 = vmatprep.subr.bf16.mxu0 %v4266_v43  ;;  %v4257_v51 = vunpack.c.h.s8.bf16 %v5074_v32  ;;  %v4256_v61 = vunpack.c.l.s8.bf16 %v5074_v32 }
 0x6ed   : > { %p5547_p11 = pneg %p5546_p4 }
 0x6ee   : > { %4149 = vmatpush1.bf16.msra.mxu1 %v3794_v45 }
 0x6ef   : > { %4150 = vmatprep.subr.bf16.mxu1 %v3791_v41  ;;  %5247 = vmatpush3.bf16.msra.mxu0 %v4258_v59  ;;  %v5083_v59 = vld [vmem:[%s6189_s12 + $0x1d0] sm:$0xff]  ;;  %p5554_p5 = pnand %p5553_p7, %p5547_p11 }
 0x6f0   : > { %5248 = vmatprep.subr.bf16.mxu0 %v4265_v50  ;;  %v4274_v37 = vunpack.c.l.s8.bf16 %v5083_v59 }
 0x6f2   : > { %4151 = vmatpush1.bf16.msra.mxu1 %v3790_v5  ;;  %v5088_v5 = vld [vmem:[%s6189_s12 + $0x1f8] sm:$0xff] }
 0x6f3   : > { %4152 = vmatprep.subr.bf16.mxu1 %v3787_v56  ;;  %5249 = vmatpush3.bf16.msra.mxu0 %v4257_v51  ;;  %v5084_v56 = vld [vmem:[%s6189_s12 + $0x1d8] sm:$0xff]  ;;  %v4285_v60 = vunpack.c.h.s8.bf16 %v5088_v5  ;;  %v4284_v43 = vunpack.c.l.s8.bf16 %v5088_v5 }
 0x6f4   : > { %5250 = vmatprep.subr.bf16.mxu0 %v4264_v40  ;;  %v4277_v49 = vunpack.c.h.s8.bf16 %v5084_v56 }
 0x6f6   : > { %4153 = vmatpush1.bf16.msra.mxu1 %v3786_v2  ;;  %v5087_v2 = vld [vmem:[%s6189_s12 + $0x1f0] sm:$0xff] }
 0x6f7   : > { %4154 = vmatprep.subr.bf16.mxu1 %v3783_v3  ;;  %5251 = vmatpush3.bf16.msra.mxu0 %v4256_v61  ;;  %v4276_v3 = vunpack.c.l.s8.bf16 %v5084_v56  ;;  %v4283_v46 = vunpack.c.h.s8.bf16 %v5087_v2 }
 0x6fa   : > { %4155 = vmatpush1.bf16.msra.mxu1 %v3782_v1  ;;  %v4275_v1 = vunpack.c.h.s8.bf16 %v5083_v59 }
 0x6fb   : > { %4156 = vmatprep.subr.bf16.mxu1 %v3779_v55  ;;  %v4282_v55 = vunpack.c.l.s8.bf16 %v5087_v2 }
 0x6fe   : > { %4157 = vmatpush1.bf16.msra.mxu1 %v3778_v23  ;;  %v5086_v23 = vld [vmem:[%s6189_s12 + $0x1e8] sm:$0xff] }
 0x6ff   : > { %4158 = vmatprep.subr.bf16.mxu1 %v3839_v19  ;;  %v4281_v19 = vunpack.c.h.s8.bf16 %v5086_v23 }
 0x702   : > { %4159 = vmatpush2.bf16.msra.mxu1 %v3838_v22  ;;  %v4273_v22 = vunpack.c.h.s8.bf16 %v5082_v4 }
 0x703   : > { %4160 = vmatprep.subr.bf16.mxu1 %v3835_v26 }
 0x706   : > { %4161 = vmatpush2.bf16.msra.mxu1 %v3834_v53 }
 0x707   : > { %4162 = vmatprep.subr.bf16.mxu1 %v3831_v12 }
 0x70a   : > { %4163 = vmatpush2.bf16.msra.mxu1 %v3830_v6  ;;  %v4280_v6 = vunpack.c.l.s8.bf16 %v5086_v23 }
 0x70b   : > { %4164 = vmatprep.subr.bf16.mxu1 %v3827_v35 }
 0x70e   : > { %4165 = vmatpush2.bf16.msra.mxu1 %v3826_v16 }
 0x70f   : > { %4166 = vmatprep.subr.bf16.mxu1 %v3823_v17 }
 0x712   : > { %4167 = vmatpush2.bf16.msra.mxu1 %v3822_v33 }
 0x713   : > { %4168 = vmatprep.subr.bf16.mxu1 %v3819_v48 }
 0x716   : > { %4169 = vmatpush2.bf16.msra.mxu1 %v3818_v31  ;;  %v5081_v31 = vld [vmem:[%s6189_s12 + $0x1c0] sm:$0xff] }
 0x717   : > { %4170 = vmatprep.subr.bf16.mxu1 %v3815_v24  ;;  %v4271_v24 = vunpack.c.h.s8.bf16 %v5081_v31 }
 0x71a   : > { %4171 = vmatpush2.bf16.msra.mxu1 %v3814_v28  ;;  %v4270_v28 = vunpack.c.l.s8.bf16 %v5081_v31 }
 0x71b   : > { %4172 = vmatprep.subr.bf16.mxu1 %v3811_v25 }
 0x71e   : > { %4173 = vmatpush2.bf16.msra.mxu1 %v3810_v10  ;;  %v5072_v10 = vld [vmem:[%s6230_s29 + $0xc] sm:$0xf] }
 0x71f   : > { %5262 = vmatprep.subr.bf16.mxu1 %v4285_v60 }
 0x721   : > { %v3915_v42 = vpop.f32.mrf.mxu1  ;;  %4175 = vmatmul.mubr.bf16.vlgmr.msra.gmra.mxu1 %v6143_v29  ;;  %v3956_v8 = vpop.f32.mrf.mxu0  ;;  %v5077_v29 = vld [vmem:[%s6189_s12 + $0x1a0] sm:$0xff] }
 0x722   : > { %v6874_v11 = vadd.f32 %v3915_v42, %v6844_v18  ;;  %v4263_v18 = vunpack.c.h.s8.bf16 %v5077_v29  ;;  %v4262_v54 = vunpack.c.l.s8.bf16 %v5077_v29  ;;  %5263 = vmatpush3.bf16.msra.mxu1 %v4277_v49 }
 0x723   : > { %v3917_v44 = vpop.f32.mrf.mxu1  ;;  %v3958_v52 = vpop.f32.mrf.mxu0  ;;  %5264 = vmatprep.subr.bf16.mxu1 %v4284_v43 }
 0x724   : > { %v6877_v27 = vadd.f32 %v3917_v44, %v6848_v34  ;;  %5252 = vmatprep.subr.bf16.mxu0 %v4263_v18  ;;  %v4254_v34 = vunpack.c.l.s8.bf16 %v5073_v30  ;;  %v4015_v42 = vmul.f32 %v6397_v15, %v6874_v11  ;;  %v4208_v44 = vrot.slane %v5072_v10, %v6228_v36 }
 0x725   : > { %v3919_v47 = vpop.f32.mrf.mxu1  ;;  %v3960_v45 = vpop.f32.mrf.mxu0  ;;  %5253 = vmatpush3.bf16.msra.mxu0 %v4255_v7 }
 0x726   : > { %5254 = vmatprep.subr.bf16.mxu0 %v4262_v54  ;;  %5265 = vmatpush3.bf16.msra.mxu1 %v4276_v3  ;;  %v4016_v47 = vmul.f32 %v6397_v15, %v6877_v27 }
 0x727   : > { %v3920_v41 = vpop.f32.mrf.mxu1  ;;  %v3961_v38 = vpop.f32.mrf.mxu0  ;;  %5266 = vmatprep.subr.bf16.mxu1 %v4283_v46 }
 0x728   : > { %v4212_v41 = vrot.slane %v5072_v10, %v6236_v39  ;;  %v4216_v39 = vrot.slane %v5072_v10, %v6263_v57 }
 0x729   : > { %5255 = vmatpush3.bf16.msra.mxu0 %v4254_v34 }
 0x72a   : > { %5267 = vmatpush3.bf16.msra.mxu1 %v4275_v1 }
 0x72b   : > { %5268 = vmatprep.subr.bf16.mxu1 %v4282_v55  ;;  %v4220_v55 = vrot.slane %v5072_v10, %v6267_v0 }
 0x72e   : > { %5269 = vmatpush3.bf16.msra.mxu1 %v4274_v37 }
 0x72f   : > { %5270 = vmatprep.subr.bf16.mxu1 %v4281_v19 }
 0x732   : > { %5271 = vmatpush3.bf16.msra.mxu1 %v4273_v22 }
 0x733   : > { %5272 = vmatprep.subr.bf16.mxu1 %v4280_v6 }
 0x736   : > { %5273 = vmatpush3.bf16.msra.mxu1 %v4272_v62 }
 0x737   : > { %5274 = vmatprep.subr.bf16.mxu1 %v4279_v21 }
 0x73a   : > { %5275 = vmatpush3.bf16.msra.mxu1 %v4271_v24 }
 0x73b   : > { %5276 = vmatprep.subr.bf16.mxu1 %v4278_v14 }
 0x73e   : > { %5277 = vmatpush3.bf16.msra.mxu1 %v4270_v28 }
 0x761   : > { %v3997_v26 = vpop.f32.mrf.mxu1  ;;  %v4053_v9 = vpop.f32.mrf.mxu0 }
 0x762   : > { %v3998_v53 = vadd.f32 %v3997_v26, %v3956_v8 }
 0x763   : > { %v3999_v12 = vpop.f32.mrf.mxu1  ;;  %v4055_v13 = vpop.f32.mrf.mxu0 }
 0x764   : > { %v4000_v35 = vadd.f32 %v3999_v12, %v3958_v52  ;;  %v4017_v27 = vmul.f32 %v6397_v15, %v3998_v53 }
 0x765   : > { %v4001_v16 = vpop.f32.mrf.mxu1  ;;  %v4057_v17 = vpop.f32.mrf.mxu0 }
 0x766   : > { %v4018_v46 = vmul.f32 %v6397_v15, %v4000_v35  ;;  %v4375_v17 = vpop.permute.xlu1 %4374 }
 0x767   : > { %v4002_v33 = vpop.f32.mrf.mxu1  ;;  %v4058_v48 = vpop.f32.mrf.mxu0 }
 0x7a1   : > { %v4094_v25 = vpop.f32.mrf.mxu1  ;;  %v4135_v63 = vpop.f32.mrf.mxu0 }
 0x7a2   : > { %v4095_v50 = vadd.f32 %v4094_v25, %v4053_v9 }
 0x7a3   : > { %v4096_v32 = vpop.f32.mrf.mxu1  ;;  %v4137_v51 = vpop.f32.mrf.mxu0 }
 0x7a4   : > { %v4194_v8 = vmul.f32 %v6626_v58, %v4095_v50  ;;  %v4097_v52 = vadd.f32 %v4096_v32, %v4055_v13 }
 0x7a5   : > { %v4098_v40 = vpop.f32.mrf.mxu1  ;;  %v4139_v61 = vpop.f32.mrf.mxu0 }
 0x7a6   : > { %v4198_v45 = vadd.f32 %v4194_v8, %v4015_v42  ;;  %v4195_v29 = vmul.f32 %v6626_v58, %v4097_v52 }
 0x7a7   : > { %v4099_v38 = vpop.f32.mrf.mxu1  ;;  %v4140_v18 = vpop.f32.mrf.mxu0 }
 0x7a8   : > { %v4225_v30 = vadd.f32 %v4208_v44, %v4198_v45  ;;  %v4199_v7 = vadd.f32 %v4195_v29, %v4016_v47 }
 0x7aa   : > { %v4226_v11 = vadd.f32 %v4212_v41, %v4199_v7  ;;  %v4229_v54 = vmax.f32 %v4225_v30, 0.0 }
 0x7ac   : > { %v4230_v34 = vmax.f32 %v4226_v11, 0.0  ;;  %v4233_v36 = vpack.c.bf16 %v4229_v54, %v4229_v54 }
 0x7ae   : > { %v4234_v5 = vpack.c.bf16 %v4230_v34, %v4230_v34 }
 0x7b0   : > { %4318 = vmatprep.mubr.bf16.mxu0 %v4234_v5 }
 0x7b1   : > { %4319 = vmatmul.mubr.bf16.vlgmr.msra.gmra.mxu0 %v4233_v36 }
 0x7e1   : > { %v4176_v56 = vpop.f32.mrf.mxu1 }
 0x7e2   : > { %v4177_v60 = vadd.f32 %v4176_v56, %v4135_v63 }
 0x7e3   : > { %v4178_v49 = vpop.f32.mrf.mxu1 }
 0x7e4   : > { %v4196_v43 = vmul.f32 %v6626_v58, %v4177_v60  ;;  %v4179_v2 = vadd.f32 %v4178_v49, %v4137_v51 }
 0x7e5   : > { %v4180_v3 = vpop.f32.mrf.mxu1 }
 0x7e6   : > { %v4200_v59 = vadd.f32 %v4196_v43, %v4017_v27  ;;  %v4197_v1 = vmul.f32 %v6626_v58, %v4179_v2 }
 0x7e7   : > { %v4181_v37 = vpop.f32.mrf.mxu1 }
 0x7e8   : > { %v4227_v23 = vadd.f32 %v4216_v39, %v4200_v59  ;;  %v4201_v19 = vadd.f32 %v4197_v1, %v4018_v46 }
 0x7ea   : > { %v4228_v4 = vadd.f32 %v4220_v55, %v4201_v19  ;;  %v4231_v22 = vmax.f32 %v4227_v23, 0.0 }
 0x7ec   : > { %v4232_v26 = vmax.f32 %v4228_v4, 0.0  ;;  %v4235_v53 = vpack.c.bf16 %v4231_v22, %v4231_v22 }
 0x7ee   : > { %v4236_v9 = vpack.c.bf16 %v4232_v26, %v4232_v26 }
 0x7f0   : > { %4358 = vmatprep.mubr.bf16.mxu1 %v4236_v9 }
 0x7f1   : > { %4359 = vmatmul.mubr.bf16.vlgmr.msra.gmra.mxu1 %v4235_v53 }
 0x871   : > { %v5256_v57 = vpop.f32.mrf.mxu0 }
 0x873   : > { %v5257_v15 = vpop.f32.mrf.mxu0 }
 0x874   : > { %v5258_v12 = vadd.f32 %v5257_v15, %v5256_v57 }
 0x875   : > { %v5259_v13 = vpop.f32.mrf.mxu0 }
 0x877   : > { %v5260_v58 = vpop.f32.mrf.mxu0 }
 0x8b1   : > { %v5278_v0 = vpop.f32.mrf.mxu1 }
 0x8b3   : > { %v5279_v6 = vpop.f32.mrf.mxu1 }
 0x8b4   : > { %v5280_v35 = vadd.f32 %v5279_v6, %v5278_v0 }
 0x8b5   : > { %v5281_v62 = vpop.f32.mrf.mxu1 }
 0x8b6   : > { %v4361_v16 = vadd.f32 %v5280_v35, %v5258_v12 }
 0x8b7   : > { %v5282_v33 = vpop.f32.mrf.mxu1 }
 0x8b8   : > { %v4377_v48 = vmul.f32 %v4375_v17, %v4361_v16 }
 0x8ba   : > { %v4386_v21 = vadd.f32 %v5092_v20, %v4377_v48 }
 0x8bc   : > { %5093 = vst.msk [vmem:[%s6421_s30 + $0x6] sm:$0x3] %vm1582_vm0, %v4386_v21 }
 0x8bd   : > { %5557 = shalt.err (!%p5554_p5)
}
 0x8be   : > { %s5558_s25 = scalar_lea.hbm %s6910_s11, 128  ;;  %s5562_s29 = scalar_lea.hbm %s7017_s22, 256 }
 0x8bf   : > { %p5559_p8 = scmp.ne.s32.totalorder %s6910_s11, %s5558_s25  ;;  %p5563_p9 = scmp.lt.s32.totalorder %s6910_s11, %s7017_s22 }
 0x8c0   : > { %p5564_p3 = scmp.lt.s32.totalorder %s5562_s29, %s5558_s25 }
 0x8c1   : > { %p5560_p12 = pnand %p5559_p8, %p7018_p0 }
 0x8c2   : > { %p5565_p10 = por %p5564_p3, %p5563_p9 }
 0x8c3   : > { %p5561_p1 = pneg %p5560_p12 }
 0x8c5   : > { %p5566_p2 = pnand %p5565_p10, %p5561_p1 }
 0x8c7   : > { %5569 = shalt.err (!%p5566_p2)
}
 0x8c8   : > { %s5633_s0 = smov 32   ;;  %s5634_s30 = smov 2  }
 0x8c9   : > { %5300 = dma.vmem_to_hbm [thread:$0]  (%p7018_p0), %s6912_s20, 128, %s6910_s11, %s4390_s21, %s5633_s0, %s5633_s0, %s5634_s30  }
 0x8ca PF: > { %s7019_s15 = sld [smem:[#allocation16_spill]]  ;;  %p7022_p11 = scmp.ge.s32.totalorder %s5616_s16, 2 }
 0x8cb   : > { %s7020_s2 = sld [smem:[#allocation21_spill]] }
 0x8d0   : > { %s4418_s13 = sand.u32 1, %s7019_s15  }
 0x8d1   : > { %p7021_p4 = scmp.ne.s32.totalorder %s7020_s2, 0  ;;  %s4419_s17 = scalar_lea.sflag [#allocation4], %s4418_s13 }
 0x8d3   : > { %p5323_p6 = pnand %p7022_p11, %p7021_p4 }
 0x8d5   : > { %p5324_p13 = pneg %p5323_p6 }
 0x8d7   : > { %5599 = dma.done.wait (%p5324_p13), %s4419_s17, 128  }
 0x8d8   : > { %5601 = vsyncadd (%p5324_p13), %s4419_s17, 4294967168  ;;  %s7023_s16 = sld [smem:[#allocation18_spill]]  ;;  %s7026_s13 = smov %s5608_s14 }
 0x8d9   : > { %s7024_s10 = sld [smem:[#allocation17_spill]] }
 0x8da   : > { %s7025_s15 = sld [smem:[#allocation19_spill]] }
 0x8de   : > { %p22_p7 = scmp.ge.s32.totalorder %s7023_s16, 4  }
 0x8df   : > { %s7027_s14 = smov %s7024_s10 }
 0x8e0   :  { %24 = sbr.rel (!%p22_p7) target bundleno = 9 (0x9), region = 184 }
 0x8e5   :  { %4424 = vsyncpa [#allocation3], 1 }
 0x8e6   :  { %4426 = vsyncpa [#allocation3 + $0x1], 1 }
 0x8e7   :  { %4427 = vsyncpa [#allocation6], 1 }
 0x8e8   :  { %4428 = vsyncpa [#allocation4], 1 }
 0x8e9   :  { %4430 = vsyncpa [#allocation4 + $0x1], 1 }

</bundles_post_ra>
